<compile_context>
chip_gen: v7x
topology: tpu7x:2x2x1
jax: 0.10.0
libtpu: 0.0.40
codegen_flags: <defaults>
</compile_context>

<pallas_src>
import math

import jax
import jax.numpy as jnp
from jax.experimental import pallas as pl
from jax.experimental.pallas import tpu as pltpu

CHANNELS = 32
KSIZE = 3
NTAPS = 2 * KSIZE
BN_EPS = 1e-5


# ----------------------------------------------------------------------------
# Kernel 1: Conv1d(2->32,k=3,pad=1) [BN folded] + ReLU + Conv1d(32->1,k=1)
# x0p/x1p: conv-padded input rows [TB, D+2]; per-channel params in SMEM.
# The [TB, 32, D] intermediate is never materialized.
# ----------------------------------------------------------------------------
def feat_kernel(x0p_ref, x1p_ref, w1_ref, b1_ref, w2_ref, b2_ref, out_ref, taps_ref):
    TB, D = out_ref.shape

    # Build the 6 shifted conv taps once (static lane-offset slices; the XLU is
    # idle in this VALU-bound kernel) and stash them in VMEM scratch so the
    # channel loop re-loads instead of keeping 6 live slabs in vregs.
    for r, x_ref in enumerate((x0p_ref, x1p_ref)):
        for k in range(KSIZE):
            taps_ref[r * KSIZE + k] = x_ref[:, pl.ds(k, D)]

    acc = jnp.full((TB, D), b2_ref[0], dtype=jnp.float32)
    for c in range(CHANNELS):
        y = jnp.full((TB, D), b1_ref[c], dtype=jnp.float32)   # BN-folded bias
        for k in range(NTAPS):
            y = y + w1_ref[c * NTAPS + k] * taps_ref[k]        # BN-folded weight
        y = jnp.maximum(y, 0.0)                                # ReLU
        # TODO(synk): Dropout(0.2) is identity in eval mode; training-mode RNG dropout omitted.
        acc = acc + w2_ref[c] * y                              # 1x1 output conv
    out_ref[...] = acc


# ----------------------------------------------------------------------------
# Kernel 2: scores = pw * (cl_x @ emb.T) + (1-pw) * (cl_x @ his.T)
# Entity matrices stay in native [E, D] layout (contraction on dim 1 of both
# operands); the history mix is applied to the small [B, TE] results (O(B*E)
# VPU work) instead of the [D, TE] streaming tiles. Everything is f32.
# ----------------------------------------------------------------------------
def score_kernel(pw_ref, clx_ref, emb_ref, his_ref, out_ref):
    pw = pw_ref[0]
    dims = (((1,), (1,)), ((), ()))
    clx = clx_ref[...]
    s_emb = jax.lax.dot_general(clx, emb_ref[...], dims,
                                preferred_element_type=jnp.float32)
    s_his = jax.lax.dot_general(clx, his_ref[...], dims,
                                preferred_element_type=jnp.float32)
    out_ref[...] = pw * s_emb + (1.0 - pw) * s_his


def conv_transe_forward(embedding, emb_rel, triplets, his_emb, pre_weight, params,
                        *, batch_tile=32, entity_tile=2048):
    embedding = embedding.astype(jnp.float32)
    his_emb = his_emb.astype(jnp.float32)
    emb_rel = emb_rel.astype(jnp.float32)
    E, D = embedding.shape
    B = triplets.shape[0]

    # --- glue: embedding lookups (row gather stays in XLA) --------------------
    e1_embed = jnp.take(embedding, triplets[:, 0], axis=0)
    rel_embedded = jnp.take(emb_rel, triplets[:, 1], axis=0)

    # --- batch tiling (pad B up to a multiple of the batch tile) --------------
    TB = max(8, (min(batch_tile, B) // 8) * 8)
    B_pad = int(pl.cdiv(B, TB)) * TB
    pad_b = B_pad - B

    # conv padding=1 applied once on the lane axis; kernel slices the 3 taps.
    x0p = jnp.pad(e1_embed, ((0, pad_b), (1, 1)))
    x1p = jnp.pad(rel_embedded, ((0, pad_b), (1, 1)))

    # --- fold BatchNorm1d (eval mode) into conv1 weight/bias -------------------
    sc = params["gamma"] / jnp.sqrt(params["var"] + BN_EPS)
    w1f = (params["w1"] * sc[:, None, None]).reshape(-1).astype(jnp.float32)
    b1f = ((params["b1"] - params["mean"]) * sc + params["beta"]).astype(jnp.float32)
    w2f = params["w2"].reshape(-1).astype(jnp.float32)
    b2f = params["b2"].reshape(-1).astype(jnp.float32)

    smem_spec = pl.BlockSpec(memory_space=pltpu.MemorySpace.SMEM)

    cl_x_pad = pl.pallas_call(
        feat_kernel,
        out_shape=jax.ShapeDtypeStruct((B_pad, D), jnp.float32),
        grid=(B_pad // TB,),
        in_specs=[pl.BlockSpec((TB, D + 2), lambda i: (i, 0)),
                  pl.BlockSpec((TB, D + 2), lambda i: (i, 0)),
                  smem_spec, smem_spec, smem_spec, smem_spec],
        out_specs=pl.BlockSpec((TB, D), lambda i: (i, 0)),
        scratch_shapes=[pltpu.VMEM((NTAPS, TB, D), jnp.float32)],
        compiler_params=pltpu.CompilerParams(
            dimension_semantics=("parallel",)),
    )(x0p, x1p, w1f, b1f, w2f, b2f)

    # --- score kernel tiling / VMEM budget -------------------------------------
    # Budget counts: emb+his input tiles (double-buffered), f32 output tile
    # (double-buffered) and the resident cl_x. Conservative for v7x's 64 MiB VMEM.
    E_pad = int(pl.cdiv(E, 128)) * 128
    vmem_budget = 40 * 1024 * 1024
    fixed_bytes = 2 * B_pad * D * 4
    bytes_per_te = (2 * 2 * D + 2 * B_pad) * 4
    max_te = max(128, ((vmem_budget - fixed_bytes) // bytes_per_te) // 128 * 128)
    te_cap = max(128, (min(entity_tile, max_te, E_pad) // 128) * 128)
    TE = 128
    for cand in range(te_cap, 127, -128):       # largest 128-multiple dividing E_pad
        if E_pad % cand == 0:
            TE = cand
            break

    if E_pad != E:
        embedding_p = jnp.pad(embedding, ((0, E_pad - E), (0, 0)))
        his_p = jnp.pad(his_emb, ((0, E_pad - E), (0, 0)))
    else:
        embedding_p, his_p = embedding, his_emb

    pw_arr = jnp.asarray([pre_weight], dtype=jnp.float32)
    est_vmem = fixed_bytes + bytes_per_te * TE + (2 << 20)
    vmem_limit = int(min(56 * 1024 * 1024, max(est_vmem, 32 * 1024 * 1024)))

    scores_pad = pl.pallas_call(
        score_kernel,
        out_shape=jax.ShapeDtypeStruct((B_pad, E_pad), jnp.float32),
        grid=(E_pad // TE,),
        in_specs=[
            smem_spec,                                    # pre_weight scalar
            pl.BlockSpec((B_pad, D), lambda j: (0, 0)),   # cl_x (resident)
            pl.BlockSpec((TE, D), lambda j: (j, 0)),      # embedding tile (native layout)
            pl.BlockSpec((TE, D), lambda j: (j, 0)),      # his_emb tile (native layout)
        ],
        out_specs=pl.BlockSpec((B_pad, TE), lambda j: (0, j)),
        compiler_params=pltpu.CompilerParams(
            dimension_semantics=("parallel",),
            vmem_limit_bytes=vmem_limit),
    )(pw_arr, cl_x_pad, embedding_p, his_p)

    # Slice only when padding was actually added (skips a full-matrix copy when
    # shapes are already 8/128-aligned).
    scores = scores_pad if (B_pad == B and E_pad == E) else scores_pad[:B, :E]
    cl_x = cl_x_pad if B_pad == B else cl_x_pad[:B]
    return scores, cl_x


# ----------------------------------------------------------------------------
# Pure-JAX (f32) reference for verification
# ----------------------------------------------------------------------------
def reference_forward(embedding, emb_rel, triplets, his_emb, pre_weight, params):
    e1 = pre_weight * embedding + (1.0 - pre_weight) * his_emb
    e1_embed = embedding[triplets[:, 0]]
    rel_embedded = emb_rel[triplets[:, 1]]
    x = jnp.stack([e1_embed, rel_embedded], axis=1)              # [B, 2, D]
    y = jax.lax.conv_general_dilated(
        x, params["w1"], window_strides=(1,), padding=((1, 1),),
        dimension_numbers=("NCH", "OIH", "NCH")) + params["b1"][None, :, None]
    sc = params["gamma"] / jnp.sqrt(params["var"] + BN_EPS)
    sh = params["beta"] - params["mean"] * sc
    y = y * sc[None, :, None] + sh[None, :, None]
    y = jnp.maximum(y, 0.0)
    y = jax.lax.conv_general_dilated(
        y, params["w2"], window_strides=(1,), padding=((0, 0),),
        dimension_numbers=("NCH", "OIH", "NCH")) + params["b2"][None, :, None]
    cl_x = y[:, 0, :]
    scores = cl_x @ e1.T
    return scores, cl_x


if __name__ == "__main__":
    key = jax.random.PRNGKey(0)
    ks = jax.random.split(key, 12)

    # small deterministic problem sizes
    E, R, D, B = 256, 16, 32, 8        # num_entities, num_rels, embedding_dim, batch

    embedding = jax.random.normal(ks[0], (E, D), jnp.float32)
    emb_rel = jax.random.normal(ks[1], (R, D), jnp.float32)
    his_emb = jax.random.normal(ks[2], (E, D), jnp.float32)
    subj = jax.random.randint(ks[3], (B,), 0, E)
    rel = jax.random.randint(ks[4], (B,), 0, R)
    obj = jax.random.randint(ks[5], (B,), 0, E)
    triplets = jnp.stack([subj, rel, obj], axis=1).astype(jnp.int32)

    fan_in1 = 2 * KSIZE
    params = dict(
        w1=(jax.random.normal(ks[6], (CHANNELS, 2, KSIZE), jnp.float32)
            / math.sqrt(fan_in1)),
        b1=0.1 * jax.random.normal(ks[7], (CHANNELS,), jnp.float32),
        gamma=1.0 + 0.1 * jax.random.normal(ks[8], (CHANNELS,), jnp.float32),
        beta=0.1 * jax.random.normal(ks[9], (CHANNELS,), jnp.float32),
        mean=jnp.zeros((CHANNELS,), jnp.float32),
        var=jnp.ones((CHANNELS,), jnp.float32),
        w2=(jax.random.normal(ks[10], (1, CHANNELS, 1), jnp.float32)
            / math.sqrt(CHANNELS)),
        b2=0.1 * jax.random.normal(ks[11], (1,), jnp.float32),
    )
    pre_weight = 0.7

    scores, cl_x = conv_transe_forward(
        embedding, emb_rel, triplets, his_emb, pre_weight, params)
    scores = jax.block_until_ready(scores)
    cl_x = jax.block_until_ready(cl_x)

    ref_scores, ref_clx = reference_forward(
        embedding, emb_rel, triplets, his_emb, pre_weight, params)

    assert scores.shape == (B, E) and cl_x.shape == (B, D)
    # Both paths are full f32 now (the only differences are MXU accumulation
    # order / internal matmul passes), so tolerances can be tight.
    assert jnp.allclose(cl_x, ref_clx, atol=1e-4, rtol=1e-4), "cl_x mismatch"
    assert jnp.allclose(scores, ref_scores, atol=2e-2, rtol=2e-2), "scores mismatch"

    print("KERNEL_OK")
</pallas_src>

<mosaic_0001>
module attributes {stable_mosaic.version = 11 : i64} {
  func.func @feat_kernel(%arg0: i32, %arg1: memref<8x34xf32, #tpu.memory_space<vmem>>, %arg2: memref<8x34xf32, #tpu.memory_space<vmem>>, %arg3: memref<192xf32, #tpu.memory_space<smem>>, %arg4: memref<32xf32, #tpu.memory_space<smem>>, %arg5: memref<32xf32, #tpu.memory_space<smem>>, %arg6: memref<1xf32, #tpu.memory_space<smem>>, %arg7: memref<8x32xf32, #tpu.memory_space<vmem>>, %arg8: memref<6x8x32xf32, #tpu.memory_space<vmem>>) attributes {dimension_semantics = [#tpu.dimension_semantics<parallel>], iteration_bounds = array<i64: 1>, scalar_prefetch = 0 : i64, scratch_operands = 1 : i64, tpu.core_type = #tpu.core_type<tc>, window_params = [{transform_indices = @transform_0, window_bounds = array<i64: 8, 34>}, {transform_indices = @transform_1, window_bounds = array<i64: 8, 34>}, {transform_indices = @transform_2, window_bounds = array<i64: 192>}, {transform_indices = @transform_3, window_bounds = array<i64: 32>}, {transform_indices = @transform_4, window_bounds = array<i64: 32>}, {transform_indices = @transform_5, window_bounds = array<i64: 1>}, {transform_indices = @transform_6, window_bounds = array<i64: 8, 32>}]} {
    %c0 = arith.constant 0 : index
    %c0_0 = arith.constant 0 : index
    %0 = vector.load %arg1[%c0, %c0_0] : memref<8x34xf32, #tpu.memory_space<vmem>>, vector<8x32xf32>
    %c0_1 = arith.constant 0 : index
    %c0_2 = arith.constant 0 : index
    %c0_3 = arith.constant 0 : index
    %1 = vector.load %arg8[%c0_1, %c0_2, %c0_3] : memref<6x8x32xf32, #tpu.memory_space<vmem>>, vector<1x8x32xf32>
    %2 = vector.shape_cast %1 : vector<1x8x32xf32> to vector<8x32xf32>
    %3 = vector.shape_cast %0 : vector<8x32xf32> to vector<1x8x32xf32>
    tpu.vector_store %arg8[%c0_1, %c0_2, %c0_3], %3 {strides = array<i32>} : memref<6x8x32xf32, #tpu.memory_space<vmem>>, vector<1x8x32xf32>,
    %c0_4 = arith.constant 0 : index
    %c1 = arith.constant 1 : index
    %4 = vector.load %arg1[%c0_4, %c1] : memref<8x34xf32, #tpu.memory_space<vmem>>, vector<8x32xf32>
    %c1_5 = arith.constant 1 : index
    %c0_6 = arith.constant 0 : index
    %c0_7 = arith.constant 0 : index
    %5 = vector.load %arg8[%c1_5, %c0_6, %c0_7] : memref<6x8x32xf32, #tpu.memory_space<vmem>>, vector<1x8x32xf32>
    %6 = vector.shape_cast %5 : vector<1x8x32xf32> to vector<8x32xf32>
    %7 = vector.shape_cast %4 : vector<8x32xf32> to vector<1x8x32xf32>
    tpu.vector_store %arg8[%c1_5, %c0_6, %c0_7], %7 {strides = array<i32>} : memref<6x8x32xf32, #tpu.memory_space<vmem>>, vector<1x8x32xf32>,
    %c0_8 = arith.constant 0 : index
    %c2 = arith.constant 2 : index
    %8 = vector.load %arg1[%c0_8, %c2] : memref<8x34xf32, #tpu.memory_space<vmem>>, vector<8x32xf32>
    %c2_9 = arith.constant 2 : index
    %c0_10 = arith.constant 0 : index
    %c0_11 = arith.constant 0 : index
    %9 = vector.load %arg8[%c2_9, %c0_10, %c0_11] : memref<6x8x32xf32, #tpu.memory_space<vmem>>, vector<1x8x32xf32>
    %10 = vector.shape_cast %9 : vector<1x8x32xf32> to vector<8x32xf32>
    %11 = vector.shape_cast %8 : vector<8x32xf32> to vector<1x8x32xf32>
    tpu.vector_store %arg8[%c2_9, %c0_10, %c0_11], %11 {strides = array<i32>} : memref<6x8x32xf32, #tpu.memory_space<vmem>>, vector<1x8x32xf32>,
    %c0_12 = arith.constant 0 : index
    %c0_13 = arith.constant 0 : index
    %12 = vector.load %arg2[%c0_12, %c0_13] : memref<8x34xf32, #tpu.memory_space<vmem>>, vector<8x32xf32>
    %c3 = arith.constant 3 : index
    %c0_14 = arith.constant 0 : index
    %c0_15 = arith.constant 0 : index
    %13 = vector.load %arg8[%c3, %c0_14, %c0_15] : memref<6x8x32xf32, #tpu.memory_space<vmem>>, vector<1x8x32xf32>
    %14 = vector.shape_cast %13 : vector<1x8x32xf32> to vector<8x32xf32>
    %15 = vector.shape_cast %12 : vector<8x32xf32> to vector<1x8x32xf32>
    tpu.vector_store %arg8[%c3, %c0_14, %c0_15], %15 {strides = array<i32>} : memref<6x8x32xf32, #tpu.memory_space<vmem>>, vector<1x8x32xf32>,
    %c0_16 = arith.constant 0 : index
    %c1_17 = arith.constant 1 : index
    %16 = vector.load %arg2[%c0_16, %c1_17] : memref<8x34xf32, #tpu.memory_space<vmem>>, vector<8x32xf32>
    %c4 = arith.constant 4 : index
    %c0_18 = arith.constant 0 : index
    %c0_19 = arith.constant 0 : index
    %17 = vector.load %arg8[%c4, %c0_18, %c0_19] : memref<6x8x32xf32, #tpu.memory_space<vmem>>, vector<1x8x32xf32>
    %18 = vector.shape_cast %17 : vector<1x8x32xf32> to vector<8x32xf32>
    %19 = vector.shape_cast %16 : vector<8x32xf32> to vector<1x8x32xf32>
    tpu.vector_store %arg8[%c4, %c0_18, %c0_19], %19 {strides = array<i32>} : memref<6x8x32xf32, #tpu.memory_space<vmem>>, vector<1x8x32xf32>,
    %c0_20 = arith.constant 0 : index
    %c2_21 = arith.constant 2 : index
    %20 = vector.load %arg2[%c0_20, %c2_21] : memref<8x34xf32, #tpu.memory_space<vmem>>, vector<8x32xf32>
    %c5 = arith.constant 5 : index
    %c0_22 = arith.constant 0 : index
    %c0_23 = arith.constant 0 : index
    %21 = vector.load %arg8[%c5, %c0_22, %c0_23] : memref<6x8x32xf32, #tpu.memory_space<vmem>>, vector<1x8x32xf32>
    %22 = vector.shape_cast %21 : vector<1x8x32xf32> to vector<8x32xf32>
    %23 = vector.shape_cast %20 : vector<8x32xf32> to vector<1x8x32xf32>
    tpu.vector_store %arg8[%c5, %c0_22, %c0_23], %23 {strides = array<i32>} : memref<6x8x32xf32, #tpu.memory_space<vmem>>, vector<1x8x32xf32>,
    %c0_24 = arith.constant 0 : index
    %24 = memref.load %arg6[%c0_24] : memref<1xf32, #tpu.memory_space<smem>>
    %25 = vector.broadcast %24 : f32 to vector<8x32xf32>
    %c0_25 = arith.constant 0 : index
    %26 = memref.load %arg4[%c0_25] : memref<32xf32, #tpu.memory_space<smem>>
    %27 = vector.broadcast %26 : f32 to vector<8x32xf32>
    %c0_26 = arith.constant 0 : index
    %28 = memref.load %arg3[%c0_26] : memref<192xf32, #tpu.memory_space<smem>>
    %c0_27 = arith.constant 0 : index
    %c0_28 = arith.constant 0 : index
    %c0_29 = arith.constant 0 : index
    %29 = vector.load %arg8[%c0_27, %c0_28, %c0_29] : memref<6x8x32xf32, #tpu.memory_space<vmem>>, vector<1x8x32xf32>
    %30 = vector.shape_cast %29 : vector<1x8x32xf32> to vector<8x32xf32>
    %31 = vector.broadcast %28 : f32 to vector<8x32xf32>
    %32 = arith.mulf %31, %30 : vector<8x32xf32>
    %33 = arith.addf %27, %32 : vector<8x32xf32>
    %c1_30 = arith.constant 1 : index
    %34 = memref.load %arg3[%c1_30] : memref<192xf32, #tpu.memory_space<smem>>
    %c1_31 = arith.constant 1 : index
    %c0_32 = arith.constant 0 : index
    %c0_33 = arith.constant 0 : index
    %35 = vector.load %arg8[%c1_31, %c0_32, %c0_33] : memref<6x8x32xf32, #tpu.memory_space<vmem>>, vector<1x8x32xf32>
    %36 = vector.shape_cast %35 : vector<1x8x32xf32> to vector<8x32xf32>
    %37 = vector.broadcast %34 : f32 to vector<8x32xf32>
    %38 = arith.mulf %37, %36 : vector<8x32xf32>
    %39 = arith.addf %33, %38 : vector<8x32xf32>
    %c2_34 = arith.constant 2 : index
    %40 = memref.load %arg3[%c2_34] : memref<192xf32, #tpu.memory_space<smem>>
    %c2_35 = arith.constant 2 : index
    %c0_36 = arith.constant 0 : index
    %c0_37 = arith.constant 0 : index
    %41 = vector.load %arg8[%c2_35, %c0_36, %c0_37] : memref<6x8x32xf32, #tpu.memory_space<vmem>>, vector<1x8x32xf32>
    %42 = vector.shape_cast %41 : vector<1x8x32xf32> to vector<8x32xf32>
    %43 = vector.broadcast %40 : f32 to vector<8x32xf32>
    %44 = arith.mulf %43, %42 : vector<8x32xf32>
    %45 = arith.addf %39, %44 : vector<8x32xf32>
    %c3_38 = arith.constant 3 : index
    %46 = memref.load %arg3[%c3_38] : memref<192xf32, #tpu.memory_space<smem>>
    %c3_39 = arith.constant 3 : index
    %c0_40 = arith.constant 0 : index
    %c0_41 = arith.constant 0 : index
    %47 = vector.load %arg8[%c3_39, %c0_40, %c0_41] : memref<6x8x32xf32, #tpu.memory_space<vmem>>, vector<1x8x32xf32>
    %48 = vector.shape_cast %47 : vector<1x8x32xf32> to vector<8x32xf32>
    %49 = vector.broadcast %46 : f32 to vector<8x32xf32>
    %50 = arith.mulf %49, %48 : vector<8x32xf32>
    %51 = arith.addf %45, %50 : vector<8x32xf32>
    %c4_42 = arith.constant 4 : index
    %52 = memref.load %arg3[%c4_42] : memref<192xf32, #tpu.memory_space<smem>>
    %c4_43 = arith.constant 4 : index
    %c0_44 = arith.constant 0 : index
    %c0_45 = arith.constant 0 : index
    %53 = vector.load %arg8[%c4_43, %c0_44, %c0_45] : memref<6x8x32xf32, #tpu.memory_space<vmem>>, vector<1x8x32xf32>
    %54 = vector.shape_cast %53 : vector<1x8x32xf32> to vector<8x32xf32>
    %55 = vector.broadcast %52 : f32 to vector<8x32xf32>
    %56 = arith.mulf %55, %54 : vector<8x32xf32>
    %57 = arith.addf %51, %56 : vector<8x32xf32>
    %c5_46 = arith.constant 5 : index
    %58 = memref.load %arg3[%c5_46] : memref<192xf32, #tpu.memory_space<smem>>
    %c5_47 = arith.constant 5 : index
    %c0_48 = arith.constant 0 : index
    %c0_49 = arith.constant 0 : index
    %59 = vector.load %arg8[%c5_47, %c0_48, %c0_49] : memref<6x8x32xf32, #tpu.memory_space<vmem>>, vector<1x8x32xf32>
    %60 = vector.shape_cast %59 : vector<1x8x32xf32> to vector<8x32xf32>
    %61 = vector.broadcast %58 : f32 to vector<8x32xf32>
    %62 = arith.mulf %61, %60 : vector<8x32xf32>
    %63 = arith.addf %57, %62 : vector<8x32xf32>
    %cst = arith.constant 0.000000e+00 : f32
    %64 = vector.broadcast %cst : f32 to vector<8x32xf32>
    %65 = arith.maximumf %63, %64 : vector<8x32xf32>
    %c0_50 = arith.constant 0 : index
    %66 = memref.load %arg5[%c0_50] : memref<32xf32, #tpu.memory_space<smem>>
    %67 = vector.broadcast %66 : f32 to vector<8x32xf32>
    %68 = arith.mulf %67, %65 : vector<8x32xf32>
    %69 = arith.addf %25, %68 : vector<8x32xf32>
    %c1_51 = arith.constant 1 : index
    %70 = memref.load %arg4[%c1_51] : memref<32xf32, #tpu.memory_space<smem>>
    %71 = vector.broadcast %70 : f32 to vector<8x32xf32>
    %c6 = arith.constant 6 : index
    %72 = memref.load %arg3[%c6] : memref<192xf32, #tpu.memory_space<smem>>
    %c0_52 = arith.constant 0 : index
    %c0_53 = arith.constant 0 : index
    %c0_54 = arith.constant 0 : index
    %73 = vector.load %arg8[%c0_52, %c0_53, %c0_54] : memref<6x8x32xf32, #tpu.memory_space<vmem>>, vector<1x8x32xf32>
    %74 = vector.shape_cast %73 : vector<1x8x32xf32> to vector<8x32xf32>
    %75 = vector.broadcast %72 : f32 to vector<8x32xf32>
    %76 = arith.mulf %75, %74 : vector<8x32xf32>
    %77 = arith.addf %71, %76 : vector<8x32xf32>
    %c7 = arith.constant 7 : index
    %78 = memref.load %arg3[%c7] : memref<192xf32, #tpu.memory_space<smem>>
    %c1_55 = arith.constant 1 : index
    %c0_56 = arith.constant 0 : index
    %c0_57 = arith.constant 0 : index
    %79 = vector.load %arg8[%c1_55, %c0_56, %c0_57] : memref<6x8x32xf32, #tpu.memory_space<vmem>>, vector<1x8x32xf32>
    %80 = vector.shape_cast %79 : vector<1x8x32xf32> to vector<8x32xf32>
    %81 = vector.broadcast %78 : f32 to vector<8x32xf32>
    %82 = arith.mulf %81, %80 : vector<8x32xf32>
    %83 = arith.addf %77, %82 : vector<8x32xf32>
    %c8 = arith.constant 8 : index
    %84 = memref.load %arg3[%c8] : memref<192xf32, #tpu.memory_space<smem>>
    %c2_58 = arith.constant 2 : index
    %c0_59 = arith.constant 0 : index
    %c0_60 = arith.constant 0 : index
    %85 = vector.load %arg8[%c2_58, %c0_59, %c0_60] : memref<6x8x32xf32, #tpu.memory_space<vmem>>, vector<1x8x32xf32>
    %86 = vector.shape_cast %85 : vector<1x8x32xf32> to vector<8x32xf32>
    %87 = vector.broadcast %84 : f32 to vector<8x32xf32>
    %88 = arith.mulf %87, %86 : vector<8x32xf32>
    %89 = arith.addf %83, %88 : vector<8x32xf32>
    %c9 = arith.constant 9 : index
    %90 = memref.load %arg3[%c9] : memref<192xf32, #tpu.memory_space<smem>>
    %c3_61 = arith.constant 3 : index
    %c0_62 = arith.constant 0 : index
    %c0_63 = arith.constant 0 : index
    %91 = vector.load %arg8[%c3_61, %c0_62, %c0_63] : memref<6x8x32xf32, #tpu.memory_space<vmem>>, vector<1x8x32xf32>
    %92 = vector.shape_cast %91 : vector<1x8x32xf32> to vector<8x32xf32>
    %93 = vector.broadcast %90 : f32 to vector<8x32xf32>
    %94 = arith.mulf %93, %92 : vector<8x32xf32>
    %95 = arith.addf %89, %94 : vector<8x32xf32>
    %c10 = arith.constant 10 : index
    %96 = memref.load %arg3[%c10] : memref<192xf32, #tpu.memory_space<smem>>
    %c4_64 = arith.constant 4 : index
    %c0_65 = arith.constant 0 : index
    %c0_66 = arith.constant 0 : index
    %97 = vector.load %arg8[%c4_64, %c0_65, %c0_66] : memref<6x8x32xf32, #tpu.memory_space<vmem>>, vector<1x8x32xf32>
    %98 = vector.shape_cast %97 : vector<1x8x32xf32> to vector<8x32xf32>
    %99 = vector.broadcast %96 : f32 to vector<8x32xf32>
    %100 = arith.mulf %99, %98 : vector<8x32xf32>
    %101 = arith.addf %95, %100 : vector<8x32xf32>
    %c11 = arith.constant 11 : index
    %102 = memref.load %arg3[%c11] : memref<192xf32, #tpu.memory_space<smem>>
    %c5_67 = arith.constant 5 : index
    %c0_68 = arith.constant 0 : index
    %c0_69 = arith.constant 0 : index
    %103 = vector.load %arg8[%c5_67, %c0_68, %c0_69] : memref<6x8x32xf32, #tpu.memory_space<vmem>>, vector<1x8x32xf32>
    %104 = vector.shape_cast %103 : vector<1x8x32xf32> to vector<8x32xf32>
    %105 = vector.broadcast %102 : f32 to vector<8x32xf32>
    %106 = arith.mulf %105, %104 : vector<8x32xf32>
    %107 = arith.addf %101, %106 : vector<8x32xf32>
    %cst_70 = arith.constant 0.000000e+00 : f32
    %108 = vector.broadcast %cst_70 : f32 to vector<8x32xf32>
    %109 = arith.maximumf %107, %108 : vector<8x32xf32>
    %c1_71 = arith.constant 1 : index
    %110 = memref.load %arg5[%c1_71] : memref<32xf32, #tpu.memory_space<smem>>
    %111 = vector.broadcast %110 : f32 to vector<8x32xf32>
    %112 = arith.mulf %111, %109 : vector<8x32xf32>
    %113 = arith.addf %69, %112 : vector<8x32xf32>
    %c2_72 = arith.constant 2 : index
    %114 = memref.load %arg4[%c2_72] : memref<32xf32, #tpu.memory_space<smem>>
    %115 = vector.broadcast %114 : f32 to vector<8x32xf32>
    %c12 = arith.constant 12 : index
    %116 = memref.load %arg3[%c12] : memref<192xf32, #tpu.memory_space<smem>>
    %c0_73 = arith.constant 0 : index
    %c0_74 = arith.constant 0 : index
    %c0_75 = arith.constant 0 : index
    %117 = vector.load %arg8[%c0_73, %c0_74, %c0_75] : memref<6x8x32xf32, #tpu.memory_space<vmem>>, vector<1x8x32xf32>
    %118 = vector.shape_cast %117 : vector<1x8x32xf32> to vector<8x32xf32>
    %119 = vector.broadcast %116 : f32 to vector<8x32xf32>
    %120 = arith.mulf %119, %118 : vector<8x32xf32>
    %121 = arith.addf %115, %120 : vector<8x32xf32>
    %c13 = arith.constant 13 : index
    %122 = memref.load %arg3[%c13] : memref<192xf32, #tpu.memory_space<smem>>
    %c1_76 = arith.constant 1 : index
    %c0_77 = arith.constant 0 : index
    %c0_78 = arith.constant 0 : index
    %123 = vector.load %arg8[%c1_76, %c0_77, %c0_78] : memref<6x8x32xf32, #tpu.memory_space<vmem>>, vector<1x8x32xf32>
    %124 = vector.shape_cast %123 : vector<1x8x32xf32> to vector<8x32xf32>
    %125 = vector.broadcast %122 : f32 to vector<8x32xf32>
    %126 = arith.mulf %125, %124 : vector<8x32xf32>
    %127 = arith.addf %121, %126 : vector<8x32xf32>
    %c14 = arith.constant 14 : index
    %128 = memref.load %arg3[%c14] : memref<192xf32, #tpu.memory_space<smem>>
    %c2_79 = arith.constant 2 : index
    %c0_80 = arith.constant 0 : index
    %c0_81 = arith.constant 0 : index
    %129 = vector.load %arg8[%c2_79, %c0_80, %c0_81] : memref<6x8x32xf32, #tpu.memory_space<vmem>>, vector<1x8x32xf32>
    %130 = vector.shape_cast %129 : vector<1x8x32xf32> to vector<8x32xf32>
    %131 = vector.broadcast %128 : f32 to vector<8x32xf32>
    %132 = arith.mulf %131, %130 : vector<8x32xf32>
    %133 = arith.addf %127, %132 : vector<8x32xf32>
    %c15 = arith.constant 15 : index
    %134 = memref.load %arg3[%c15] : memref<192xf32, #tpu.memory_space<smem>>
    %c3_82 = arith.constant 3 : index
    %c0_83 = arith.constant 0 : index
    %c0_84 = arith.constant 0 : index
    %135 = vector.load %arg8[%c3_82, %c0_83, %c0_84] : memref<6x8x32xf32, #tpu.memory_space<vmem>>, vector<1x8x32xf32>
    %136 = vector.shape_cast %135 : vector<1x8x32xf32> to vector<8x32xf32>
    %137 = vector.broadcast %134 : f32 to vector<8x32xf32>
    %138 = arith.mulf %137, %136 : vector<8x32xf32>
    %139 = arith.addf %133, %138 : vector<8x32xf32>
    %c16 = arith.constant 16 : index
    %140 = memref.load %arg3[%c16] : memref<192xf32, #tpu.memory_space<smem>>
    %c4_85 = arith.constant 4 : index
    %c0_86 = arith.constant 0 : index
    %c0_87 = arith.constant 0 : index
    %141 = vector.load %arg8[%c4_85, %c0_86, %c0_87] : memref<6x8x32xf32, #tpu.memory_space<vmem>>, vector<1x8x32xf32>
    %142 = vector.shape_cast %141 : vector<1x8x32xf32> to vector<8x32xf32>
    %143 = vector.broadcast %140 : f32 to vector<8x32xf32>
    %144 = arith.mulf %143, %142 : vector<8x32xf32>
    %145 = arith.addf %139, %144 : vector<8x32xf32>
    %c17 = arith.constant 17 : index
    %146 = memref.load %arg3[%c17] : memref<192xf32, #tpu.memory_space<smem>>
    %c5_88 = arith.constant 5 : index
    %c0_89 = arith.constant 0 : index
    %c0_90 = arith.constant 0 : index
    %147 = vector.load %arg8[%c5_88, %c0_89, %c0_90] : memref<6x8x32xf32, #tpu.memory_space<vmem>>, vector<1x8x32xf32>
    %148 = vector.shape_cast %147 : vector<1x8x32xf32> to vector<8x32xf32>
    %149 = vector.broadcast %146 : f32 to vector<8x32xf32>
    %150 = arith.mulf %149, %148 : vector<8x32xf32>
    %151 = arith.addf %145, %150 : vector<8x32xf32>
    %cst_91 = arith.constant 0.000000e+00 : f32
    %152 = vector.broadcast %cst_91 : f32 to vector<8x32xf32>
    %153 = arith.maximumf %151, %152 : vector<8x32xf32>
    %c2_92 = arith.constant 2 : index
    %154 = memref.load %arg5[%c2_92] : memref<32xf32, #tpu.memory_space<smem>>
    %155 = vector.broadcast %154 : f32 to vector<8x32xf32>
    %156 = arith.mulf %155, %153 : vector<8x32xf32>
    %157 = arith.addf %113, %156 : vector<8x32xf32>
    %c3_93 = arith.constant 3 : index
    %158 = memref.load %arg4[%c3_93] : memref<32xf32, #tpu.memory_space<smem>>
    %159 = vector.broadcast %158 : f32 to vector<8x32xf32>
    %c18 = arith.constant 18 : index
    %160 = memref.load %arg3[%c18] : memref<192xf32, #tpu.memory_space<smem>>
    %c0_94 = arith.constant 0 : index
    %c0_95 = arith.constant 0 : index
    %c0_96 = arith.constant 0 : index
    %161 = vector.load %arg8[%c0_94, %c0_95, %c0_96] : memref<6x8x32xf32, #tpu.memory_space<vmem>>, vector<1x8x32xf32>
    %162 = vector.shape_cast %161 : vector<1x8x32xf32> to vector<8x32xf32>
    %163 = vector.broadcast %160 : f32 to vector<8x32xf32>
    %164 = arith.mulf %163, %162 : vector<8x32xf32>
    %165 = arith.addf %159, %164 : vector<8x32xf32>
    %c19 = arith.constant 19 : index
    %166 = memref.load %arg3[%c19] : memref<192xf32, #tpu.memory_space<smem>>
    %c1_97 = arith.constant 1 : index
    %c0_98 = arith.constant 0 : index
    %c0_99 = arith.constant 0 : index
    %167 = vector.load %arg8[%c1_97, %c0_98, %c0_99] : memref<6x8x32xf32, #tpu.memory_space<vmem>>, vector<1x8x32xf32>
    %168 = vector.shape_cast %167 : vector<1x8x32xf32> to vector<8x32xf32>
    %169 = vector.broadcast %166 : f32 to vector<8x32xf32>
    %170 = arith.mulf %169, %168 : vector<8x32xf32>
    %171 = arith.addf %165, %170 : vector<8x32xf32>
    %c20 = arith.constant 20 : index
    %172 = memref.load %arg3[%c20] : memref<192xf32, #tpu.memory_space<smem>>
    %c2_100 = arith.constant 2 : index
    %c0_101 = arith.constant 0 : index
    %c0_102 = arith.constant 0 : index
    %173 = vector.load %arg8[%c2_100, %c0_101, %c0_102] : memref<6x8x32xf32, #tpu.memory_space<vmem>>, vector<1x8x32xf32>
    %174 = vector.shape_cast %173 : vector<1x8x32xf32> to vector<8x32xf32>
    %175 = vector.broadcast %172 : f32 to vector<8x32xf32>
    %176 = arith.mulf %175, %174 : vector<8x32xf32>
    %177 = arith.addf %171, %176 : vector<8x32xf32>
    %c21 = arith.constant 21 : index
    %178 = memref.load %arg3[%c21] : memref<192xf32, #tpu.memory_space<smem>>
    %c3_103 = arith.constant 3 : index
    %c0_104 = arith.constant 0 : index
    %c0_105 = arith.constant 0 : index
    %179 = vector.load %arg8[%c3_103, %c0_104, %c0_105] : memref<6x8x32xf32, #tpu.memory_space<vmem>>, vector<1x8x32xf32>
    %180 = vector.shape_cast %179 : vector<1x8x32xf32> to vector<8x32xf32>
    %181 = vector.broadcast %178 : f32 to vector<8x32xf32>
    %182 = arith.mulf %181, %180 : vector<8x32xf32>
    %183 = arith.addf %177, %182 : vector<8x32xf32>
    %c22 = arith.constant 22 : index
    %184 = memref.load %arg3[%c22] : memref<192xf32, #tpu.memory_space<smem>>
    %c4_106 = arith.constant 4 : index
    %c0_107 = arith.constant 0 : index
    %c0_108 = arith.constant 0 : index
    %185 = vector.load %arg8[%c4_106, %c0_107, %c0_108] : memref<6x8x32xf32, #tpu.memory_space<vmem>>, vector<1x8x32xf32>
    %186 = vector.shape_cast %185 : vector<1x8x32xf32> to vector<8x32xf32>
    %187 = vector.broadcast %184 : f32 to vector<8x32xf32>
    %188 = arith.mulf %187, %186 : vector<8x32xf32>
    %189 = arith.addf %183, %188 : vector<8x32xf32>
    %c23 = arith.constant 23 : index
    %190 = memref.load %arg3[%c23] : memref<192xf32, #tpu.memory_space<smem>>
    %c5_109 = arith.constant 5 : index
    %c0_110 = arith.constant 0 : index
    %c0_111 = arith.constant 0 : index
    %191 = vector.load %arg8[%c5_109, %c0_110, %c0_111] : memref<6x8x32xf32, #tpu.memory_space<vmem>>, vector<1x8x32xf32>
    %192 = vector.shape_cast %191 : vector<1x8x32xf32> to vector<8x32xf32>
    %193 = vector.broadcast %190 : f32 to vector<8x32xf32>
    %194 = arith.mulf %193, %192 : vector<8x32xf32>
    %195 = arith.addf %189, %194 : vector<8x32xf32>
    %cst_112 = arith.constant 0.000000e+00 : f32
    %196 = vector.broadcast %cst_112 : f32 to vector<8x32xf32>
    %197 = arith.maximumf %195, %196 : vector<8x32xf32>
    %c3_113 = arith.constant 3 : index
    %198 = memref.load %arg5[%c3_113] : memref<32xf32, #tpu.memory_space<smem>>
    %199 = vector.broadcast %198 : f32 to vector<8x32xf32>
    %200 = arith.mulf %199, %197 : vector<8x32xf32>
    %201 = arith.addf %157, %200 : vector<8x32xf32>
    %c4_114 = arith.constant 4 : index
    %202 = memref.load %arg4[%c4_114] : memref<32xf32, #tpu.memory_space<smem>>
    %203 = vector.broadcast %202 : f32 to vector<8x32xf32>
    %c24 = arith.constant 24 : index
    %204 = memref.load %arg3[%c24] : memref<192xf32, #tpu.memory_space<smem>>
    %c0_115 = arith.constant 0 : index
    %c0_116 = arith.constant 0 : index
    %c0_117 = arith.constant 0 : index
    %205 = vector.load %arg8[%c0_115, %c0_116, %c0_117] : memref<6x8x32xf32, #tpu.memory_space<vmem>>, vector<1x8x32xf32>
    %206 = vector.shape_cast %205 : vector<1x8x32xf32> to vector<8x32xf32>
    %207 = vector.broadcast %204 : f32 to vector<8x32xf32>
    %208 = arith.mulf %207, %206 : vector<8x32xf32>
    %209 = arith.addf %203, %208 : vector<8x32xf32>
    %c25 = arith.constant 25 : index
    %210 = memref.load %arg3[%c25] : memref<192xf32, #tpu.memory_space<smem>>
    %c1_118 = arith.constant 1 : index
    %c0_119 = arith.constant 0 : index
    %c0_120 = arith.constant 0 : index
    %211 = vector.load %arg8[%c1_118, %c0_119, %c0_120] : memref<6x8x32xf32, #tpu.memory_space<vmem>>, vector<1x8x32xf32>
    %212 = vector.shape_cast %211 : vector<1x8x32xf32> to vector<8x32xf32>
    %213 = vector.broadcast %210 : f32 to vector<8x32xf32>
    %214 = arith.mulf %213, %212 : vector<8x32xf32>
    %215 = arith.addf %209, %214 : vector<8x32xf32>
    %c26 = arith.constant 26 : index
    %216 = memref.load %arg3[%c26] : memref<192xf32, #tpu.memory_space<smem>>
    %c2_121 = arith.constant 2 : index
    %c0_122 = arith.constant 0 : index
    %c0_123 = arith.constant 0 : index
    %217 = vector.load %arg8[%c2_121, %c0_122, %c0_123] : memref<6x8x32xf32, #tpu.memory_space<vmem>>, vector<1x8x32xf32>
    %218 = vector.shape_cast %217 : vector<1x8x32xf32> to vector<8x32xf32>
    %219 = vector.broadcast %216 : f32 to vector<8x32xf32>
    %220 = arith.mulf %219, %218 : vector<8x32xf32>
    %221 = arith.addf %215, %220 : vector<8x32xf32>
    %c27 = arith.constant 27 : index
    %222 = memref.load %arg3[%c27] : memref<192xf32, #tpu.memory_space<smem>>
    %c3_124 = arith.constant 3 : index
    %c0_125 = arith.constant 0 : index
    %c0_126 = arith.constant 0 : index
    %223 = vector.load %arg8[%c3_124, %c0_125, %c0_126] : memref<6x8x32xf32, #tpu.memory_space<vmem>>, vector<1x8x32xf32>
    %224 = vector.shape_cast %223 : vector<1x8x32xf32> to vector<8x32xf32>
    %225 = vector.broadcast %222 : f32 to vector<8x32xf32>
    %226 = arith.mulf %225, %224 : vector<8x32xf32>
    %227 = arith.addf %221, %226 : vector<8x32xf32>
    %c28 = arith.constant 28 : index
    %228 = memref.load %arg3[%c28] : memref<192xf32, #tpu.memory_space<smem>>
    %c4_127 = arith.constant 4 : index
    %c0_128 = arith.constant 0 : index
    %c0_129 = arith.constant 0 : index
    %229 = vector.load %arg8[%c4_127, %c0_128, %c0_129] : memref<6x8x32xf32, #tpu.memory_space<vmem>>, vector<1x8x32xf32>
    %230 = vector.shape_cast %229 : vector<1x8x32xf32> to vector<8x32xf32>
    %231 = vector.broadcast %228 : f32 to vector<8x32xf32>
    %232 = arith.mulf %231, %230 : vector<8x32xf32>
    %233 = arith.addf %227, %232 : vector<8x32xf32>
    %c29 = arith.constant 29 : index
    %234 = memref.load %arg3[%c29] : memref<192xf32, #tpu.memory_space<smem>>
    %c5_130 = arith.constant 5 : index
    %c0_131 = arith.constant 0 : index
    %c0_132 = arith.constant 0 : index
    %235 = vector.load %arg8[%c5_130, %c0_131, %c0_132] : memref<6x8x32xf32, #tpu.memory_space<vmem>>, vector<1x8x32xf32>
    %236 = vector.shape_cast %235 : vector<1x8x32xf32> to vector<8x32xf32>
    %237 = vector.broadcast %234 : f32 to vector<8x32xf32>
    %238 = arith.mulf %237, %236 : vector<8x32xf32>
    %239 = arith.addf %233, %238 : vector<8x32xf32>
    %cst_133 = arith.constant 0.000000e+00 : f32
    %240 = vector.broadcast %cst_133 : f32 to vector<8x32xf32>
    %241 = arith.maximumf %239, %240 : vector<8x32xf32>
    %c4_134 = arith.constant 4 : index
    %242 = memref.load %arg5[%c4_134] : memref<32xf32, #tpu.memory_space<smem>>
    %243 = vector.broadcast %242 : f32 to vector<8x32xf32>
    %244 = arith.mulf %243, %241 : vector<8x32xf32>
    %245 = arith.addf %201, %244 : vector<8x32xf32>
    %c5_135 = arith.constant 5 : index
    %246 = memref.load %arg4[%c5_135] : memref<32xf32, #tpu.memory_space<smem>>
    %247 = vector.broadcast %246 : f32 to vector<8x32xf32>
    %c30 = arith.constant 30 : index
    %248 = memref.load %arg3[%c30] : memref<192xf32, #tpu.memory_space<smem>>
    %c0_136 = arith.constant 0 : index
    %c0_137 = arith.constant 0 : index
    %c0_138 = arith.constant 0 : index
    %249 = vector.load %arg8[%c0_136, %c0_137, %c0_138] : memref<6x8x32xf32, #tpu.memory_space<vmem>>, vector<1x8x32xf32>
    %250 = vector.shape_cast %249 : vector<1x8x32xf32> to vector<8x32xf32>
    %251 = vector.broadcast %248 : f32 to vector<8x32xf32>
    %252 = arith.mulf %251, %250 : vector<8x32xf32>
    %253 = arith.addf %247, %252 : vector<8x32xf32>
    %c31 = arith.constant 31 : index
    %254 = memref.load %arg3[%c31] : memref<192xf32, #tpu.memory_space<smem>>
    %c1_139 = arith.constant 1 : index
    %c0_140 = arith.constant 0 : index
    %c0_141 = arith.constant 0 : index
    %255 = vector.load %arg8[%c1_139, %c0_140, %c0_141] : memref<6x8x32xf32, #tpu.memory_space<vmem>>, vector<1x8x32xf32>
    %256 = vector.shape_cast %255 : vector<1x8x32xf32> to vector<8x32xf32>
    %257 = vector.broadcast %254 : f32 to vector<8x32xf32>
    %258 = arith.mulf %257, %256 : vector<8x32xf32>
    %259 = arith.addf %253, %258 : vector<8x32xf32>
    %c32 = arith.constant 32 : index
    %260 = memref.load %arg3[%c32] : memref<192xf32, #tpu.memory_space<smem>>
    %c2_142 = arith.constant 2 : index
    %c0_143 = arith.constant 0 : index
    %c0_144 = arith.constant 0 : index
    %261 = vector.load %arg8[%c2_142, %c0_143, %c0_144] : memref<6x8x32xf32, #tpu.memory_space<vmem>>, vector<1x8x32xf32>
    %262 = vector.shape_cast %261 : vector<1x8x32xf32> to vector<8x32xf32>
    %263 = vector.broadcast %260 : f32 to vector<8x32xf32>
    %264 = arith.mulf %263, %262 : vector<8x32xf32>
    %265 = arith.addf %259, %264 : vector<8x32xf32>
    %c33 = arith.constant 33 : index
    %266 = memref.load %arg3[%c33] : memref<192xf32, #tpu.memory_space<smem>>
    %c3_145 = arith.constant 3 : index
    %c0_146 = arith.constant 0 : index
    %c0_147 = arith.constant 0 : index
    %267 = vector.load %arg8[%c3_145, %c0_146, %c0_147] : memref<6x8x32xf32, #tpu.memory_space<vmem>>, vector<1x8x32xf32>
    %268 = vector.shape_cast %267 : vector<1x8x32xf32> to vector<8x32xf32>
    %269 = vector.broadcast %266 : f32 to vector<8x32xf32>
    %270 = arith.mulf %269, %268 : vector<8x32xf32>
    %271 = arith.addf %265, %270 : vector<8x32xf32>
    %c34 = arith.constant 34 : index
    %272 = memref.load %arg3[%c34] : memref<192xf32, #tpu.memory_space<smem>>
    %c4_148 = arith.constant 4 : index
    %c0_149 = arith.constant 0 : index
    %c0_150 = arith.constant 0 : index
    %273 = vector.load %arg8[%c4_148, %c0_149, %c0_150] : memref<6x8x32xf32, #tpu.memory_space<vmem>>, vector<1x8x32xf32>
    %274 = vector.shape_cast %273 : vector<1x8x32xf32> to vector<8x32xf32>
    %275 = vector.broadcast %272 : f32 to vector<8x32xf32>
    %276 = arith.mulf %275, %274 : vector<8x32xf32>
    %277 = arith.addf %271, %276 : vector<8x32xf32>
    %c35 = arith.constant 35 : index
    %278 = memref.load %arg3[%c35] : memref<192xf32, #tpu.memory_space<smem>>
    %c5_151 = arith.constant 5 : index
    %c0_152 = arith.constant 0 : index
    %c0_153 = arith.constant 0 : index
    %279 = vector.load %arg8[%c5_151, %c0_152, %c0_153] : memref<6x8x32xf32, #tpu.memory_space<vmem>>, vector<1x8x32xf32>
    %280 = vector.shape_cast %279 : vector<1x8x32xf32> to vector<8x32xf32>
    %281 = vector.broadcast %278 : f32 to vector<8x32xf32>
    %282 = arith.mulf %281, %280 : vector<8x32xf32>
    %283 = arith.addf %277, %282 : vector<8x32xf32>
    %cst_154 = arith.constant 0.000000e+00 : f32
    %284 = vector.broadcast %cst_154 : f32 to vector<8x32xf32>
    %285 = arith.maximumf %283, %284 : vector<8x32xf32>
    %c5_155 = arith.constant 5 : index
    %286 = memref.load %arg5[%c5_155] : memref<32xf32, #tpu.memory_space<smem>>
    %287 = vector.broadcast %286 : f32 to vector<8x32xf32>
    %288 = arith.mulf %287, %285 : vector<8x32xf32>
    %289 = arith.addf %245, %288 : vector<8x32xf32>
    %c6_156 = arith.constant 6 : index
    %290 = memref.load %arg4[%c6_156] : memref<32xf32, #tpu.memory_space<smem>>
    %291 = vector.broadcast %290 : f32 to vector<8x32xf32>
    %c36 = arith.constant 36 : index
    %292 = memref.load %arg3[%c36] : memref<192xf32, #tpu.memory_space<smem>>
    %c0_157 = arith.constant 0 : index
    %c0_158 = arith.constant 0 : index
    %c0_159 = arith.constant 0 : index
    %293 = vector.load %arg8[%c0_157, %c0_158, %c0_159] : memref<6x8x32xf32, #tpu.memory_space<vmem>>, vector<1x8x32xf32>
    %294 = vector.shape_cast %293 : vector<1x8x32xf32> to vector<8x32xf32>
    %295 = vector.broadcast %292 : f32 to vector<8x32xf32>
    %296 = arith.mulf %295, %294 : vector<8x32xf32>
    %297 = arith.addf %291, %296 : vector<8x32xf32>
    %c37 = arith.constant 37 : index
    %298 = memref.load %arg3[%c37] : memref<192xf32, #tpu.memory_space<smem>>
    %c1_160 = arith.constant 1 : index
    %c0_161 = arith.constant 0 : index
    %c0_162 = arith.constant 0 : index
    %299 = vector.load %arg8[%c1_160, %c0_161, %c0_162] : memref<6x8x32xf32, #tpu.memory_space<vmem>>, vector<1x8x32xf32>
    %300 = vector.shape_cast %299 : vector<1x8x32xf32> to vector<8x32xf32>
    %301 = vector.broadcast %298 : f32 to vector<8x32xf32>
    %302 = arith.mulf %301, %300 : vector<8x32xf32>
    %303 = arith.addf %297, %302 : vector<8x32xf32>
    %c38 = arith.constant 38 : index
    %304 = memref.load %arg3[%c38] : memref<192xf32, #tpu.memory_space<smem>>
    %c2_163 = arith.constant 2 : index
    %c0_164 = arith.constant 0 : index
    %c0_165 = arith.constant 0 : index
    %305 = vector.load %arg8[%c2_163, %c0_164, %c0_165] : memref<6x8x32xf32, #tpu.memory_space<vmem>>, vector<1x8x32xf32>
    %306 = vector.shape_cast %305 : vector<1x8x32xf32> to vector<8x32xf32>
    %307 = vector.broadcast %304 : f32 to vector<8x32xf32>
    %308 = arith.mulf %307, %306 : vector<8x32xf32>
    %309 = arith.addf %303, %308 : vector<8x32xf32>
    %c39 = arith.constant 39 : index
    %310 = memref.load %arg3[%c39] : memref<192xf32, #tpu.memory_space<smem>>
    %c3_166 = arith.constant 3 : index
    %c0_167 = arith.constant 0 : index
    %c0_168 = arith.constant 0 : index
    %311 = vector.load %arg8[%c3_166, %c0_167, %c0_168] : memref<6x8x32xf32, #tpu.memory_space<vmem>>, vector<1x8x32xf32>
    %312 = vector.shape_cast %311 : vector<1x8x32xf32> to vector<8x32xf32>
    %313 = vector.broadcast %310 : f32 to vector<8x32xf32>
    %314 = arith.mulf %313, %312 : vector<8x32xf32>
    %315 = arith.addf %309, %314 : vector<8x32xf32>
    %c40 = arith.constant 40 : index
    %316 = memref.load %arg3[%c40] : memref<192xf32, #tpu.memory_space<smem>>
    %c4_169 = arith.constant 4 : index
    %c0_170 = arith.constant 0 : index
    %c0_171 = arith.constant 0 : index
    %317 = vector.load %arg8[%c4_169, %c0_170, %c0_171] : memref<6x8x32xf32, #tpu.memory_space<vmem>>, vector<1x8x32xf32>
    %318 = vector.shape_cast %317 : vector<1x8x32xf32> to vector<8x32xf32>
    %319 = vector.broadcast %316 : f32 to vector<8x32xf32>
    %320 = arith.mulf %319, %318 : vector<8x32xf32>
    %321 = arith.addf %315, %320 : vector<8x32xf32>
    %c41 = arith.constant 41 : index
    %322 = memref.load %arg3[%c41] : memref<192xf32, #tpu.memory_space<smem>>
    %c5_172 = arith.constant 5 : index
    %c0_173 = arith.constant 0 : index
    %c0_174 = arith.constant 0 : index
    %323 = vector.load %arg8[%c5_172, %c0_173, %c0_174] : memref<6x8x32xf32, #tpu.memory_space<vmem>>, vector<1x8x32xf32>
    %324 = vector.shape_cast %323 : vector<1x8x32xf32> to vector<8x32xf32>
    %325 = vector.broadcast %322 : f32 to vector<8x32xf32>
    %326 = arith.mulf %325, %324 : vector<8x32xf32>
    %327 = arith.addf %321, %326 : vector<8x32xf32>
    %cst_175 = arith.constant 0.000000e+00 : f32
    %328 = vector.broadcast %cst_175 : f32 to vector<8x32xf32>
    %329 = arith.maximumf %327, %328 : vector<8x32xf32>
    %c6_176 = arith.constant 6 : index
    %330 = memref.load %arg5[%c6_176] : memref<32xf32, #tpu.memory_space<smem>>
    %331 = vector.broadcast %330 : f32 to vector<8x32xf32>
    %332 = arith.mulf %331, %329 : vector<8x32xf32>
    %333 = arith.addf %289, %332 : vector<8x32xf32>
    %c7_177 = arith.constant 7 : index
    %334 = memref.load %arg4[%c7_177] : memref<32xf32, #tpu.memory_space<smem>>
    %335 = vector.broadcast %334 : f32 to vector<8x32xf32>
    %c42 = arith.constant 42 : index
    %336 = memref.load %arg3[%c42] : memref<192xf32, #tpu.memory_space<smem>>
    %c0_178 = arith.constant 0 : index
    %c0_179 = arith.constant 0 : index
    %c0_180 = arith.constant 0 : index
    %337 = vector.load %arg8[%c0_178, %c0_179, %c0_180] : memref<6x8x32xf32, #tpu.memory_space<vmem>>, vector<1x8x32xf32>
    %338 = vector.shape_cast %337 : vector<1x8x32xf32> to vector<8x32xf32>
    %339 = vector.broadcast %336 : f32 to vector<8x32xf32>
    %340 = arith.mulf %339, %338 : vector<8x32xf32>
    %341 = arith.addf %335, %340 : vector<8x32xf32>
    %c43 = arith.constant 43 : index
    %342 = memref.load %arg3[%c43] : memref<192xf32, #tpu.memory_space<smem>>
    %c1_181 = arith.constant 1 : index
    %c0_182 = arith.constant 0 : index
    %c0_183 = arith.constant 0 : index
    %343 = vector.load %arg8[%c1_181, %c0_182, %c0_183] : memref<6x8x32xf32, #tpu.memory_space<vmem>>, vector<1x8x32xf32>
    %344 = vector.shape_cast %343 : vector<1x8x32xf32> to vector<8x32xf32>
    %345 = vector.broadcast %342 : f32 to vector<8x32xf32>
    %346 = arith.mulf %345, %344 : vector<8x32xf32>
    %347 = arith.addf %341, %346 : vector<8x32xf32>
    %c44 = arith.constant 44 : index
    %348 = memref.load %arg3[%c44] : memref<192xf32, #tpu.memory_space<smem>>
    %c2_184 = arith.constant 2 : index
    %c0_185 = arith.constant 0 : index
    %c0_186 = arith.constant 0 : index
    %349 = vector.load %arg8[%c2_184, %c0_185, %c0_186] : memref<6x8x32xf32, #tpu.memory_space<vmem>>, vector<1x8x32xf32>
    %350 = vector.shape_cast %349 : vector<1x8x32xf32> to vector<8x32xf32>
    %351 = vector.broadcast %348 : f32 to vector<8x32xf32>
    %352 = arith.mulf %351, %350 : vector<8x32xf32>
    %353 = arith.addf %347, %352 : vector<8x32xf32>
    %c45 = arith.constant 45 : index
    %354 = memref.load %arg3[%c45] : memref<192xf32, #tpu.memory_space<smem>>
    %c3_187 = arith.constant 3 : index
    %c0_188 = arith.constant 0 : index
    %c0_189 = arith.constant 0 : index
    %355 = vector.load %arg8[%c3_187, %c0_188, %c0_189] : memref<6x8x32xf32, #tpu.memory_space<vmem>>, vector<1x8x32xf32>
    %356 = vector.shape_cast %355 : vector<1x8x32xf32> to vector<8x32xf32>
    %357 = vector.broadcast %354 : f32 to vector<8x32xf32>
    %358 = arith.mulf %357, %356 : vector<8x32xf32>
    %359 = arith.addf %353, %358 : vector<8x32xf32>
    %c46 = arith.constant 46 : index
    %360 = memref.load %arg3[%c46] : memref<192xf32, #tpu.memory_space<smem>>
    %c4_190 = arith.constant 4 : index
    %c0_191 = arith.constant 0 : index
    %c0_192 = arith.constant 0 : index
    %361 = vector.load %arg8[%c4_190, %c0_191, %c0_192] : memref<6x8x32xf32, #tpu.memory_space<vmem>>, vector<1x8x32xf32>
    %362 = vector.shape_cast %361 : vector<1x8x32xf32> to vector<8x32xf32>
    %363 = vector.broadcast %360 : f32 to vector<8x32xf32>
    %364 = arith.mulf %363, %362 : vector<8x32xf32>
    %365 = arith.addf %359, %364 : vector<8x32xf32>
    %c47 = arith.constant 47 : index
    %366 = memref.load %arg3[%c47] : memref<192xf32, #tpu.memory_space<smem>>
    %c5_193 = arith.constant 5 : index
    %c0_194 = arith.constant 0 : index
    %c0_195 = arith.constant 0 : index
    %367 = vector.load %arg8[%c5_193, %c0_194, %c0_195] : memref<6x8x32xf32, #tpu.memory_space<vmem>>, vector<1x8x32xf32>
    %368 = vector.shape_cast %367 : vector<1x8x32xf32> to vector<8x32xf32>
    %369 = vector.broadcast %366 : f32 to vector<8x32xf32>
    %370 = arith.mulf %369, %368 : vector<8x32xf32>
    %371 = arith.addf %365, %370 : vector<8x32xf32>
    %cst_196 = arith.constant 0.000000e+00 : f32
    %372 = vector.broadcast %cst_196 : f32 to vector<8x32xf32>
    %373 = arith.maximumf %371, %372 : vector<8x32xf32>
    %c7_197 = arith.constant 7 : index
    %374 = memref.load %arg5[%c7_197] : memref<32xf32, #tpu.memory_space<smem>>
    %375 = vector.broadcast %374 : f32 to vector<8x32xf32>
    %376 = arith.mulf %375, %373 : vector<8x32xf32>
    %377 = arith.addf %333, %376 : vector<8x32xf32>
    %c8_198 = arith.constant 8 : index
    %378 = memref.load %arg4[%c8_198] : memref<32xf32, #tpu.memory_space<smem>>
    %379 = vector.broadcast %378 : f32 to vector<8x32xf32>
    %c48 = arith.constant 48 : index
    %380 = memref.load %arg3[%c48] : memref<192xf32, #tpu.memory_space<smem>>
    %c0_199 = arith.constant 0 : index
    %c0_200 = arith.constant 0 : index
    %c0_201 = arith.constant 0 : index
    %381 = vector.load %arg8[%c0_199, %c0_200, %c0_201] : memref<6x8x32xf32, #tpu.memory_space<vmem>>, vector<1x8x32xf32>
    %382 = vector.shape_cast %381 : vector<1x8x32xf32> to vector<8x32xf32>
    %383 = vector.broadcast %380 : f32 to vector<8x32xf32>
    %384 = arith.mulf %383, %382 : vector<8x32xf32>
    %385 = arith.addf %379, %384 : vector<8x32xf32>
    %c49 = arith.constant 49 : index
    %386 = memref.load %arg3[%c49] : memref<192xf32, #tpu.memory_space<smem>>
    %c1_202 = arith.constant 1 : index
    %c0_203 = arith.constant 0 : index
    %c0_204 = arith.constant 0 : index
    %387 = vector.load %arg8[%c1_202, %c0_203, %c0_204] : memref<6x8x32xf32, #tpu.memory_space<vmem>>, vector<1x8x32xf32>
    %388 = vector.shape_cast %387 : vector<1x8x32xf32> to vector<8x32xf32>
    %389 = vector.broadcast %386 : f32 to vector<8x32xf32>
    %390 = arith.mulf %389, %388 : vector<8x32xf32>
    %391 = arith.addf %385, %390 : vector<8x32xf32>
    %c50 = arith.constant 50 : index
    %392 = memref.load %arg3[%c50] : memref<192xf32, #tpu.memory_space<smem>>
    %c2_205 = arith.constant 2 : index
    %c0_206 = arith.constant 0 : index
    %c0_207 = arith.constant 0 : index
    %393 = vector.load %arg8[%c2_205, %c0_206, %c0_207] : memref<6x8x32xf32, #tpu.memory_space<vmem>>, vector<1x8x32xf32>
    %394 = vector.shape_cast %393 : vector<1x8x32xf32> to vector<8x32xf32>
    %395 = vector.broadcast %392 : f32 to vector<8x32xf32>
    %396 = arith.mulf %395, %394 : vector<8x32xf32>
    %397 = arith.addf %391, %396 : vector<8x32xf32>
    %c51 = arith.constant 51 : index
    %398 = memref.load %arg3[%c51] : memref<192xf32, #tpu.memory_space<smem>>
    %c3_208 = arith.constant 3 : index
    %c0_209 = arith.constant 0 : index
    %c0_210 = arith.constant 0 : index
    %399 = vector.load %arg8[%c3_208, %c0_209, %c0_210] : memref<6x8x32xf32, #tpu.memory_space<vmem>>, vector<1x8x32xf32>
    %400 = vector.shape_cast %399 : vector<1x8x32xf32> to vector<8x32xf32>
    %401 = vector.broadcast %398 : f32 to vector<8x32xf32>
    %402 = arith.mulf %401, %400 : vector<8x32xf32>
    %403 = arith.addf %397, %402 : vector<8x32xf32>
    %c52 = arith.constant 52 : index
    %404 = memref.load %arg3[%c52] : memref<192xf32, #tpu.memory_space<smem>>
    %c4_211 = arith.constant 4 : index
    %c0_212 = arith.constant 0 : index
    %c0_213 = arith.constant 0 : index
    %405 = vector.load %arg8[%c4_211, %c0_212, %c0_213] : memref<6x8x32xf32, #tpu.memory_space<vmem>>, vector<1x8x32xf32>
    %406 = vector.shape_cast %405 : vector<1x8x32xf32> to vector<8x32xf32>
    %407 = vector.broadcast %404 : f32 to vector<8x32xf32>
    %408 = arith.mulf %407, %406 : vector<8x32xf32>
    %409 = arith.addf %403, %408 : vector<8x32xf32>
    %c53 = arith.constant 53 : index
    %410 = memref.load %arg3[%c53] : memref<192xf32, #tpu.memory_space<smem>>
    %c5_214 = arith.constant 5 : index
    %c0_215 = arith.constant 0 : index
    %c0_216 = arith.constant 0 : index
    %411 = vector.load %arg8[%c5_214, %c0_215, %c0_216] : memref<6x8x32xf32, #tpu.memory_space<vmem>>, vector<1x8x32xf32>
    %412 = vector.shape_cast %411 : vector<1x8x32xf32> to vector<8x32xf32>
    %413 = vector.broadcast %410 : f32 to vector<8x32xf32>
    %414 = arith.mulf %413, %412 : vector<8x32xf32>
    %415 = arith.addf %409, %414 : vector<8x32xf32>
    %cst_217 = arith.constant 0.000000e+00 : f32
    %416 = vector.broadcast %cst_217 : f32 to vector<8x32xf32>
    %417 = arith.maximumf %415, %416 : vector<8x32xf32>
    %c8_218 = arith.constant 8 : index
    %418 = memref.load %arg5[%c8_218] : memref<32xf32, #tpu.memory_space<smem>>
    %419 = vector.broadcast %418 : f32 to vector<8x32xf32>
    %420 = arith.mulf %419, %417 : vector<8x32xf32>
    %421 = arith.addf %377, %420 : vector<8x32xf32>
    %c9_219 = arith.constant 9 : index
    %422 = memref.load %arg4[%c9_219] : memref<32xf32, #tpu.memory_space<smem>>
    %423 = vector.broadcast %422 : f32 to vector<8x32xf32>
    %c54 = arith.constant 54 : index
    %424 = memref.load %arg3[%c54] : memref<192xf32, #tpu.memory_space<smem>>
    %c0_220 = arith.constant 0 : index
    %c0_221 = arith.constant 0 : index
    %c0_222 = arith.constant 0 : index
    %425 = vector.load %arg8[%c0_220, %c0_221, %c0_222] : memref<6x8x32xf32, #tpu.memory_space<vmem>>, vector<1x8x32xf32>
    %426 = vector.shape_cast %425 : vector<1x8x32xf32> to vector<8x32xf32>
    %427 = vector.broadcast %424 : f32 to vector<8x32xf32>
    %428 = arith.mulf %427, %426 : vector<8x32xf32>
    %429 = arith.addf %423, %428 : vector<8x32xf32>
    %c55 = arith.constant 55 : index
    %430 = memref.load %arg3[%c55] : memref<192xf32, #tpu.memory_space<smem>>
    %c1_223 = arith.constant 1 : index
    %c0_224 = arith.constant 0 : index
    %c0_225 = arith.constant 0 : index
    %431 = vector.load %arg8[%c1_223, %c0_224, %c0_225] : memref<6x8x32xf32, #tpu.memory_space<vmem>>, vector<1x8x32xf32>
    %432 = vector.shape_cast %431 : vector<1x8x32xf32> to vector<8x32xf32>
    %433 = vector.broadcast %430 : f32 to vector<8x32xf32>
    %434 = arith.mulf %433, %432 : vector<8x32xf32>
    %435 = arith.addf %429, %434 : vector<8x32xf32>
    %c56 = arith.constant 56 : index
    %436 = memref.load %arg3[%c56] : memref<192xf32, #tpu.memory_space<smem>>
    %c2_226 = arith.constant 2 : index
    %c0_227 = arith.constant 0 : index
    %c0_228 = arith.constant 0 : index
    %437 = vector.load %arg8[%c2_226, %c0_227, %c0_228] : memref<6x8x32xf32, #tpu.memory_space<vmem>>, vector<1x8x32xf32>
    %438 = vector.shape_cast %437 : vector<1x8x32xf32> to vector<8x32xf32>
    %439 = vector.broadcast %436 : f32 to vector<8x32xf32>
    %440 = arith.mulf %439, %438 : vector<8x32xf32>
    %441 = arith.addf %435, %440 : vector<8x32xf32>
    %c57 = arith.constant 57 : index
    %442 = memref.load %arg3[%c57] : memref<192xf32, #tpu.memory_space<smem>>
    %c3_229 = arith.constant 3 : index
    %c0_230 = arith.constant 0 : index
    %c0_231 = arith.constant 0 : index
    %443 = vector.load %arg8[%c3_229, %c0_230, %c0_231] : memref<6x8x32xf32, #tpu.memory_space<vmem>>, vector<1x8x32xf32>
    %444 = vector.shape_cast %443 : vector<1x8x32xf32> to vector<8x32xf32>
    %445 = vector.broadcast %442 : f32 to vector<8x32xf32>
    %446 = arith.mulf %445, %444 : vector<8x32xf32>
    %447 = arith.addf %441, %446 : vector<8x32xf32>
    %c58 = arith.constant 58 : index
    %448 = memref.load %arg3[%c58] : memref<192xf32, #tpu.memory_space<smem>>
    %c4_232 = arith.constant 4 : index
    %c0_233 = arith.constant 0 : index
    %c0_234 = arith.constant 0 : index
    %449 = vector.load %arg8[%c4_232, %c0_233, %c0_234] : memref<6x8x32xf32, #tpu.memory_space<vmem>>, vector<1x8x32xf32>
    %450 = vector.shape_cast %449 : vector<1x8x32xf32> to vector<8x32xf32>
    %451 = vector.broadcast %448 : f32 to vector<8x32xf32>
    %452 = arith.mulf %451, %450 : vector<8x32xf32>
    %453 = arith.addf %447, %452 : vector<8x32xf32>
    %c59 = arith.constant 59 : index
    %454 = memref.load %arg3[%c59] : memref<192xf32, #tpu.memory_space<smem>>
    %c5_235 = arith.constant 5 : index
    %c0_236 = arith.constant 0 : index
    %c0_237 = arith.constant 0 : index
    %455 = vector.load %arg8[%c5_235, %c0_236, %c0_237] : memref<6x8x32xf32, #tpu.memory_space<vmem>>, vector<1x8x32xf32>
    %456 = vector.shape_cast %455 : vector<1x8x32xf32> to vector<8x32xf32>
    %457 = vector.broadcast %454 : f32 to vector<8x32xf32>
    %458 = arith.mulf %457, %456 : vector<8x32xf32>
    %459 = arith.addf %453, %458 : vector<8x32xf32>
    %cst_238 = arith.constant 0.000000e+00 : f32
    %460 = vector.broadcast %cst_238 : f32 to vector<8x32xf32>
    %461 = arith.maximumf %459, %460 : vector<8x32xf32>
    %c9_239 = arith.constant 9 : index
    %462 = memref.load %arg5[%c9_239] : memref<32xf32, #tpu.memory_space<smem>>
    %463 = vector.broadcast %462 : f32 to vector<8x32xf32>
    %464 = arith.mulf %463, %461 : vector<8x32xf32>
    %465 = arith.addf %421, %464 : vector<8x32xf32>
    %c10_240 = arith.constant 10 : index
    %466 = memref.load %arg4[%c10_240] : memref<32xf32, #tpu.memory_space<smem>>
    %467 = vector.broadcast %466 : f32 to vector<8x32xf32>
    %c60 = arith.constant 60 : index
    %468 = memref.load %arg3[%c60] : memref<192xf32, #tpu.memory_space<smem>>
    %c0_241 = arith.constant 0 : index
    %c0_242 = arith.constant 0 : index
    %c0_243 = arith.constant 0 : index
    %469 = vector.load %arg8[%c0_241, %c0_242, %c0_243] : memref<6x8x32xf32, #tpu.memory_space<vmem>>, vector<1x8x32xf32>
    %470 = vector.shape_cast %469 : vector<1x8x32xf32> to vector<8x32xf32>
    %471 = vector.broadcast %468 : f32 to vector<8x32xf32>
    %472 = arith.mulf %471, %470 : vector<8x32xf32>
    %473 = arith.addf %467, %472 : vector<8x32xf32>
    %c61 = arith.constant 61 : index
    %474 = memref.load %arg3[%c61] : memref<192xf32, #tpu.memory_space<smem>>
    %c1_244 = arith.constant 1 : index
    %c0_245 = arith.constant 0 : index
    %c0_246 = arith.constant 0 : index
    %475 = vector.load %arg8[%c1_244, %c0_245, %c0_246] : memref<6x8x32xf32, #tpu.memory_space<vmem>>, vector<1x8x32xf32>
    %476 = vector.shape_cast %475 : vector<1x8x32xf32> to vector<8x32xf32>
    %477 = vector.broadcast %474 : f32 to vector<8x32xf32>
    %478 = arith.mulf %477, %476 : vector<8x32xf32>
    %479 = arith.addf %473, %478 : vector<8x32xf32>
    %c62 = arith.constant 62 : index
    %480 = memref.load %arg3[%c62] : memref<192xf32, #tpu.memory_space<smem>>
    %c2_247 = arith.constant 2 : index
    %c0_248 = arith.constant 0 : index
    %c0_249 = arith.constant 0 : index
    %481 = vector.load %arg8[%c2_247, %c0_248, %c0_249] : memref<6x8x32xf32, #tpu.memory_space<vmem>>, vector<1x8x32xf32>
    %482 = vector.shape_cast %481 : vector<1x8x32xf32> to vector<8x32xf32>
    %483 = vector.broadcast %480 : f32 to vector<8x32xf32>
    %484 = arith.mulf %483, %482 : vector<8x32xf32>
    %485 = arith.addf %479, %484 : vector<8x32xf32>
    %c63 = arith.constant 63 : index
    %486 = memref.load %arg3[%c63] : memref<192xf32, #tpu.memory_space<smem>>
    %c3_250 = arith.constant 3 : index
    %c0_251 = arith.constant 0 : index
    %c0_252 = arith.constant 0 : index
    %487 = vector.load %arg8[%c3_250, %c0_251, %c0_252] : memref<6x8x32xf32, #tpu.memory_space<vmem>>, vector<1x8x32xf32>
    %488 = vector.shape_cast %487 : vector<1x8x32xf32> to vector<8x32xf32>
    %489 = vector.broadcast %486 : f32 to vector<8x32xf32>
    %490 = arith.mulf %489, %488 : vector<8x32xf32>
    %491 = arith.addf %485, %490 : vector<8x32xf32>
    %c64 = arith.constant 64 : index
    %492 = memref.load %arg3[%c64] : memref<192xf32, #tpu.memory_space<smem>>
    %c4_253 = arith.constant 4 : index
    %c0_254 = arith.constant 0 : index
    %c0_255 = arith.constant 0 : index
    %493 = vector.load %arg8[%c4_253, %c0_254, %c0_255] : memref<6x8x32xf32, #tpu.memory_space<vmem>>, vector<1x8x32xf32>
    %494 = vector.shape_cast %493 : vector<1x8x32xf32> to vector<8x32xf32>
    %495 = vector.broadcast %492 : f32 to vector<8x32xf32>
    %496 = arith.mulf %495, %494 : vector<8x32xf32>
    %497 = arith.addf %491, %496 : vector<8x32xf32>
    %c65 = arith.constant 65 : index
    %498 = memref.load %arg3[%c65] : memref<192xf32, #tpu.memory_space<smem>>
    %c5_256 = arith.constant 5 : index
    %c0_257 = arith.constant 0 : index
    %c0_258 = arith.constant 0 : index
    %499 = vector.load %arg8[%c5_256, %c0_257, %c0_258] : memref<6x8x32xf32, #tpu.memory_space<vmem>>, vector<1x8x32xf32>
    %500 = vector.shape_cast %499 : vector<1x8x32xf32> to vector<8x32xf32>
    %501 = vector.broadcast %498 : f32 to vector<8x32xf32>
    %502 = arith.mulf %501, %500 : vector<8x32xf32>
    %503 = arith.addf %497, %502 : vector<8x32xf32>
    %cst_259 = arith.constant 0.000000e+00 : f32
    %504 = vector.broadcast %cst_259 : f32 to vector<8x32xf32>
    %505 = arith.maximumf %503, %504 : vector<8x32xf32>
    %c10_260 = arith.constant 10 : index
    %506 = memref.load %arg5[%c10_260] : memref<32xf32, #tpu.memory_space<smem>>
    %507 = vector.broadcast %506 : f32 to vector<8x32xf32>
    %508 = arith.mulf %507, %505 : vector<8x32xf32>
    %509 = arith.addf %465, %508 : vector<8x32xf32>
    %c11_261 = arith.constant 11 : index
    %510 = memref.load %arg4[%c11_261] : memref<32xf32, #tpu.memory_space<smem>>
    %511 = vector.broadcast %510 : f32 to vector<8x32xf32>
    %c66 = arith.constant 66 : index
    %512 = memref.load %arg3[%c66] : memref<192xf32, #tpu.memory_space<smem>>
    %c0_262 = arith.constant 0 : index
    %c0_263 = arith.constant 0 : index
    %c0_264 = arith.constant 0 : index
    %513 = vector.load %arg8[%c0_262, %c0_263, %c0_264] : memref<6x8x32xf32, #tpu.memory_space<vmem>>, vector<1x8x32xf32>
    %514 = vector.shape_cast %513 : vector<1x8x32xf32> to vector<8x32xf32>
    %515 = vector.broadcast %512 : f32 to vector<8x32xf32>
    %516 = arith.mulf %515, %514 : vector<8x32xf32>
    %517 = arith.addf %511, %516 : vector<8x32xf32>
    %c67 = arith.constant 67 : index
    %518 = memref.load %arg3[%c67] : memref<192xf32, #tpu.memory_space<smem>>
    %c1_265 = arith.constant 1 : index
    %c0_266 = arith.constant 0 : index
    %c0_267 = arith.constant 0 : index
    %519 = vector.load %arg8[%c1_265, %c0_266, %c0_267] : memref<6x8x32xf32, #tpu.memory_space<vmem>>, vector<1x8x32xf32>
    %520 = vector.shape_cast %519 : vector<1x8x32xf32> to vector<8x32xf32>
    %521 = vector.broadcast %518 : f32 to vector<8x32xf32>
    %522 = arith.mulf %521, %520 : vector<8x32xf32>
    %523 = arith.addf %517, %522 : vector<8x32xf32>
    %c68 = arith.constant 68 : index
    %524 = memref.load %arg3[%c68] : memref<192xf32, #tpu.memory_space<smem>>
    %c2_268 = arith.constant 2 : index
    %c0_269 = arith.constant 0 : index
    %c0_270 = arith.constant 0 : index
    %525 = vector.load %arg8[%c2_268, %c0_269, %c0_270] : memref<6x8x32xf32, #tpu.memory_space<vmem>>, vector<1x8x32xf32>
    %526 = vector.shape_cast %525 : vector<1x8x32xf32> to vector<8x32xf32>
    %527 = vector.broadcast %524 : f32 to vector<8x32xf32>
    %528 = arith.mulf %527, %526 : vector<8x32xf32>
    %529 = arith.addf %523, %528 : vector<8x32xf32>
    %c69 = arith.constant 69 : index
    %530 = memref.load %arg3[%c69] : memref<192xf32, #tpu.memory_space<smem>>
    %c3_271 = arith.constant 3 : index
    %c0_272 = arith.constant 0 : index
    %c0_273 = arith.constant 0 : index
    %531 = vector.load %arg8[%c3_271, %c0_272, %c0_273] : memref<6x8x32xf32, #tpu.memory_space<vmem>>, vector<1x8x32xf32>
    %532 = vector.shape_cast %531 : vector<1x8x32xf32> to vector<8x32xf32>
    %533 = vector.broadcast %530 : f32 to vector<8x32xf32>
    %534 = arith.mulf %533, %532 : vector<8x32xf32>
    %535 = arith.addf %529, %534 : vector<8x32xf32>
    %c70 = arith.constant 70 : index
    %536 = memref.load %arg3[%c70] : memref<192xf32, #tpu.memory_space<smem>>
    %c4_274 = arith.constant 4 : index
    %c0_275 = arith.constant 0 : index
    %c0_276 = arith.constant 0 : index
    %537 = vector.load %arg8[%c4_274, %c0_275, %c0_276] : memref<6x8x32xf32, #tpu.memory_space<vmem>>, vector<1x8x32xf32>
    %538 = vector.shape_cast %537 : vector<1x8x32xf32> to vector<8x32xf32>
    %539 = vector.broadcast %536 : f32 to vector<8x32xf32>
    %540 = arith.mulf %539, %538 : vector<8x32xf32>
    %541 = arith.addf %535, %540 : vector<8x32xf32>
    %c71 = arith.constant 71 : index
    %542 = memref.load %arg3[%c71] : memref<192xf32, #tpu.memory_space<smem>>
    %c5_277 = arith.constant 5 : index
    %c0_278 = arith.constant 0 : index
    %c0_279 = arith.constant 0 : index
    %543 = vector.load %arg8[%c5_277, %c0_278, %c0_279] : memref<6x8x32xf32, #tpu.memory_space<vmem>>, vector<1x8x32xf32>
    %544 = vector.shape_cast %543 : vector<1x8x32xf32> to vector<8x32xf32>
    %545 = vector.broadcast %542 : f32 to vector<8x32xf32>
    %546 = arith.mulf %545, %544 : vector<8x32xf32>
    %547 = arith.addf %541, %546 : vector<8x32xf32>
    %cst_280 = arith.constant 0.000000e+00 : f32
    %548 = vector.broadcast %cst_280 : f32 to vector<8x32xf32>
    %549 = arith.maximumf %547, %548 : vector<8x32xf32>
    %c11_281 = arith.constant 11 : index
    %550 = memref.load %arg5[%c11_281] : memref<32xf32, #tpu.memory_space<smem>>
    %551 = vector.broadcast %550 : f32 to vector<8x32xf32>
    %552 = arith.mulf %551, %549 : vector<8x32xf32>
    %553 = arith.addf %509, %552 : vector<8x32xf32>
    %c12_282 = arith.constant 12 : index
    %554 = memref.load %arg4[%c12_282] : memref<32xf32, #tpu.memory_space<smem>>
    %555 = vector.broadcast %554 : f32 to vector<8x32xf32>
    %c72 = arith.constant 72 : index
    %556 = memref.load %arg3[%c72] : memref<192xf32, #tpu.memory_space<smem>>
    %c0_283 = arith.constant 0 : index
    %c0_284 = arith.constant 0 : index
    %c0_285 = arith.constant 0 : index
    %557 = vector.load %arg8[%c0_283, %c0_284, %c0_285] : memref<6x8x32xf32, #tpu.memory_space<vmem>>, vector<1x8x32xf32>
    %558 = vector.shape_cast %557 : vector<1x8x32xf32> to vector<8x32xf32>
    %559 = vector.broadcast %556 : f32 to vector<8x32xf32>
    %560 = arith.mulf %559, %558 : vector<8x32xf32>
    %561 = arith.addf %555, %560 : vector<8x32xf32>
    %c73 = arith.constant 73 : index
    %562 = memref.load %arg3[%c73] : memref<192xf32, #tpu.memory_space<smem>>
    %c1_286 = arith.constant 1 : index
    %c0_287 = arith.constant 0 : index
    %c0_288 = arith.constant 0 : index
    %563 = vector.load %arg8[%c1_286, %c0_287, %c0_288] : memref<6x8x32xf32, #tpu.memory_space<vmem>>, vector<1x8x32xf32>
    %564 = vector.shape_cast %563 : vector<1x8x32xf32> to vector<8x32xf32>
    %565 = vector.broadcast %562 : f32 to vector<8x32xf32>
    %566 = arith.mulf %565, %564 : vector<8x32xf32>
    %567 = arith.addf %561, %566 : vector<8x32xf32>
    %c74 = arith.constant 74 : index
    %568 = memref.load %arg3[%c74] : memref<192xf32, #tpu.memory_space<smem>>
    %c2_289 = arith.constant 2 : index
    %c0_290 = arith.constant 0 : index
    %c0_291 = arith.constant 0 : index
    %569 = vector.load %arg8[%c2_289, %c0_290, %c0_291] : memref<6x8x32xf32, #tpu.memory_space<vmem>>, vector<1x8x32xf32>
    %570 = vector.shape_cast %569 : vector<1x8x32xf32> to vector<8x32xf32>
    %571 = vector.broadcast %568 : f32 to vector<8x32xf32>
    %572 = arith.mulf %571, %570 : vector<8x32xf32>
    %573 = arith.addf %567, %572 : vector<8x32xf32>
    %c75 = arith.constant 75 : index
    %574 = memref.load %arg3[%c75] : memref<192xf32, #tpu.memory_space<smem>>
    %c3_292 = arith.constant 3 : index
    %c0_293 = arith.constant 0 : index
    %c0_294 = arith.constant 0 : index
    %575 = vector.load %arg8[%c3_292, %c0_293, %c0_294] : memref<6x8x32xf32, #tpu.memory_space<vmem>>, vector<1x8x32xf32>
    %576 = vector.shape_cast %575 : vector<1x8x32xf32> to vector<8x32xf32>
    %577 = vector.broadcast %574 : f32 to vector<8x32xf32>
    %578 = arith.mulf %577, %576 : vector<8x32xf32>
    %579 = arith.addf %573, %578 : vector<8x32xf32>
    %c76 = arith.constant 76 : index
    %580 = memref.load %arg3[%c76] : memref<192xf32, #tpu.memory_space<smem>>
    %c4_295 = arith.constant 4 : index
    %c0_296 = arith.constant 0 : index
    %c0_297 = arith.constant 0 : index
    %581 = vector.load %arg8[%c4_295, %c0_296, %c0_297] : memref<6x8x32xf32, #tpu.memory_space<vmem>>, vector<1x8x32xf32>
    %582 = vector.shape_cast %581 : vector<1x8x32xf32> to vector<8x32xf32>
    %583 = vector.broadcast %580 : f32 to vector<8x32xf32>
    %584 = arith.mulf %583, %582 : vector<8x32xf32>
    %585 = arith.addf %579, %584 : vector<8x32xf32>
    %c77 = arith.constant 77 : index
    %586 = memref.load %arg3[%c77] : memref<192xf32, #tpu.memory_space<smem>>
    %c5_298 = arith.constant 5 : index
    %c0_299 = arith.constant 0 : index
    %c0_300 = arith.constant 0 : index
    %587 = vector.load %arg8[%c5_298, %c0_299, %c0_300] : memref<6x8x32xf32, #tpu.memory_space<vmem>>, vector<1x8x32xf32>
    %588 = vector.shape_cast %587 : vector<1x8x32xf32> to vector<8x32xf32>
    %589 = vector.broadcast %586 : f32 to vector<8x32xf32>
    %590 = arith.mulf %589, %588 : vector<8x32xf32>
    %591 = arith.addf %585, %590 : vector<8x32xf32>
    %cst_301 = arith.constant 0.000000e+00 : f32
    %592 = vector.broadcast %cst_301 : f32 to vector<8x32xf32>
    %593 = arith.maximumf %591, %592 : vector<8x32xf32>
    %c12_302 = arith.constant 12 : index
    %594 = memref.load %arg5[%c12_302] : memref<32xf32, #tpu.memory_space<smem>>
    %595 = vector.broadcast %594 : f32 to vector<8x32xf32>
    %596 = arith.mulf %595, %593 : vector<8x32xf32>
    %597 = arith.addf %553, %596 : vector<8x32xf32>
    %c13_303 = arith.constant 13 : index
    %598 = memref.load %arg4[%c13_303] : memref<32xf32, #tpu.memory_space<smem>>
    %599 = vector.broadcast %598 : f32 to vector<8x32xf32>
    %c78 = arith.constant 78 : index
    %600 = memref.load %arg3[%c78] : memref<192xf32, #tpu.memory_space<smem>>
    %c0_304 = arith.constant 0 : index
    %c0_305 = arith.constant 0 : index
    %c0_306 = arith.constant 0 : index
    %601 = vector.load %arg8[%c0_304, %c0_305, %c0_306] : memref<6x8x32xf32, #tpu.memory_space<vmem>>, vector<1x8x32xf32>
    %602 = vector.shape_cast %601 : vector<1x8x32xf32> to vector<8x32xf32>
    %603 = vector.broadcast %600 : f32 to vector<8x32xf32>
    %604 = arith.mulf %603, %602 : vector<8x32xf32>
    %605 = arith.addf %599, %604 : vector<8x32xf32>
    %c79 = arith.constant 79 : index
    %606 = memref.load %arg3[%c79] : memref<192xf32, #tpu.memory_space<smem>>
    %c1_307 = arith.constant 1 : index
    %c0_308 = arith.constant 0 : index
    %c0_309 = arith.constant 0 : index
    %607 = vector.load %arg8[%c1_307, %c0_308, %c0_309] : memref<6x8x32xf32, #tpu.memory_space<vmem>>, vector<1x8x32xf32>
    %608 = vector.shape_cast %607 : vector<1x8x32xf32> to vector<8x32xf32>
    %609 = vector.broadcast %606 : f32 to vector<8x32xf32>
    %610 = arith.mulf %609, %608 : vector<8x32xf32>
    %611 = arith.addf %605, %610 : vector<8x32xf32>
    %c80 = arith.constant 80 : index
    %612 = memref.load %arg3[%c80] : memref<192xf32, #tpu.memory_space<smem>>
    %c2_310 = arith.constant 2 : index
    %c0_311 = arith.constant 0 : index
    %c0_312 = arith.constant 0 : index
    %613 = vector.load %arg8[%c2_310, %c0_311, %c0_312] : memref<6x8x32xf32, #tpu.memory_space<vmem>>, vector<1x8x32xf32>
    %614 = vector.shape_cast %613 : vector<1x8x32xf32> to vector<8x32xf32>
    %615 = vector.broadcast %612 : f32 to vector<8x32xf32>
    %616 = arith.mulf %615, %614 : vector<8x32xf32>
    %617 = arith.addf %611, %616 : vector<8x32xf32>
    %c81 = arith.constant 81 : index
    %618 = memref.load %arg3[%c81] : memref<192xf32, #tpu.memory_space<smem>>
    %c3_313 = arith.constant 3 : index
    %c0_314 = arith.constant 0 : index
    %c0_315 = arith.constant 0 : index
    %619 = vector.load %arg8[%c3_313, %c0_314, %c0_315] : memref<6x8x32xf32, #tpu.memory_space<vmem>>, vector<1x8x32xf32>
    %620 = vector.shape_cast %619 : vector<1x8x32xf32> to vector<8x32xf32>
    %621 = vector.broadcast %618 : f32 to vector<8x32xf32>
    %622 = arith.mulf %621, %620 : vector<8x32xf32>
    %623 = arith.addf %617, %622 : vector<8x32xf32>
    %c82 = arith.constant 82 : index
    %624 = memref.load %arg3[%c82] : memref<192xf32, #tpu.memory_space<smem>>
    %c4_316 = arith.constant 4 : index
    %c0_317 = arith.constant 0 : index
    %c0_318 = arith.constant 0 : index
    %625 = vector.load %arg8[%c4_316, %c0_317, %c0_318] : memref<6x8x32xf32, #tpu.memory_space<vmem>>, vector<1x8x32xf32>
    %626 = vector.shape_cast %625 : vector<1x8x32xf32> to vector<8x32xf32>
    %627 = vector.broadcast %624 : f32 to vector<8x32xf32>
    %628 = arith.mulf %627, %626 : vector<8x32xf32>
    %629 = arith.addf %623, %628 : vector<8x32xf32>
    %c83 = arith.constant 83 : index
    %630 = memref.load %arg3[%c83] : memref<192xf32, #tpu.memory_space<smem>>
    %c5_319 = arith.constant 5 : index
    %c0_320 = arith.constant 0 : index
    %c0_321 = arith.constant 0 : index
    %631 = vector.load %arg8[%c5_319, %c0_320, %c0_321] : memref<6x8x32xf32, #tpu.memory_space<vmem>>, vector<1x8x32xf32>
    %632 = vector.shape_cast %631 : vector<1x8x32xf32> to vector<8x32xf32>
    %633 = vector.broadcast %630 : f32 to vector<8x32xf32>
    %634 = arith.mulf %633, %632 : vector<8x32xf32>
    %635 = arith.addf %629, %634 : vector<8x32xf32>
    %cst_322 = arith.constant 0.000000e+00 : f32
    %636 = vector.broadcast %cst_322 : f32 to vector<8x32xf32>
    %637 = arith.maximumf %635, %636 : vector<8x32xf32>
    %c13_323 = arith.constant 13 : index
    %638 = memref.load %arg5[%c13_323] : memref<32xf32, #tpu.memory_space<smem>>
    %639 = vector.broadcast %638 : f32 to vector<8x32xf32>
    %640 = arith.mulf %639, %637 : vector<8x32xf32>
    %641 = arith.addf %597, %640 : vector<8x32xf32>
    %c14_324 = arith.constant 14 : index
    %642 = memref.load %arg4[%c14_324] : memref<32xf32, #tpu.memory_space<smem>>
    %643 = vector.broadcast %642 : f32 to vector<8x32xf32>
    %c84 = arith.constant 84 : index
    %644 = memref.load %arg3[%c84] : memref<192xf32, #tpu.memory_space<smem>>
    %c0_325 = arith.constant 0 : index
    %c0_326 = arith.constant 0 : index
    %c0_327 = arith.constant 0 : index
    %645 = vector.load %arg8[%c0_325, %c0_326, %c0_327] : memref<6x8x32xf32, #tpu.memory_space<vmem>>, vector<1x8x32xf32>
    %646 = vector.shape_cast %645 : vector<1x8x32xf32> to vector<8x32xf32>
    %647 = vector.broadcast %644 : f32 to vector<8x32xf32>
    %648 = arith.mulf %647, %646 : vector<8x32xf32>
    %649 = arith.addf %643, %648 : vector<8x32xf32>
    %c85 = arith.constant 85 : index
    %650 = memref.load %arg3[%c85] : memref<192xf32, #tpu.memory_space<smem>>
    %c1_328 = arith.constant 1 : index
    %c0_329 = arith.constant 0 : index
    %c0_330 = arith.constant 0 : index
    %651 = vector.load %arg8[%c1_328, %c0_329, %c0_330] : memref<6x8x32xf32, #tpu.memory_space<vmem>>, vector<1x8x32xf32>
    %652 = vector.shape_cast %651 : vector<1x8x32xf32> to vector<8x32xf32>
    %653 = vector.broadcast %650 : f32 to vector<8x32xf32>
    %654 = arith.mulf %653, %652 : vector<8x32xf32>
    %655 = arith.addf %649, %654 : vector<8x32xf32>
    %c86 = arith.constant 86 : index
    %656 = memref.load %arg3[%c86] : memref<192xf32, #tpu.memory_space<smem>>
    %c2_331 = arith.constant 2 : index
    %c0_332 = arith.constant 0 : index
    %c0_333 = arith.constant 0 : index
    %657 = vector.load %arg8[%c2_331, %c0_332, %c0_333] : memref<6x8x32xf32, #tpu.memory_space<vmem>>, vector<1x8x32xf32>
    %658 = vector.shape_cast %657 : vector<1x8x32xf32> to vector<8x32xf32>
    %659 = vector.broadcast %656 : f32 to vector<8x32xf32>
    %660 = arith.mulf %659, %658 : vector<8x32xf32>
    %661 = arith.addf %655, %660 : vector<8x32xf32>
    %c87 = arith.constant 87 : index
    %662 = memref.load %arg3[%c87] : memref<192xf32, #tpu.memory_space<smem>>
    %c3_334 = arith.constant 3 : index
    %c0_335 = arith.constant 0 : index
    %c0_336 = arith.constant 0 : index
    %663 = vector.load %arg8[%c3_334, %c0_335, %c0_336] : memref<6x8x32xf32, #tpu.memory_space<vmem>>, vector<1x8x32xf32>
    %664 = vector.shape_cast %663 : vector<1x8x32xf32> to vector<8x32xf32>
    %665 = vector.broadcast %662 : f32 to vector<8x32xf32>
    %666 = arith.mulf %665, %664 : vector<8x32xf32>
    %667 = arith.addf %661, %666 : vector<8x32xf32>
    %c88 = arith.constant 88 : index
    %668 = memref.load %arg3[%c88] : memref<192xf32, #tpu.memory_space<smem>>
    %c4_337 = arith.constant 4 : index
    %c0_338 = arith.constant 0 : index
    %c0_339 = arith.constant 0 : index
    %669 = vector.load %arg8[%c4_337, %c0_338, %c0_339] : memref<6x8x32xf32, #tpu.memory_space<vmem>>, vector<1x8x32xf32>
    %670 = vector.shape_cast %669 : vector<1x8x32xf32> to vector<8x32xf32>
    %671 = vector.broadcast %668 : f32 to vector<8x32xf32>
    %672 = arith.mulf %671, %670 : vector<8x32xf32>
    %673 = arith.addf %667, %672 : vector<8x32xf32>
    %c89 = arith.constant 89 : index
    %674 = memref.load %arg3[%c89] : memref<192xf32, #tpu.memory_space<smem>>
    %c5_340 = arith.constant 5 : index
    %c0_341 = arith.constant 0 : index
    %c0_342 = arith.constant 0 : index
    %675 = vector.load %arg8[%c5_340, %c0_341, %c0_342] : memref<6x8x32xf32, #tpu.memory_space<vmem>>, vector<1x8x32xf32>
    %676 = vector.shape_cast %675 : vector<1x8x32xf32> to vector<8x32xf32>
    %677 = vector.broadcast %674 : f32 to vector<8x32xf32>
    %678 = arith.mulf %677, %676 : vector<8x32xf32>
    %679 = arith.addf %673, %678 : vector<8x32xf32>
    %cst_343 = arith.constant 0.000000e+00 : f32
    %680 = vector.broadcast %cst_343 : f32 to vector<8x32xf32>
    %681 = arith.maximumf %679, %680 : vector<8x32xf32>
    %c14_344 = arith.constant 14 : index
    %682 = memref.load %arg5[%c14_344] : memref<32xf32, #tpu.memory_space<smem>>
    %683 = vector.broadcast %682 : f32 to vector<8x32xf32>
    %684 = arith.mulf %683, %681 : vector<8x32xf32>
    %685 = arith.addf %641, %684 : vector<8x32xf32>
    %c15_345 = arith.constant 15 : index
    %686 = memref.load %arg4[%c15_345] : memref<32xf32, #tpu.memory_space<smem>>
    %687 = vector.broadcast %686 : f32 to vector<8x32xf32>
    %c90 = arith.constant 90 : index
    %688 = memref.load %arg3[%c90] : memref<192xf32, #tpu.memory_space<smem>>
    %c0_346 = arith.constant 0 : index
    %c0_347 = arith.constant 0 : index
    %c0_348 = arith.constant 0 : index
    %689 = vector.load %arg8[%c0_346, %c0_347, %c0_348] : memref<6x8x32xf32, #tpu.memory_space<vmem>>, vector<1x8x32xf32>
    %690 = vector.shape_cast %689 : vector<1x8x32xf32> to vector<8x32xf32>
    %691 = vector.broadcast %688 : f32 to vector<8x32xf32>
    %692 = arith.mulf %691, %690 : vector<8x32xf32>
    %693 = arith.addf %687, %692 : vector<8x32xf32>
    %c91 = arith.constant 91 : index
    %694 = memref.load %arg3[%c91] : memref<192xf32, #tpu.memory_space<smem>>
    %c1_349 = arith.constant 1 : index
    %c0_350 = arith.constant 0 : index
    %c0_351 = arith.constant 0 : index
    %695 = vector.load %arg8[%c1_349, %c0_350, %c0_351] : memref<6x8x32xf32, #tpu.memory_space<vmem>>, vector<1x8x32xf32>
    %696 = vector.shape_cast %695 : vector<1x8x32xf32> to vector<8x32xf32>
    %697 = vector.broadcast %694 : f32 to vector<8x32xf32>
    %698 = arith.mulf %697, %696 : vector<8x32xf32>
    %699 = arith.addf %693, %698 : vector<8x32xf32>
    %c92 = arith.constant 92 : index
    %700 = memref.load %arg3[%c92] : memref<192xf32, #tpu.memory_space<smem>>
    %c2_352 = arith.constant 2 : index
    %c0_353 = arith.constant 0 : index
    %c0_354 = arith.constant 0 : index
    %701 = vector.load %arg8[%c2_352, %c0_353, %c0_354] : memref<6x8x32xf32, #tpu.memory_space<vmem>>, vector<1x8x32xf32>
    %702 = vector.shape_cast %701 : vector<1x8x32xf32> to vector<8x32xf32>
    %703 = vector.broadcast %700 : f32 to vector<8x32xf32>
    %704 = arith.mulf %703, %702 : vector<8x32xf32>
    %705 = arith.addf %699, %704 : vector<8x32xf32>
    %c93 = arith.constant 93 : index
    %706 = memref.load %arg3[%c93] : memref<192xf32, #tpu.memory_space<smem>>
    %c3_355 = arith.constant 3 : index
    %c0_356 = arith.constant 0 : index
    %c0_357 = arith.constant 0 : index
    %707 = vector.load %arg8[%c3_355, %c0_356, %c0_357] : memref<6x8x32xf32, #tpu.memory_space<vmem>>, vector<1x8x32xf32>
    %708 = vector.shape_cast %707 : vector<1x8x32xf32> to vector<8x32xf32>
    %709 = vector.broadcast %706 : f32 to vector<8x32xf32>
    %710 = arith.mulf %709, %708 : vector<8x32xf32>
    %711 = arith.addf %705, %710 : vector<8x32xf32>
    %c94 = arith.constant 94 : index
    %712 = memref.load %arg3[%c94] : memref<192xf32, #tpu.memory_space<smem>>
    %c4_358 = arith.constant 4 : index
    %c0_359 = arith.constant 0 : index
    %c0_360 = arith.constant 0 : index
    %713 = vector.load %arg8[%c4_358, %c0_359, %c0_360] : memref<6x8x32xf32, #tpu.memory_space<vmem>>, vector<1x8x32xf32>
    %714 = vector.shape_cast %713 : vector<1x8x32xf32> to vector<8x32xf32>
    %715 = vector.broadcast %712 : f32 to vector<8x32xf32>
    %716 = arith.mulf %715, %714 : vector<8x32xf32>
    %717 = arith.addf %711, %716 : vector<8x32xf32>
    %c95 = arith.constant 95 : index
    %718 = memref.load %arg3[%c95] : memref<192xf32, #tpu.memory_space<smem>>
    %c5_361 = arith.constant 5 : index
    %c0_362 = arith.constant 0 : index
    %c0_363 = arith.constant 0 : index
    %719 = vector.load %arg8[%c5_361, %c0_362, %c0_363] : memref<6x8x32xf32, #tpu.memory_space<vmem>>, vector<1x8x32xf32>
    %720 = vector.shape_cast %719 : vector<1x8x32xf32> to vector<8x32xf32>
    %721 = vector.broadcast %718 : f32 to vector<8x32xf32>
    %722 = arith.mulf %721, %720 : vector<8x32xf32>
    %723 = arith.addf %717, %722 : vector<8x32xf32>
    %cst_364 = arith.constant 0.000000e+00 : f32
    %724 = vector.broadcast %cst_364 : f32 to vector<8x32xf32>
    %725 = arith.maximumf %723, %724 : vector<8x32xf32>
    %c15_365 = arith.constant 15 : index
    %726 = memref.load %arg5[%c15_365] : memref<32xf32, #tpu.memory_space<smem>>
    %727 = vector.broadcast %726 : f32 to vector<8x32xf32>
    %728 = arith.mulf %727, %725 : vector<8x32xf32>
    %729 = arith.addf %685, %728 : vector<8x32xf32>
    %c16_366 = arith.constant 16 : index
    %730 = memref.load %arg4[%c16_366] : memref<32xf32, #tpu.memory_space<smem>>
    %731 = vector.broadcast %730 : f32 to vector<8x32xf32>
    %c96 = arith.constant 96 : index
    %732 = memref.load %arg3[%c96] : memref<192xf32, #tpu.memory_space<smem>>
    %c0_367 = arith.constant 0 : index
    %c0_368 = arith.constant 0 : index
    %c0_369 = arith.constant 0 : index
    %733 = vector.load %arg8[%c0_367, %c0_368, %c0_369] : memref<6x8x32xf32, #tpu.memory_space<vmem>>, vector<1x8x32xf32>
    %734 = vector.shape_cast %733 : vector<1x8x32xf32> to vector<8x32xf32>
    %735 = vector.broadcast %732 : f32 to vector<8x32xf32>
    %736 = arith.mulf %735, %734 : vector<8x32xf32>
    %737 = arith.addf %731, %736 : vector<8x32xf32>
    %c97 = arith.constant 97 : index
    %738 = memref.load %arg3[%c97] : memref<192xf32, #tpu.memory_space<smem>>
    %c1_370 = arith.constant 1 : index
    %c0_371 = arith.constant 0 : index
    %c0_372 = arith.constant 0 : index
    %739 = vector.load %arg8[%c1_370, %c0_371, %c0_372] : memref<6x8x32xf32, #tpu.memory_space<vmem>>, vector<1x8x32xf32>
    %740 = vector.shape_cast %739 : vector<1x8x32xf32> to vector<8x32xf32>
    %741 = vector.broadcast %738 : f32 to vector<8x32xf32>
    %742 = arith.mulf %741, %740 : vector<8x32xf32>
    %743 = arith.addf %737, %742 : vector<8x32xf32>
    %c98 = arith.constant 98 : index
    %744 = memref.load %arg3[%c98] : memref<192xf32, #tpu.memory_space<smem>>
    %c2_373 = arith.constant 2 : index
    %c0_374 = arith.constant 0 : index
    %c0_375 = arith.constant 0 : index
    %745 = vector.load %arg8[%c2_373, %c0_374, %c0_375] : memref<6x8x32xf32, #tpu.memory_space<vmem>>, vector<1x8x32xf32>
    %746 = vector.shape_cast %745 : vector<1x8x32xf32> to vector<8x32xf32>
    %747 = vector.broadcast %744 : f32 to vector<8x32xf32>
    %748 = arith.mulf %747, %746 : vector<8x32xf32>
    %749 = arith.addf %743, %748 : vector<8x32xf32>
    %c99 = arith.constant 99 : index
    %750 = memref.load %arg3[%c99] : memref<192xf32, #tpu.memory_space<smem>>
    %c3_376 = arith.constant 3 : index
    %c0_377 = arith.constant 0 : index
    %c0_378 = arith.constant 0 : index
    %751 = vector.load %arg8[%c3_376, %c0_377, %c0_378] : memref<6x8x32xf32, #tpu.memory_space<vmem>>, vector<1x8x32xf32>
    %752 = vector.shape_cast %751 : vector<1x8x32xf32> to vector<8x32xf32>
    %753 = vector.broadcast %750 : f32 to vector<8x32xf32>
    %754 = arith.mulf %753, %752 : vector<8x32xf32>
    %755 = arith.addf %749, %754 : vector<8x32xf32>
    %c100 = arith.constant 100 : index
    %756 = memref.load %arg3[%c100] : memref<192xf32, #tpu.memory_space<smem>>
    %c4_379 = arith.constant 4 : index
    %c0_380 = arith.constant 0 : index
    %c0_381 = arith.constant 0 : index
    %757 = vector.load %arg8[%c4_379, %c0_380, %c0_381] : memref<6x8x32xf32, #tpu.memory_space<vmem>>, vector<1x8x32xf32>
    %758 = vector.shape_cast %757 : vector<1x8x32xf32> to vector<8x32xf32>
    %759 = vector.broadcast %756 : f32 to vector<8x32xf32>
    %760 = arith.mulf %759, %758 : vector<8x32xf32>
    %761 = arith.addf %755, %760 : vector<8x32xf32>
    %c101 = arith.constant 101 : index
    %762 = memref.load %arg3[%c101] : memref<192xf32, #tpu.memory_space<smem>>
    %c5_382 = arith.constant 5 : index
    %c0_383 = arith.constant 0 : index
    %c0_384 = arith.constant 0 : index
    %763 = vector.load %arg8[%c5_382, %c0_383, %c0_384] : memref<6x8x32xf32, #tpu.memory_space<vmem>>, vector<1x8x32xf32>
    %764 = vector.shape_cast %763 : vector<1x8x32xf32> to vector<8x32xf32>
    %765 = vector.broadcast %762 : f32 to vector<8x32xf32>
    %766 = arith.mulf %765, %764 : vector<8x32xf32>
    %767 = arith.addf %761, %766 : vector<8x32xf32>
    %cst_385 = arith.constant 0.000000e+00 : f32
    %768 = vector.broadcast %cst_385 : f32 to vector<8x32xf32>
    %769 = arith.maximumf %767, %768 : vector<8x32xf32>
    %c16_386 = arith.constant 16 : index
    %770 = memref.load %arg5[%c16_386] : memref<32xf32, #tpu.memory_space<smem>>
    %771 = vector.broadcast %770 : f32 to vector<8x32xf32>
    %772 = arith.mulf %771, %769 : vector<8x32xf32>
    %773 = arith.addf %729, %772 : vector<8x32xf32>
    %c17_387 = arith.constant 17 : index
    %774 = memref.load %arg4[%c17_387] : memref<32xf32, #tpu.memory_space<smem>>
    %775 = vector.broadcast %774 : f32 to vector<8x32xf32>
    %c102 = arith.constant 102 : index
    %776 = memref.load %arg3[%c102] : memref<192xf32, #tpu.memory_space<smem>>
    %c0_388 = arith.constant 0 : index
    %c0_389 = arith.constant 0 : index
    %c0_390 = arith.constant 0 : index
    %777 = vector.load %arg8[%c0_388, %c0_389, %c0_390] : memref<6x8x32xf32, #tpu.memory_space<vmem>>, vector<1x8x32xf32>
    %778 = vector.shape_cast %777 : vector<1x8x32xf32> to vector<8x32xf32>
    %779 = vector.broadcast %776 : f32 to vector<8x32xf32>
    %780 = arith.mulf %779, %778 : vector<8x32xf32>
    %781 = arith.addf %775, %780 : vector<8x32xf32>
    %c103 = arith.constant 103 : index
    %782 = memref.load %arg3[%c103] : memref<192xf32, #tpu.memory_space<smem>>
    %c1_391 = arith.constant 1 : index
    %c0_392 = arith.constant 0 : index
    %c0_393 = arith.constant 0 : index
    %783 = vector.load %arg8[%c1_391, %c0_392, %c0_393] : memref<6x8x32xf32, #tpu.memory_space<vmem>>, vector<1x8x32xf32>
    %784 = vector.shape_cast %783 : vector<1x8x32xf32> to vector<8x32xf32>
    %785 = vector.broadcast %782 : f32 to vector<8x32xf32>
    %786 = arith.mulf %785, %784 : vector<8x32xf32>
    %787 = arith.addf %781, %786 : vector<8x32xf32>
    %c104 = arith.constant 104 : index
    %788 = memref.load %arg3[%c104] : memref<192xf32, #tpu.memory_space<smem>>
    %c2_394 = arith.constant 2 : index
    %c0_395 = arith.constant 0 : index
    %c0_396 = arith.constant 0 : index
    %789 = vector.load %arg8[%c2_394, %c0_395, %c0_396] : memref<6x8x32xf32, #tpu.memory_space<vmem>>, vector<1x8x32xf32>
    %790 = vector.shape_cast %789 : vector<1x8x32xf32> to vector<8x32xf32>
    %791 = vector.broadcast %788 : f32 to vector<8x32xf32>
    %792 = arith.mulf %791, %790 : vector<8x32xf32>
    %793 = arith.addf %787, %792 : vector<8x32xf32>
    %c105 = arith.constant 105 : index
    %794 = memref.load %arg3[%c105] : memref<192xf32, #tpu.memory_space<smem>>
    %c3_397 = arith.constant 3 : index
    %c0_398 = arith.constant 0 : index
    %c0_399 = arith.constant 0 : index
    %795 = vector.load %arg8[%c3_397, %c0_398, %c0_399] : memref<6x8x32xf32, #tpu.memory_space<vmem>>, vector<1x8x32xf32>
    %796 = vector.shape_cast %795 : vector<1x8x32xf32> to vector<8x32xf32>
    %797 = vector.broadcast %794 : f32 to vector<8x32xf32>
    %798 = arith.mulf %797, %796 : vector<8x32xf32>
    %799 = arith.addf %793, %798 : vector<8x32xf32>
    %c106 = arith.constant 106 : index
    %800 = memref.load %arg3[%c106] : memref<192xf32, #tpu.memory_space<smem>>
    %c4_400 = arith.constant 4 : index
    %c0_401 = arith.constant 0 : index
    %c0_402 = arith.constant 0 : index
    %801 = vector.load %arg8[%c4_400, %c0_401, %c0_402] : memref<6x8x32xf32, #tpu.memory_space<vmem>>, vector<1x8x32xf32>
    %802 = vector.shape_cast %801 : vector<1x8x32xf32> to vector<8x32xf32>
    %803 = vector.broadcast %800 : f32 to vector<8x32xf32>
    %804 = arith.mulf %803, %802 : vector<8x32xf32>
    %805 = arith.addf %799, %804 : vector<8x32xf32>
    %c107 = arith.constant 107 : index
    %806 = memref.load %arg3[%c107] : memref<192xf32, #tpu.memory_space<smem>>
    %c5_403 = arith.constant 5 : index
    %c0_404 = arith.constant 0 : index
    %c0_405 = arith.constant 0 : index
    %807 = vector.load %arg8[%c5_403, %c0_404, %c0_405] : memref<6x8x32xf32, #tpu.memory_space<vmem>>, vector<1x8x32xf32>
    %808 = vector.shape_cast %807 : vector<1x8x32xf32> to vector<8x32xf32>
    %809 = vector.broadcast %806 : f32 to vector<8x32xf32>
    %810 = arith.mulf %809, %808 : vector<8x32xf32>
    %811 = arith.addf %805, %810 : vector<8x32xf32>
    %cst_406 = arith.constant 0.000000e+00 : f32
    %812 = vector.broadcast %cst_406 : f32 to vector<8x32xf32>
    %813 = arith.maximumf %811, %812 : vector<8x32xf32>
    %c17_407 = arith.constant 17 : index
    %814 = memref.load %arg5[%c17_407] : memref<32xf32, #tpu.memory_space<smem>>
    %815 = vector.broadcast %814 : f32 to vector<8x32xf32>
    %816 = arith.mulf %815, %813 : vector<8x32xf32>
    %817 = arith.addf %773, %816 : vector<8x32xf32>
    %c18_408 = arith.constant 18 : index
    %818 = memref.load %arg4[%c18_408] : memref<32xf32, #tpu.memory_space<smem>>
    %819 = vector.broadcast %818 : f32 to vector<8x32xf32>
    %c108 = arith.constant 108 : index
    %820 = memref.load %arg3[%c108] : memref<192xf32, #tpu.memory_space<smem>>
    %c0_409 = arith.constant 0 : index
    %c0_410 = arith.constant 0 : index
    %c0_411 = arith.constant 0 : index
    %821 = vector.load %arg8[%c0_409, %c0_410, %c0_411] : memref<6x8x32xf32, #tpu.memory_space<vmem>>, vector<1x8x32xf32>
    %822 = vector.shape_cast %821 : vector<1x8x32xf32> to vector<8x32xf32>
    %823 = vector.broadcast %820 : f32 to vector<8x32xf32>
    %824 = arith.mulf %823, %822 : vector<8x32xf32>
    %825 = arith.addf %819, %824 : vector<8x32xf32>
    %c109 = arith.constant 109 : index
    %826 = memref.load %arg3[%c109] : memref<192xf32, #tpu.memory_space<smem>>
    %c1_412 = arith.constant 1 : index
    %c0_413 = arith.constant 0 : index
    %c0_414 = arith.constant 0 : index
    %827 = vector.load %arg8[%c1_412, %c0_413, %c0_414] : memref<6x8x32xf32, #tpu.memory_space<vmem>>, vector<1x8x32xf32>
    %828 = vector.shape_cast %827 : vector<1x8x32xf32> to vector<8x32xf32>
    %829 = vector.broadcast %826 : f32 to vector<8x32xf32>
    %830 = arith.mulf %829, %828 : vector<8x32xf32>
    %831 = arith.addf %825, %830 : vector<8x32xf32>
    %c110 = arith.constant 110 : index
    %832 = memref.load %arg3[%c110] : memref<192xf32, #tpu.memory_space<smem>>
    %c2_415 = arith.constant 2 : index
    %c0_416 = arith.constant 0 : index
    %c0_417 = arith.constant 0 : index
    %833 = vector.load %arg8[%c2_415, %c0_416, %c0_417] : memref<6x8x32xf32, #tpu.memory_space<vmem>>, vector<1x8x32xf32>
    %834 = vector.shape_cast %833 : vector<1x8x32xf32> to vector<8x32xf32>
    %835 = vector.broadcast %832 : f32 to vector<8x32xf32>
    %836 = arith.mulf %835, %834 : vector<8x32xf32>
    %837 = arith.addf %831, %836 : vector<8x32xf32>
    %c111 = arith.constant 111 : index
    %838 = memref.load %arg3[%c111] : memref<192xf32, #tpu.memory_space<smem>>
    %c3_418 = arith.constant 3 : index
    %c0_419 = arith.constant 0 : index
    %c0_420 = arith.constant 0 : index
    %839 = vector.load %arg8[%c3_418, %c0_419, %c0_420] : memref<6x8x32xf32, #tpu.memory_space<vmem>>, vector<1x8x32xf32>
    %840 = vector.shape_cast %839 : vector<1x8x32xf32> to vector<8x32xf32>
    %841 = vector.broadcast %838 : f32 to vector<8x32xf32>
    %842 = arith.mulf %841, %840 : vector<8x32xf32>
    %843 = arith.addf %837, %842 : vector<8x32xf32>
    %c112 = arith.constant 112 : index
    %844 = memref.load %arg3[%c112] : memref<192xf32, #tpu.memory_space<smem>>
    %c4_421 = arith.constant 4 : index
    %c0_422 = arith.constant 0 : index
    %c0_423 = arith.constant 0 : index
    %845 = vector.load %arg8[%c4_421, %c0_422, %c0_423] : memref<6x8x32xf32, #tpu.memory_space<vmem>>, vector<1x8x32xf32>
    %846 = vector.shape_cast %845 : vector<1x8x32xf32> to vector<8x32xf32>
    %847 = vector.broadcast %844 : f32 to vector<8x32xf32>
    %848 = arith.mulf %847, %846 : vector<8x32xf32>
    %849 = arith.addf %843, %848 : vector<8x32xf32>
    %c113 = arith.constant 113 : index
    %850 = memref.load %arg3[%c113] : memref<192xf32, #tpu.memory_space<smem>>
    %c5_424 = arith.constant 5 : index
    %c0_425 = arith.constant 0 : index
    %c0_426 = arith.constant 0 : index
    %851 = vector.load %arg8[%c5_424, %c0_425, %c0_426] : memref<6x8x32xf32, #tpu.memory_space<vmem>>, vector<1x8x32xf32>
    %852 = vector.shape_cast %851 : vector<1x8x32xf32> to vector<8x32xf32>
    %853 = vector.broadcast %850 : f32 to vector<8x32xf32>
    %854 = arith.mulf %853, %852 : vector<8x32xf32>
    %855 = arith.addf %849, %854 : vector<8x32xf32>
    %cst_427 = arith.constant 0.000000e+00 : f32
    %856 = vector.broadcast %cst_427 : f32 to vector<8x32xf32>
    %857 = arith.maximumf %855, %856 : vector<8x32xf32>
    %c18_428 = arith.constant 18 : index
    %858 = memref.load %arg5[%c18_428] : memref<32xf32, #tpu.memory_space<smem>>
    %859 = vector.broadcast %858 : f32 to vector<8x32xf32>
    %860 = arith.mulf %859, %857 : vector<8x32xf32>
    %861 = arith.addf %817, %860 : vector<8x32xf32>
    %c19_429 = arith.constant 19 : index
    %862 = memref.load %arg4[%c19_429] : memref<32xf32, #tpu.memory_space<smem>>
    %863 = vector.broadcast %862 : f32 to vector<8x32xf32>
    %c114 = arith.constant 114 : index
    %864 = memref.load %arg3[%c114] : memref<192xf32, #tpu.memory_space<smem>>
    %c0_430 = arith.constant 0 : index
    %c0_431 = arith.constant 0 : index
    %c0_432 = arith.constant 0 : index
    %865 = vector.load %arg8[%c0_430, %c0_431, %c0_432] : memref<6x8x32xf32, #tpu.memory_space<vmem>>, vector<1x8x32xf32>
    %866 = vector.shape_cast %865 : vector<1x8x32xf32> to vector<8x32xf32>
    %867 = vector.broadcast %864 : f32 to vector<8x32xf32>
    %868 = arith.mulf %867, %866 : vector<8x32xf32>
    %869 = arith.addf %863, %868 : vector<8x32xf32>
    %c115 = arith.constant 115 : index
    %870 = memref.load %arg3[%c115] : memref<192xf32, #tpu.memory_space<smem>>
    %c1_433 = arith.constant 1 : index
    %c0_434 = arith.constant 0 : index
    %c0_435 = arith.constant 0 : index
    %871 = vector.load %arg8[%c1_433, %c0_434, %c0_435] : memref<6x8x32xf32, #tpu.memory_space<vmem>>, vector<1x8x32xf32>
    %872 = vector.shape_cast %871 : vector<1x8x32xf32> to vector<8x32xf32>
    %873 = vector.broadcast %870 : f32 to vector<8x32xf32>
    %874 = arith.mulf %873, %872 : vector<8x32xf32>
    %875 = arith.addf %869, %874 : vector<8x32xf32>
    %c116 = arith.constant 116 : index
    %876 = memref.load %arg3[%c116] : memref<192xf32, #tpu.memory_space<smem>>
    %c2_436 = arith.constant 2 : index
    %c0_437 = arith.constant 0 : index
    %c0_438 = arith.constant 0 : index
    %877 = vector.load %arg8[%c2_436, %c0_437, %c0_438] : memref<6x8x32xf32, #tpu.memory_space<vmem>>, vector<1x8x32xf32>
    %878 = vector.shape_cast %877 : vector<1x8x32xf32> to vector<8x32xf32>
    %879 = vector.broadcast %876 : f32 to vector<8x32xf32>
    %880 = arith.mulf %879, %878 : vector<8x32xf32>
    %881 = arith.addf %875, %880 : vector<8x32xf32>
    %c117 = arith.constant 117 : index
    %882 = memref.load %arg3[%c117] : memref<192xf32, #tpu.memory_space<smem>>
    %c3_439 = arith.constant 3 : index
    %c0_440 = arith.constant 0 : index
    %c0_441 = arith.constant 0 : index
    %883 = vector.load %arg8[%c3_439, %c0_440, %c0_441] : memref<6x8x32xf32, #tpu.memory_space<vmem>>, vector<1x8x32xf32>
    %884 = vector.shape_cast %883 : vector<1x8x32xf32> to vector<8x32xf32>
    %885 = vector.broadcast %882 : f32 to vector<8x32xf32>
    %886 = arith.mulf %885, %884 : vector<8x32xf32>
    %887 = arith.addf %881, %886 : vector<8x32xf32>
    %c118 = arith.constant 118 : index
    %888 = memref.load %arg3[%c118] : memref<192xf32, #tpu.memory_space<smem>>
    %c4_442 = arith.constant 4 : index
    %c0_443 = arith.constant 0 : index
    %c0_444 = arith.constant 0 : index
    %889 = vector.load %arg8[%c4_442, %c0_443, %c0_444] : memref<6x8x32xf32, #tpu.memory_space<vmem>>, vector<1x8x32xf32>
    %890 = vector.shape_cast %889 : vector<1x8x32xf32> to vector<8x32xf32>
    %891 = vector.broadcast %888 : f32 to vector<8x32xf32>
    %892 = arith.mulf %891, %890 : vector<8x32xf32>
    %893 = arith.addf %887, %892 : vector<8x32xf32>
    %c119 = arith.constant 119 : index
    %894 = memref.load %arg3[%c119] : memref<192xf32, #tpu.memory_space<smem>>
    %c5_445 = arith.constant 5 : index
    %c0_446 = arith.constant 0 : index
    %c0_447 = arith.constant 0 : index
    %895 = vector.load %arg8[%c5_445, %c0_446, %c0_447] : memref<6x8x32xf32, #tpu.memory_space<vmem>>, vector<1x8x32xf32>
    %896 = vector.shape_cast %895 : vector<1x8x32xf32> to vector<8x32xf32>
    %897 = vector.broadcast %894 : f32 to vector<8x32xf32>
    %898 = arith.mulf %897, %896 : vector<8x32xf32>
    %899 = arith.addf %893, %898 : vector<8x32xf32>
    %cst_448 = arith.constant 0.000000e+00 : f32
    %900 = vector.broadcast %cst_448 : f32 to vector<8x32xf32>
    %901 = arith.maximumf %899, %900 : vector<8x32xf32>
    %c19_449 = arith.constant 19 : index
    %902 = memref.load %arg5[%c19_449] : memref<32xf32, #tpu.memory_space<smem>>
    %903 = vector.broadcast %902 : f32 to vector<8x32xf32>
    %904 = arith.mulf %903, %901 : vector<8x32xf32>
    %905 = arith.addf %861, %904 : vector<8x32xf32>
    %c20_450 = arith.constant 20 : index
    %906 = memref.load %arg4[%c20_450] : memref<32xf32, #tpu.memory_space<smem>>
    %907 = vector.broadcast %906 : f32 to vector<8x32xf32>
    %c120 = arith.constant 120 : index
    %908 = memref.load %arg3[%c120] : memref<192xf32, #tpu.memory_space<smem>>
    %c0_451 = arith.constant 0 : index
    %c0_452 = arith.constant 0 : index
    %c0_453 = arith.constant 0 : index
    %909 = vector.load %arg8[%c0_451, %c0_452, %c0_453] : memref<6x8x32xf32, #tpu.memory_space<vmem>>, vector<1x8x32xf32>
    %910 = vector.shape_cast %909 : vector<1x8x32xf32> to vector<8x32xf32>
    %911 = vector.broadcast %908 : f32 to vector<8x32xf32>
    %912 = arith.mulf %911, %910 : vector<8x32xf32>
    %913 = arith.addf %907, %912 : vector<8x32xf32>
    %c121 = arith.constant 121 : index
    %914 = memref.load %arg3[%c121] : memref<192xf32, #tpu.memory_space<smem>>
    %c1_454 = arith.constant 1 : index
    %c0_455 = arith.constant 0 : index
    %c0_456 = arith.constant 0 : index
    %915 = vector.load %arg8[%c1_454, %c0_455, %c0_456] : memref<6x8x32xf32, #tpu.memory_space<vmem>>, vector<1x8x32xf32>
    %916 = vector.shape_cast %915 : vector<1x8x32xf32> to vector<8x32xf32>
    %917 = vector.broadcast %914 : f32 to vector<8x32xf32>
    %918 = arith.mulf %917, %916 : vector<8x32xf32>
    %919 = arith.addf %913, %918 : vector<8x32xf32>
    %c122 = arith.constant 122 : index
    %920 = memref.load %arg3[%c122] : memref<192xf32, #tpu.memory_space<smem>>
    %c2_457 = arith.constant 2 : index
    %c0_458 = arith.constant 0 : index
    %c0_459 = arith.constant 0 : index
    %921 = vector.load %arg8[%c2_457, %c0_458, %c0_459] : memref<6x8x32xf32, #tpu.memory_space<vmem>>, vector<1x8x32xf32>
    %922 = vector.shape_cast %921 : vector<1x8x32xf32> to vector<8x32xf32>
    %923 = vector.broadcast %920 : f32 to vector<8x32xf32>
    %924 = arith.mulf %923, %922 : vector<8x32xf32>
    %925 = arith.addf %919, %924 : vector<8x32xf32>
    %c123 = arith.constant 123 : index
    %926 = memref.load %arg3[%c123] : memref<192xf32, #tpu.memory_space<smem>>
    %c3_460 = arith.constant 3 : index
    %c0_461 = arith.constant 0 : index
    %c0_462 = arith.constant 0 : index
    %927 = vector.load %arg8[%c3_460, %c0_461, %c0_462] : memref<6x8x32xf32, #tpu.memory_space<vmem>>, vector<1x8x32xf32>
    %928 = vector.shape_cast %927 : vector<1x8x32xf32> to vector<8x32xf32>
    %929 = vector.broadcast %926 : f32 to vector<8x32xf32>
    %930 = arith.mulf %929, %928 : vector<8x32xf32>
    %931 = arith.addf %925, %930 : vector<8x32xf32>
    %c124 = arith.constant 124 : index
    %932 = memref.load %arg3[%c124] : memref<192xf32, #tpu.memory_space<smem>>
    %c4_463 = arith.constant 4 : index
    %c0_464 = arith.constant 0 : index
    %c0_465 = arith.constant 0 : index
    %933 = vector.load %arg8[%c4_463, %c0_464, %c0_465] : memref<6x8x32xf32, #tpu.memory_space<vmem>>, vector<1x8x32xf32>
    %934 = vector.shape_cast %933 : vector<1x8x32xf32> to vector<8x32xf32>
    %935 = vector.broadcast %932 : f32 to vector<8x32xf32>
    %936 = arith.mulf %935, %934 : vector<8x32xf32>
    %937 = arith.addf %931, %936 : vector<8x32xf32>
    %c125 = arith.constant 125 : index
    %938 = memref.load %arg3[%c125] : memref<192xf32, #tpu.memory_space<smem>>
    %c5_466 = arith.constant 5 : index
    %c0_467 = arith.constant 0 : index
    %c0_468 = arith.constant 0 : index
    %939 = vector.load %arg8[%c5_466, %c0_467, %c0_468] : memref<6x8x32xf32, #tpu.memory_space<vmem>>, vector<1x8x32xf32>
    %940 = vector.shape_cast %939 : vector<1x8x32xf32> to vector<8x32xf32>
    %941 = vector.broadcast %938 : f32 to vector<8x32xf32>
    %942 = arith.mulf %941, %940 : vector<8x32xf32>
    %943 = arith.addf %937, %942 : vector<8x32xf32>
    %cst_469 = arith.constant 0.000000e+00 : f32
    %944 = vector.broadcast %cst_469 : f32 to vector<8x32xf32>
    %945 = arith.maximumf %943, %944 : vector<8x32xf32>
    %c20_470 = arith.constant 20 : index
    %946 = memref.load %arg5[%c20_470] : memref<32xf32, #tpu.memory_space<smem>>
    %947 = vector.broadcast %946 : f32 to vector<8x32xf32>
    %948 = arith.mulf %947, %945 : vector<8x32xf32>
    %949 = arith.addf %905, %948 : vector<8x32xf32>
    %c21_471 = arith.constant 21 : index
    %950 = memref.load %arg4[%c21_471] : memref<32xf32, #tpu.memory_space<smem>>
    %951 = vector.broadcast %950 : f32 to vector<8x32xf32>
    %c126 = arith.constant 126 : index
    %952 = memref.load %arg3[%c126] : memref<192xf32, #tpu.memory_space<smem>>
    %c0_472 = arith.constant 0 : index
    %c0_473 = arith.constant 0 : index
    %c0_474 = arith.constant 0 : index
    %953 = vector.load %arg8[%c0_472, %c0_473, %c0_474] : memref<6x8x32xf32, #tpu.memory_space<vmem>>, vector<1x8x32xf32>
    %954 = vector.shape_cast %953 : vector<1x8x32xf32> to vector<8x32xf32>
    %955 = vector.broadcast %952 : f32 to vector<8x32xf32>
    %956 = arith.mulf %955, %954 : vector<8x32xf32>
    %957 = arith.addf %951, %956 : vector<8x32xf32>
    %c127 = arith.constant 127 : index
    %958 = memref.load %arg3[%c127] : memref<192xf32, #tpu.memory_space<smem>>
    %c1_475 = arith.constant 1 : index
    %c0_476 = arith.constant 0 : index
    %c0_477 = arith.constant 0 : index
    %959 = vector.load %arg8[%c1_475, %c0_476, %c0_477] : memref<6x8x32xf32, #tpu.memory_space<vmem>>, vector<1x8x32xf32>
    %960 = vector.shape_cast %959 : vector<1x8x32xf32> to vector<8x32xf32>
    %961 = vector.broadcast %958 : f32 to vector<8x32xf32>
    %962 = arith.mulf %961, %960 : vector<8x32xf32>
    %963 = arith.addf %957, %962 : vector<8x32xf32>
    %c128 = arith.constant 128 : index
    %964 = memref.load %arg3[%c128] : memref<192xf32, #tpu.memory_space<smem>>
    %c2_478 = arith.constant 2 : index
    %c0_479 = arith.constant 0 : index
    %c0_480 = arith.constant 0 : index
    %965 = vector.load %arg8[%c2_478, %c0_479, %c0_480] : memref<6x8x32xf32, #tpu.memory_space<vmem>>, vector<1x8x32xf32>
    %966 = vector.shape_cast %965 : vector<1x8x32xf32> to vector<8x32xf32>
    %967 = vector.broadcast %964 : f32 to vector<8x32xf32>
    %968 = arith.mulf %967, %966 : vector<8x32xf32>
    %969 = arith.addf %963, %968 : vector<8x32xf32>
    %c129 = arith.constant 129 : index
    %970 = memref.load %arg3[%c129] : memref<192xf32, #tpu.memory_space<smem>>
    %c3_481 = arith.constant 3 : index
    %c0_482 = arith.constant 0 : index
    %c0_483 = arith.constant 0 : index
    %971 = vector.load %arg8[%c3_481, %c0_482, %c0_483] : memref<6x8x32xf32, #tpu.memory_space<vmem>>, vector<1x8x32xf32>
    %972 = vector.shape_cast %971 : vector<1x8x32xf32> to vector<8x32xf32>
    %973 = vector.broadcast %970 : f32 to vector<8x32xf32>
    %974 = arith.mulf %973, %972 : vector<8x32xf32>
    %975 = arith.addf %969, %974 : vector<8x32xf32>
    %c130 = arith.constant 130 : index
    %976 = memref.load %arg3[%c130] : memref<192xf32, #tpu.memory_space<smem>>
    %c4_484 = arith.constant 4 : index
    %c0_485 = arith.constant 0 : index
    %c0_486 = arith.constant 0 : index
    %977 = vector.load %arg8[%c4_484, %c0_485, %c0_486] : memref<6x8x32xf32, #tpu.memory_space<vmem>>, vector<1x8x32xf32>
    %978 = vector.shape_cast %977 : vector<1x8x32xf32> to vector<8x32xf32>
    %979 = vector.broadcast %976 : f32 to vector<8x32xf32>
    %980 = arith.mulf %979, %978 : vector<8x32xf32>
    %981 = arith.addf %975, %980 : vector<8x32xf32>
    %c131 = arith.constant 131 : index
    %982 = memref.load %arg3[%c131] : memref<192xf32, #tpu.memory_space<smem>>
    %c5_487 = arith.constant 5 : index
    %c0_488 = arith.constant 0 : index
    %c0_489 = arith.constant 0 : index
    %983 = vector.load %arg8[%c5_487, %c0_488, %c0_489] : memref<6x8x32xf32, #tpu.memory_space<vmem>>, vector<1x8x32xf32>
    %984 = vector.shape_cast %983 : vector<1x8x32xf32> to vector<8x32xf32>
    %985 = vector.broadcast %982 : f32 to vector<8x32xf32>
    %986 = arith.mulf %985, %984 : vector<8x32xf32>
    %987 = arith.addf %981, %986 : vector<8x32xf32>
    %cst_490 = arith.constant 0.000000e+00 : f32
    %988 = vector.broadcast %cst_490 : f32 to vector<8x32xf32>
    %989 = arith.maximumf %987, %988 : vector<8x32xf32>
    %c21_491 = arith.constant 21 : index
    %990 = memref.load %arg5[%c21_491] : memref<32xf32, #tpu.memory_space<smem>>
    %991 = vector.broadcast %990 : f32 to vector<8x32xf32>
    %992 = arith.mulf %991, %989 : vector<8x32xf32>
    %993 = arith.addf %949, %992 : vector<8x32xf32>
    %c22_492 = arith.constant 22 : index
    %994 = memref.load %arg4[%c22_492] : memref<32xf32, #tpu.memory_space<smem>>
    %995 = vector.broadcast %994 : f32 to vector<8x32xf32>
    %c132 = arith.constant 132 : index
    %996 = memref.load %arg3[%c132] : memref<192xf32, #tpu.memory_space<smem>>
    %c0_493 = arith.constant 0 : index
    %c0_494 = arith.constant 0 : index
    %c0_495 = arith.constant 0 : index
    %997 = vector.load %arg8[%c0_493, %c0_494, %c0_495] : memref<6x8x32xf32, #tpu.memory_space<vmem>>, vector<1x8x32xf32>
    %998 = vector.shape_cast %997 : vector<1x8x32xf32> to vector<8x32xf32>
    %999 = vector.broadcast %996 : f32 to vector<8x32xf32>
    %1000 = arith.mulf %999, %998 : vector<8x32xf32>
    %1001 = arith.addf %995, %1000 : vector<8x32xf32>
    %c133 = arith.constant 133 : index
    %1002 = memref.load %arg3[%c133] : memref<192xf32, #tpu.memory_space<smem>>
    %c1_496 = arith.constant 1 : index
    %c0_497 = arith.constant 0 : index
    %c0_498 = arith.constant 0 : index
    %1003 = vector.load %arg8[%c1_496, %c0_497, %c0_498] : memref<6x8x32xf32, #tpu.memory_space<vmem>>, vector<1x8x32xf32>
    %1004 = vector.shape_cast %1003 : vector<1x8x32xf32> to vector<8x32xf32>
    %1005 = vector.broadcast %1002 : f32 to vector<8x32xf32>
    %1006 = arith.mulf %1005, %1004 : vector<8x32xf32>
    %1007 = arith.addf %1001, %1006 : vector<8x32xf32>
    %c134 = arith.constant 134 : index
    %1008 = memref.load %arg3[%c134] : memref<192xf32, #tpu.memory_space<smem>>
    %c2_499 = arith.constant 2 : index
    %c0_500 = arith.constant 0 : index
    %c0_501 = arith.constant 0 : index
    %1009 = vector.load %arg8[%c2_499, %c0_500, %c0_501] : memref<6x8x32xf32, #tpu.memory_space<vmem>>, vector<1x8x32xf32>
    %1010 = vector.shape_cast %1009 : vector<1x8x32xf32> to vector<8x32xf32>
    %1011 = vector.broadcast %1008 : f32 to vector<8x32xf32>
    %1012 = arith.mulf %1011, %1010 : vector<8x32xf32>
    %1013 = arith.addf %1007, %1012 : vector<8x32xf32>
    %c135 = arith.constant 135 : index
    %1014 = memref.load %arg3[%c135] : memref<192xf32, #tpu.memory_space<smem>>
    %c3_502 = arith.constant 3 : index
    %c0_503 = arith.constant 0 : index
    %c0_504 = arith.constant 0 : index
    %1015 = vector.load %arg8[%c3_502, %c0_503, %c0_504] : memref<6x8x32xf32, #tpu.memory_space<vmem>>, vector<1x8x32xf32>
    %1016 = vector.shape_cast %1015 : vector<1x8x32xf32> to vector<8x32xf32>
    %1017 = vector.broadcast %1014 : f32 to vector<8x32xf32>
    %1018 = arith.mulf %1017, %1016 : vector<8x32xf32>
    %1019 = arith.addf %1013, %1018 : vector<8x32xf32>
    %c136 = arith.constant 136 : index
    %1020 = memref.load %arg3[%c136] : memref<192xf32, #tpu.memory_space<smem>>
    %c4_505 = arith.constant 4 : index
    %c0_506 = arith.constant 0 : index
    %c0_507 = arith.constant 0 : index
    %1021 = vector.load %arg8[%c4_505, %c0_506, %c0_507] : memref<6x8x32xf32, #tpu.memory_space<vmem>>, vector<1x8x32xf32>
    %1022 = vector.shape_cast %1021 : vector<1x8x32xf32> to vector<8x32xf32>
    %1023 = vector.broadcast %1020 : f32 to vector<8x32xf32>
    %1024 = arith.mulf %1023, %1022 : vector<8x32xf32>
    %1025 = arith.addf %1019, %1024 : vector<8x32xf32>
    %c137 = arith.constant 137 : index
    %1026 = memref.load %arg3[%c137] : memref<192xf32, #tpu.memory_space<smem>>
    %c5_508 = arith.constant 5 : index
    %c0_509 = arith.constant 0 : index
    %c0_510 = arith.constant 0 : index
    %1027 = vector.load %arg8[%c5_508, %c0_509, %c0_510] : memref<6x8x32xf32, #tpu.memory_space<vmem>>, vector<1x8x32xf32>
    %1028 = vector.shape_cast %1027 : vector<1x8x32xf32> to vector<8x32xf32>
    %1029 = vector.broadcast %1026 : f32 to vector<8x32xf32>
    %1030 = arith.mulf %1029, %1028 : vector<8x32xf32>
    %1031 = arith.addf %1025, %1030 : vector<8x32xf32>
    %cst_511 = arith.constant 0.000000e+00 : f32
    %1032 = vector.broadcast %cst_511 : f32 to vector<8x32xf32>
    %1033 = arith.maximumf %1031, %1032 : vector<8x32xf32>
    %c22_512 = arith.constant 22 : index
    %1034 = memref.load %arg5[%c22_512] : memref<32xf32, #tpu.memory_space<smem>>
    %1035 = vector.broadcast %1034 : f32 to vector<8x32xf32>
    %1036 = arith.mulf %1035, %1033 : vector<8x32xf32>
    %1037 = arith.addf %993, %1036 : vector<8x32xf32>
    %c23_513 = arith.constant 23 : index
    %1038 = memref.load %arg4[%c23_513] : memref<32xf32, #tpu.memory_space<smem>>
    %1039 = vector.broadcast %1038 : f32 to vector<8x32xf32>
    %c138 = arith.constant 138 : index
    %1040 = memref.load %arg3[%c138] : memref<192xf32, #tpu.memory_space<smem>>
    %c0_514 = arith.constant 0 : index
    %c0_515 = arith.constant 0 : index
    %c0_516 = arith.constant 0 : index
    %1041 = vector.load %arg8[%c0_514, %c0_515, %c0_516] : memref<6x8x32xf32, #tpu.memory_space<vmem>>, vector<1x8x32xf32>
    %1042 = vector.shape_cast %1041 : vector<1x8x32xf32> to vector<8x32xf32>
    %1043 = vector.broadcast %1040 : f32 to vector<8x32xf32>
    %1044 = arith.mulf %1043, %1042 : vector<8x32xf32>
    %1045 = arith.addf %1039, %1044 : vector<8x32xf32>
    %c139 = arith.constant 139 : index
    %1046 = memref.load %arg3[%c139] : memref<192xf32, #tpu.memory_space<smem>>
    %c1_517 = arith.constant 1 : index
    %c0_518 = arith.constant 0 : index
    %c0_519 = arith.constant 0 : index
    %1047 = vector.load %arg8[%c1_517, %c0_518, %c0_519] : memref<6x8x32xf32, #tpu.memory_space<vmem>>, vector<1x8x32xf32>
    %1048 = vector.shape_cast %1047 : vector<1x8x32xf32> to vector<8x32xf32>
    %1049 = vector.broadcast %1046 : f32 to vector<8x32xf32>
    %1050 = arith.mulf %1049, %1048 : vector<8x32xf32>
    %1051 = arith.addf %1045, %1050 : vector<8x32xf32>
    %c140 = arith.constant 140 : index
    %1052 = memref.load %arg3[%c140] : memref<192xf32, #tpu.memory_space<smem>>
    %c2_520 = arith.constant 2 : index
    %c0_521 = arith.constant 0 : index
    %c0_522 = arith.constant 0 : index
    %1053 = vector.load %arg8[%c2_520, %c0_521, %c0_522] : memref<6x8x32xf32, #tpu.memory_space<vmem>>, vector<1x8x32xf32>
    %1054 = vector.shape_cast %1053 : vector<1x8x32xf32> to vector<8x32xf32>
    %1055 = vector.broadcast %1052 : f32 to vector<8x32xf32>
    %1056 = arith.mulf %1055, %1054 : vector<8x32xf32>
    %1057 = arith.addf %1051, %1056 : vector<8x32xf32>
    %c141 = arith.constant 141 : index
    %1058 = memref.load %arg3[%c141] : memref<192xf32, #tpu.memory_space<smem>>
    %c3_523 = arith.constant 3 : index
    %c0_524 = arith.constant 0 : index
    %c0_525 = arith.constant 0 : index
    %1059 = vector.load %arg8[%c3_523, %c0_524, %c0_525] : memref<6x8x32xf32, #tpu.memory_space<vmem>>, vector<1x8x32xf32>
    %1060 = vector.shape_cast %1059 : vector<1x8x32xf32> to vector<8x32xf32>
    %1061 = vector.broadcast %1058 : f32 to vector<8x32xf32>
    %1062 = arith.mulf %1061, %1060 : vector<8x32xf32>
    %1063 = arith.addf %1057, %1062 : vector<8x32xf32>
    %c142 = arith.constant 142 : index
    %1064 = memref.load %arg3[%c142] : memref<192xf32, #tpu.memory_space<smem>>
    %c4_526 = arith.constant 4 : index
    %c0_527 = arith.constant 0 : index
    %c0_528 = arith.constant 0 : index
    %1065 = vector.load %arg8[%c4_526, %c0_527, %c0_528] : memref<6x8x32xf32, #tpu.memory_space<vmem>>, vector<1x8x32xf32>
    %1066 = vector.shape_cast %1065 : vector<1x8x32xf32> to vector<8x32xf32>
    %1067 = vector.broadcast %1064 : f32 to vector<8x32xf32>
    %1068 = arith.mulf %1067, %1066 : vector<8x32xf32>
    %1069 = arith.addf %1063, %1068 : vector<8x32xf32>
    %c143 = arith.constant 143 : index
    %1070 = memref.load %arg3[%c143] : memref<192xf32, #tpu.memory_space<smem>>
    %c5_529 = arith.constant 5 : index
    %c0_530 = arith.constant 0 : index
    %c0_531 = arith.constant 0 : index
    %1071 = vector.load %arg8[%c5_529, %c0_530, %c0_531] : memref<6x8x32xf32, #tpu.memory_space<vmem>>, vector<1x8x32xf32>
    %1072 = vector.shape_cast %1071 : vector<1x8x32xf32> to vector<8x32xf32>
    %1073 = vector.broadcast %1070 : f32 to vector<8x32xf32>
    %1074 = arith.mulf %1073, %1072 : vector<8x32xf32>
    %1075 = arith.addf %1069, %1074 : vector<8x32xf32>
    %cst_532 = arith.constant 0.000000e+00 : f32
    %1076 = vector.broadcast %cst_532 : f32 to vector<8x32xf32>
    %1077 = arith.maximumf %1075, %1076 : vector<8x32xf32>
    %c23_533 = arith.constant 23 : index
    %1078 = memref.load %arg5[%c23_533] : memref<32xf32, #tpu.memory_space<smem>>
    %1079 = vector.broadcast %1078 : f32 to vector<8x32xf32>
    %1080 = arith.mulf %1079, %1077 : vector<8x32xf32>
    %1081 = arith.addf %1037, %1080 : vector<8x32xf32>
    %c24_534 = arith.constant 24 : index
    %1082 = memref.load %arg4[%c24_534] : memref<32xf32, #tpu.memory_space<smem>>
    %1083 = vector.broadcast %1082 : f32 to vector<8x32xf32>
    %c144 = arith.constant 144 : index
    %1084 = memref.load %arg3[%c144] : memref<192xf32, #tpu.memory_space<smem>>
    %c0_535 = arith.constant 0 : index
    %c0_536 = arith.constant 0 : index
    %c0_537 = arith.constant 0 : index
    %1085 = vector.load %arg8[%c0_535, %c0_536, %c0_537] : memref<6x8x32xf32, #tpu.memory_space<vmem>>, vector<1x8x32xf32>
    %1086 = vector.shape_cast %1085 : vector<1x8x32xf32> to vector<8x32xf32>
    %1087 = vector.broadcast %1084 : f32 to vector<8x32xf32>
    %1088 = arith.mulf %1087, %1086 : vector<8x32xf32>
    %1089 = arith.addf %1083, %1088 : vector<8x32xf32>
    %c145 = arith.constant 145 : index
    %1090 = memref.load %arg3[%c145] : memref<192xf32, #tpu.memory_space<smem>>
    %c1_538 = arith.constant 1 : index
    %c0_539 = arith.constant 0 : index
    %c0_540 = arith.constant 0 : index
    %1091 = vector.load %arg8[%c1_538, %c0_539, %c0_540] : memref<6x8x32xf32, #tpu.memory_space<vmem>>, vector<1x8x32xf32>
    %1092 = vector.shape_cast %1091 : vector<1x8x32xf32> to vector<8x32xf32>
    %1093 = vector.broadcast %1090 : f32 to vector<8x32xf32>
    %1094 = arith.mulf %1093, %1092 : vector<8x32xf32>
    %1095 = arith.addf %1089, %1094 : vector<8x32xf32>
    %c146 = arith.constant 146 : index
    %1096 = memref.load %arg3[%c146] : memref<192xf32, #tpu.memory_space<smem>>
    %c2_541 = arith.constant 2 : index
    %c0_542 = arith.constant 0 : index
    %c0_543 = arith.constant 0 : index
    %1097 = vector.load %arg8[%c2_541, %c0_542, %c0_543] : memref<6x8x32xf32, #tpu.memory_space<vmem>>, vector<1x8x32xf32>
    %1098 = vector.shape_cast %1097 : vector<1x8x32xf32> to vector<8x32xf32>
    %1099 = vector.broadcast %1096 : f32 to vector<8x32xf32>
    %1100 = arith.mulf %1099, %1098 : vector<8x32xf32>
    %1101 = arith.addf %1095, %1100 : vector<8x32xf32>
    %c147 = arith.constant 147 : index
    %1102 = memref.load %arg3[%c147] : memref<192xf32, #tpu.memory_space<smem>>
    %c3_544 = arith.constant 3 : index
    %c0_545 = arith.constant 0 : index
    %c0_546 = arith.constant 0 : index
    %1103 = vector.load %arg8[%c3_544, %c0_545, %c0_546] : memref<6x8x32xf32, #tpu.memory_space<vmem>>, vector<1x8x32xf32>
    %1104 = vector.shape_cast %1103 : vector<1x8x32xf32> to vector<8x32xf32>
    %1105 = vector.broadcast %1102 : f32 to vector<8x32xf32>
    %1106 = arith.mulf %1105, %1104 : vector<8x32xf32>
    %1107 = arith.addf %1101, %1106 : vector<8x32xf32>
    %c148 = arith.constant 148 : index
    %1108 = memref.load %arg3[%c148] : memref<192xf32, #tpu.memory_space<smem>>
    %c4_547 = arith.constant 4 : index
    %c0_548 = arith.constant 0 : index
    %c0_549 = arith.constant 0 : index
    %1109 = vector.load %arg8[%c4_547, %c0_548, %c0_549] : memref<6x8x32xf32, #tpu.memory_space<vmem>>, vector<1x8x32xf32>
    %1110 = vector.shape_cast %1109 : vector<1x8x32xf32> to vector<8x32xf32>
    %1111 = vector.broadcast %1108 : f32 to vector<8x32xf32>
    %1112 = arith.mulf %1111, %1110 : vector<8x32xf32>
    %1113 = arith.addf %1107, %1112 : vector<8x32xf32>
    %c149 = arith.constant 149 : index
    %1114 = memref.load %arg3[%c149] : memref<192xf32, #tpu.memory_space<smem>>
    %c5_550 = arith.constant 5 : index
    %c0_551 = arith.constant 0 : index
    %c0_552 = arith.constant 0 : index
    %1115 = vector.load %arg8[%c5_550, %c0_551, %c0_552] : memref<6x8x32xf32, #tpu.memory_space<vmem>>, vector<1x8x32xf32>
    %1116 = vector.shape_cast %1115 : vector<1x8x32xf32> to vector<8x32xf32>
    %1117 = vector.broadcast %1114 : f32 to vector<8x32xf32>
    %1118 = arith.mulf %1117, %1116 : vector<8x32xf32>
    %1119 = arith.addf %1113, %1118 : vector<8x32xf32>
    %cst_553 = arith.constant 0.000000e+00 : f32
    %1120 = vector.broadcast %cst_553 : f32 to vector<8x32xf32>
    %1121 = arith.maximumf %1119, %1120 : vector<8x32xf32>
    %c24_554 = arith.constant 24 : index
    %1122 = memref.load %arg5[%c24_554] : memref<32xf32, #tpu.memory_space<smem>>
    %1123 = vector.broadcast %1122 : f32 to vector<8x32xf32>
    %1124 = arith.mulf %1123, %1121 : vector<8x32xf32>
    %1125 = arith.addf %1081, %1124 : vector<8x32xf32>
    %c25_555 = arith.constant 25 : index
    %1126 = memref.load %arg4[%c25_555] : memref<32xf32, #tpu.memory_space<smem>>
    %1127 = vector.broadcast %1126 : f32 to vector<8x32xf32>
    %c150 = arith.constant 150 : index
    %1128 = memref.load %arg3[%c150] : memref<192xf32, #tpu.memory_space<smem>>
    %c0_556 = arith.constant 0 : index
    %c0_557 = arith.constant 0 : index
    %c0_558 = arith.constant 0 : index
    %1129 = vector.load %arg8[%c0_556, %c0_557, %c0_558] : memref<6x8x32xf32, #tpu.memory_space<vmem>>, vector<1x8x32xf32>
    %1130 = vector.shape_cast %1129 : vector<1x8x32xf32> to vector<8x32xf32>
    %1131 = vector.broadcast %1128 : f32 to vector<8x32xf32>
    %1132 = arith.mulf %1131, %1130 : vector<8x32xf32>
    %1133 = arith.addf %1127, %1132 : vector<8x32xf32>
    %c151 = arith.constant 151 : index
    %1134 = memref.load %arg3[%c151] : memref<192xf32, #tpu.memory_space<smem>>
    %c1_559 = arith.constant 1 : index
    %c0_560 = arith.constant 0 : index
    %c0_561 = arith.constant 0 : index
    %1135 = vector.load %arg8[%c1_559, %c0_560, %c0_561] : memref<6x8x32xf32, #tpu.memory_space<vmem>>, vector<1x8x32xf32>
    %1136 = vector.shape_cast %1135 : vector<1x8x32xf32> to vector<8x32xf32>
    %1137 = vector.broadcast %1134 : f32 to vector<8x32xf32>
    %1138 = arith.mulf %1137, %1136 : vector<8x32xf32>
    %1139 = arith.addf %1133, %1138 : vector<8x32xf32>
    %c152 = arith.constant 152 : index
    %1140 = memref.load %arg3[%c152] : memref<192xf32, #tpu.memory_space<smem>>
    %c2_562 = arith.constant 2 : index
    %c0_563 = arith.constant 0 : index
    %c0_564 = arith.constant 0 : index
    %1141 = vector.load %arg8[%c2_562, %c0_563, %c0_564] : memref<6x8x32xf32, #tpu.memory_space<vmem>>, vector<1x8x32xf32>
    %1142 = vector.shape_cast %1141 : vector<1x8x32xf32> to vector<8x32xf32>
    %1143 = vector.broadcast %1140 : f32 to vector<8x32xf32>
    %1144 = arith.mulf %1143, %1142 : vector<8x32xf32>
    %1145 = arith.addf %1139, %1144 : vector<8x32xf32>
    %c153 = arith.constant 153 : index
    %1146 = memref.load %arg3[%c153] : memref<192xf32, #tpu.memory_space<smem>>
    %c3_565 = arith.constant 3 : index
    %c0_566 = arith.constant 0 : index
    %c0_567 = arith.constant 0 : index
    %1147 = vector.load %arg8[%c3_565, %c0_566, %c0_567] : memref<6x8x32xf32, #tpu.memory_space<vmem>>, vector<1x8x32xf32>
    %1148 = vector.shape_cast %1147 : vector<1x8x32xf32> to vector<8x32xf32>
    %1149 = vector.broadcast %1146 : f32 to vector<8x32xf32>
    %1150 = arith.mulf %1149, %1148 : vector<8x32xf32>
    %1151 = arith.addf %1145, %1150 : vector<8x32xf32>
    %c154 = arith.constant 154 : index
    %1152 = memref.load %arg3[%c154] : memref<192xf32, #tpu.memory_space<smem>>
    %c4_568 = arith.constant 4 : index
    %c0_569 = arith.constant 0 : index
    %c0_570 = arith.constant 0 : index
    %1153 = vector.load %arg8[%c4_568, %c0_569, %c0_570] : memref<6x8x32xf32, #tpu.memory_space<vmem>>, vector<1x8x32xf32>
    %1154 = vector.shape_cast %1153 : vector<1x8x32xf32> to vector<8x32xf32>
    %1155 = vector.broadcast %1152 : f32 to vector<8x32xf32>
    %1156 = arith.mulf %1155, %1154 : vector<8x32xf32>
    %1157 = arith.addf %1151, %1156 : vector<8x32xf32>
    %c155 = arith.constant 155 : index
    %1158 = memref.load %arg3[%c155] : memref<192xf32, #tpu.memory_space<smem>>
    %c5_571 = arith.constant 5 : index
    %c0_572 = arith.constant 0 : index
    %c0_573 = arith.constant 0 : index
    %1159 = vector.load %arg8[%c5_571, %c0_572, %c0_573] : memref<6x8x32xf32, #tpu.memory_space<vmem>>, vector<1x8x32xf32>
    %1160 = vector.shape_cast %1159 : vector<1x8x32xf32> to vector<8x32xf32>
    %1161 = vector.broadcast %1158 : f32 to vector<8x32xf32>
    %1162 = arith.mulf %1161, %1160 : vector<8x32xf32>
    %1163 = arith.addf %1157, %1162 : vector<8x32xf32>
    %cst_574 = arith.constant 0.000000e+00 : f32
    %1164 = vector.broadcast %cst_574 : f32 to vector<8x32xf32>
    %1165 = arith.maximumf %1163, %1164 : vector<8x32xf32>
    %c25_575 = arith.constant 25 : index
    %1166 = memref.load %arg5[%c25_575] : memref<32xf32, #tpu.memory_space<smem>>
    %1167 = vector.broadcast %1166 : f32 to vector<8x32xf32>
    %1168 = arith.mulf %1167, %1165 : vector<8x32xf32>
    %1169 = arith.addf %1125, %1168 : vector<8x32xf32>
    %c26_576 = arith.constant 26 : index
    %1170 = memref.load %arg4[%c26_576] : memref<32xf32, #tpu.memory_space<smem>>
    %1171 = vector.broadcast %1170 : f32 to vector<8x32xf32>
    %c156 = arith.constant 156 : index
    %1172 = memref.load %arg3[%c156] : memref<192xf32, #tpu.memory_space<smem>>
    %c0_577 = arith.constant 0 : index
    %c0_578 = arith.constant 0 : index
    %c0_579 = arith.constant 0 : index
    %1173 = vector.load %arg8[%c0_577, %c0_578, %c0_579] : memref<6x8x32xf32, #tpu.memory_space<vmem>>, vector<1x8x32xf32>
    %1174 = vector.shape_cast %1173 : vector<1x8x32xf32> to vector<8x32xf32>
    %1175 = vector.broadcast %1172 : f32 to vector<8x32xf32>
    %1176 = arith.mulf %1175, %1174 : vector<8x32xf32>
    %1177 = arith.addf %1171, %1176 : vector<8x32xf32>
    %c157 = arith.constant 157 : index
    %1178 = memref.load %arg3[%c157] : memref<192xf32, #tpu.memory_space<smem>>
    %c1_580 = arith.constant 1 : index
    %c0_581 = arith.constant 0 : index
    %c0_582 = arith.constant 0 : index
    %1179 = vector.load %arg8[%c1_580, %c0_581, %c0_582] : memref<6x8x32xf32, #tpu.memory_space<vmem>>, vector<1x8x32xf32>
    %1180 = vector.shape_cast %1179 : vector<1x8x32xf32> to vector<8x32xf32>
    %1181 = vector.broadcast %1178 : f32 to vector<8x32xf32>
    %1182 = arith.mulf %1181, %1180 : vector<8x32xf32>
    %1183 = arith.addf %1177, %1182 : vector<8x32xf32>
    %c158 = arith.constant 158 : index
    %1184 = memref.load %arg3[%c158] : memref<192xf32, #tpu.memory_space<smem>>
    %c2_583 = arith.constant 2 : index
    %c0_584 = arith.constant 0 : index
    %c0_585 = arith.constant 0 : index
    %1185 = vector.load %arg8[%c2_583, %c0_584, %c0_585] : memref<6x8x32xf32, #tpu.memory_space<vmem>>, vector<1x8x32xf32>
    %1186 = vector.shape_cast %1185 : vector<1x8x32xf32> to vector<8x32xf32>
    %1187 = vector.broadcast %1184 : f32 to vector<8x32xf32>
    %1188 = arith.mulf %1187, %1186 : vector<8x32xf32>
    %1189 = arith.addf %1183, %1188 : vector<8x32xf32>
    %c159 = arith.constant 159 : index
    %1190 = memref.load %arg3[%c159] : memref<192xf32, #tpu.memory_space<smem>>
    %c3_586 = arith.constant 3 : index
    %c0_587 = arith.constant 0 : index
    %c0_588 = arith.constant 0 : index
    %1191 = vector.load %arg8[%c3_586, %c0_587, %c0_588] : memref<6x8x32xf32, #tpu.memory_space<vmem>>, vector<1x8x32xf32>
    %1192 = vector.shape_cast %1191 : vector<1x8x32xf32> to vector<8x32xf32>
    %1193 = vector.broadcast %1190 : f32 to vector<8x32xf32>
    %1194 = arith.mulf %1193, %1192 : vector<8x32xf32>
    %1195 = arith.addf %1189, %1194 : vector<8x32xf32>
    %c160 = arith.constant 160 : index
    %1196 = memref.load %arg3[%c160] : memref<192xf32, #tpu.memory_space<smem>>
    %c4_589 = arith.constant 4 : index
    %c0_590 = arith.constant 0 : index
    %c0_591 = arith.constant 0 : index
    %1197 = vector.load %arg8[%c4_589, %c0_590, %c0_591] : memref<6x8x32xf32, #tpu.memory_space<vmem>>, vector<1x8x32xf32>
    %1198 = vector.shape_cast %1197 : vector<1x8x32xf32> to vector<8x32xf32>
    %1199 = vector.broadcast %1196 : f32 to vector<8x32xf32>
    %1200 = arith.mulf %1199, %1198 : vector<8x32xf32>
    %1201 = arith.addf %1195, %1200 : vector<8x32xf32>
    %c161 = arith.constant 161 : index
    %1202 = memref.load %arg3[%c161] : memref<192xf32, #tpu.memory_space<smem>>
    %c5_592 = arith.constant 5 : index
    %c0_593 = arith.constant 0 : index
    %c0_594 = arith.constant 0 : index
    %1203 = vector.load %arg8[%c5_592, %c0_593, %c0_594] : memref<6x8x32xf32, #tpu.memory_space<vmem>>, vector<1x8x32xf32>
    %1204 = vector.shape_cast %1203 : vector<1x8x32xf32> to vector<8x32xf32>
    %1205 = vector.broadcast %1202 : f32 to vector<8x32xf32>
    %1206 = arith.mulf %1205, %1204 : vector<8x32xf32>
    %1207 = arith.addf %1201, %1206 : vector<8x32xf32>
    %cst_595 = arith.constant 0.000000e+00 : f32
    %1208 = vector.broadcast %cst_595 : f32 to vector<8x32xf32>
    %1209 = arith.maximumf %1207, %1208 : vector<8x32xf32>
    %c26_596 = arith.constant 26 : index
    %1210 = memref.load %arg5[%c26_596] : memref<32xf32, #tpu.memory_space<smem>>
    %1211 = vector.broadcast %1210 : f32 to vector<8x32xf32>
    %1212 = arith.mulf %1211, %1209 : vector<8x32xf32>
    %1213 = arith.addf %1169, %1212 : vector<8x32xf32>
    %c27_597 = arith.constant 27 : index
    %1214 = memref.load %arg4[%c27_597] : memref<32xf32, #tpu.memory_space<smem>>
    %1215 = vector.broadcast %1214 : f32 to vector<8x32xf32>
    %c162 = arith.constant 162 : index
    %1216 = memref.load %arg3[%c162] : memref<192xf32, #tpu.memory_space<smem>>
    %c0_598 = arith.constant 0 : index
    %c0_599 = arith.constant 0 : index
    %c0_600 = arith.constant 0 : index
    %1217 = vector.load %arg8[%c0_598, %c0_599, %c0_600] : memref<6x8x32xf32, #tpu.memory_space<vmem>>, vector<1x8x32xf32>
    %1218 = vector.shape_cast %1217 : vector<1x8x32xf32> to vector<8x32xf32>
    %1219 = vector.broadcast %1216 : f32 to vector<8x32xf32>
    %1220 = arith.mulf %1219, %1218 : vector<8x32xf32>
    %1221 = arith.addf %1215, %1220 : vector<8x32xf32>
    %c163 = arith.constant 163 : index
    %1222 = memref.load %arg3[%c163] : memref<192xf32, #tpu.memory_space<smem>>
    %c1_601 = arith.constant 1 : index
    %c0_602 = arith.constant 0 : index
    %c0_603 = arith.constant 0 : index
    %1223 = vector.load %arg8[%c1_601, %c0_602, %c0_603] : memref<6x8x32xf32, #tpu.memory_space<vmem>>, vector<1x8x32xf32>
    %1224 = vector.shape_cast %1223 : vector<1x8x32xf32> to vector<8x32xf32>
    %1225 = vector.broadcast %1222 : f32 to vector<8x32xf32>
    %1226 = arith.mulf %1225, %1224 : vector<8x32xf32>
    %1227 = arith.addf %1221, %1226 : vector<8x32xf32>
    %c164 = arith.constant 164 : index
    %1228 = memref.load %arg3[%c164] : memref<192xf32, #tpu.memory_space<smem>>
    %c2_604 = arith.constant 2 : index
    %c0_605 = arith.constant 0 : index
    %c0_606 = arith.constant 0 : index
    %1229 = vector.load %arg8[%c2_604, %c0_605, %c0_606] : memref<6x8x32xf32, #tpu.memory_space<vmem>>, vector<1x8x32xf32>
    %1230 = vector.shape_cast %1229 : vector<1x8x32xf32> to vector<8x32xf32>
    %1231 = vector.broadcast %1228 : f32 to vector<8x32xf32>
    %1232 = arith.mulf %1231, %1230 : vector<8x32xf32>
    %1233 = arith.addf %1227, %1232 : vector<8x32xf32>
    %c165 = arith.constant 165 : index
    %1234 = memref.load %arg3[%c165] : memref<192xf32, #tpu.memory_space<smem>>
    %c3_607 = arith.constant 3 : index
    %c0_608 = arith.constant 0 : index
    %c0_609 = arith.constant 0 : index
    %1235 = vector.load %arg8[%c3_607, %c0_608, %c0_609] : memref<6x8x32xf32, #tpu.memory_space<vmem>>, vector<1x8x32xf32>
    %1236 = vector.shape_cast %1235 : vector<1x8x32xf32> to vector<8x32xf32>
    %1237 = vector.broadcast %1234 : f32 to vector<8x32xf32>
    %1238 = arith.mulf %1237, %1236 : vector<8x32xf32>
    %1239 = arith.addf %1233, %1238 : vector<8x32xf32>
    %c166 = arith.constant 166 : index
    %1240 = memref.load %arg3[%c166] : memref<192xf32, #tpu.memory_space<smem>>
    %c4_610 = arith.constant 4 : index
    %c0_611 = arith.constant 0 : index
    %c0_612 = arith.constant 0 : index
    %1241 = vector.load %arg8[%c4_610, %c0_611, %c0_612] : memref<6x8x32xf32, #tpu.memory_space<vmem>>, vector<1x8x32xf32>
    %1242 = vector.shape_cast %1241 : vector<1x8x32xf32> to vector<8x32xf32>
    %1243 = vector.broadcast %1240 : f32 to vector<8x32xf32>
    %1244 = arith.mulf %1243, %1242 : vector<8x32xf32>
    %1245 = arith.addf %1239, %1244 : vector<8x32xf32>
    %c167 = arith.constant 167 : index
    %1246 = memref.load %arg3[%c167] : memref<192xf32, #tpu.memory_space<smem>>
    %c5_613 = arith.constant 5 : index
    %c0_614 = arith.constant 0 : index
    %c0_615 = arith.constant 0 : index
    %1247 = vector.load %arg8[%c5_613, %c0_614, %c0_615] : memref<6x8x32xf32, #tpu.memory_space<vmem>>, vector<1x8x32xf32>
    %1248 = vector.shape_cast %1247 : vector<1x8x32xf32> to vector<8x32xf32>
    %1249 = vector.broadcast %1246 : f32 to vector<8x32xf32>
    %1250 = arith.mulf %1249, %1248 : vector<8x32xf32>
    %1251 = arith.addf %1245, %1250 : vector<8x32xf32>
    %cst_616 = arith.constant 0.000000e+00 : f32
    %1252 = vector.broadcast %cst_616 : f32 to vector<8x32xf32>
    %1253 = arith.maximumf %1251, %1252 : vector<8x32xf32>
    %c27_617 = arith.constant 27 : index
    %1254 = memref.load %arg5[%c27_617] : memref<32xf32, #tpu.memory_space<smem>>
    %1255 = vector.broadcast %1254 : f32 to vector<8x32xf32>
    %1256 = arith.mulf %1255, %1253 : vector<8x32xf32>
    %1257 = arith.addf %1213, %1256 : vector<8x32xf32>
    %c28_618 = arith.constant 28 : index
    %1258 = memref.load %arg4[%c28_618] : memref<32xf32, #tpu.memory_space<smem>>
    %1259 = vector.broadcast %1258 : f32 to vector<8x32xf32>
    %c168 = arith.constant 168 : index
    %1260 = memref.load %arg3[%c168] : memref<192xf32, #tpu.memory_space<smem>>
    %c0_619 = arith.constant 0 : index
    %c0_620 = arith.constant 0 : index
    %c0_621 = arith.constant 0 : index
    %1261 = vector.load %arg8[%c0_619, %c0_620, %c0_621] : memref<6x8x32xf32, #tpu.memory_space<vmem>>, vector<1x8x32xf32>
    %1262 = vector.shape_cast %1261 : vector<1x8x32xf32> to vector<8x32xf32>
    %1263 = vector.broadcast %1260 : f32 to vector<8x32xf32>
    %1264 = arith.mulf %1263, %1262 : vector<8x32xf32>
    %1265 = arith.addf %1259, %1264 : vector<8x32xf32>
    %c169 = arith.constant 169 : index
    %1266 = memref.load %arg3[%c169] : memref<192xf32, #tpu.memory_space<smem>>
    %c1_622 = arith.constant 1 : index
    %c0_623 = arith.constant 0 : index
    %c0_624 = arith.constant 0 : index
    %1267 = vector.load %arg8[%c1_622, %c0_623, %c0_624] : memref<6x8x32xf32, #tpu.memory_space<vmem>>, vector<1x8x32xf32>
    %1268 = vector.shape_cast %1267 : vector<1x8x32xf32> to vector<8x32xf32>
    %1269 = vector.broadcast %1266 : f32 to vector<8x32xf32>
    %1270 = arith.mulf %1269, %1268 : vector<8x32xf32>
    %1271 = arith.addf %1265, %1270 : vector<8x32xf32>
    %c170 = arith.constant 170 : index
    %1272 = memref.load %arg3[%c170] : memref<192xf32, #tpu.memory_space<smem>>
    %c2_625 = arith.constant 2 : index
    %c0_626 = arith.constant 0 : index
    %c0_627 = arith.constant 0 : index
    %1273 = vector.load %arg8[%c2_625, %c0_626, %c0_627] : memref<6x8x32xf32, #tpu.memory_space<vmem>>, vector<1x8x32xf32>
    %1274 = vector.shape_cast %1273 : vector<1x8x32xf32> to vector<8x32xf32>
    %1275 = vector.broadcast %1272 : f32 to vector<8x32xf32>
    %1276 = arith.mulf %1275, %1274 : vector<8x32xf32>
    %1277 = arith.addf %1271, %1276 : vector<8x32xf32>
    %c171 = arith.constant 171 : index
    %1278 = memref.load %arg3[%c171] : memref<192xf32, #tpu.memory_space<smem>>
    %c3_628 = arith.constant 3 : index
    %c0_629 = arith.constant 0 : index
    %c0_630 = arith.constant 0 : index
    %1279 = vector.load %arg8[%c3_628, %c0_629, %c0_630] : memref<6x8x32xf32, #tpu.memory_space<vmem>>, vector<1x8x32xf32>
    %1280 = vector.shape_cast %1279 : vector<1x8x32xf32> to vector<8x32xf32>
    %1281 = vector.broadcast %1278 : f32 to vector<8x32xf32>
    %1282 = arith.mulf %1281, %1280 : vector<8x32xf32>
    %1283 = arith.addf %1277, %1282 : vector<8x32xf32>
    %c172 = arith.constant 172 : index
    %1284 = memref.load %arg3[%c172] : memref<192xf32, #tpu.memory_space<smem>>
    %c4_631 = arith.constant 4 : index
    %c0_632 = arith.constant 0 : index
    %c0_633 = arith.constant 0 : index
    %1285 = vector.load %arg8[%c4_631, %c0_632, %c0_633] : memref<6x8x32xf32, #tpu.memory_space<vmem>>, vector<1x8x32xf32>
    %1286 = vector.shape_cast %1285 : vector<1x8x32xf32> to vector<8x32xf32>
    %1287 = vector.broadcast %1284 : f32 to vector<8x32xf32>
    %1288 = arith.mulf %1287, %1286 : vector<8x32xf32>
    %1289 = arith.addf %1283, %1288 : vector<8x32xf32>
    %c173 = arith.constant 173 : index
    %1290 = memref.load %arg3[%c173] : memref<192xf32, #tpu.memory_space<smem>>
    %c5_634 = arith.constant 5 : index
    %c0_635 = arith.constant 0 : index
    %c0_636 = arith.constant 0 : index
    %1291 = vector.load %arg8[%c5_634, %c0_635, %c0_636] : memref<6x8x32xf32, #tpu.memory_space<vmem>>, vector<1x8x32xf32>
    %1292 = vector.shape_cast %1291 : vector<1x8x32xf32> to vector<8x32xf32>
    %1293 = vector.broadcast %1290 : f32 to vector<8x32xf32>
    %1294 = arith.mulf %1293, %1292 : vector<8x32xf32>
    %1295 = arith.addf %1289, %1294 : vector<8x32xf32>
    %cst_637 = arith.constant 0.000000e+00 : f32
    %1296 = vector.broadcast %cst_637 : f32 to vector<8x32xf32>
    %1297 = arith.maximumf %1295, %1296 : vector<8x32xf32>
    %c28_638 = arith.constant 28 : index
    %1298 = memref.load %arg5[%c28_638] : memref<32xf32, #tpu.memory_space<smem>>
    %1299 = vector.broadcast %1298 : f32 to vector<8x32xf32>
    %1300 = arith.mulf %1299, %1297 : vector<8x32xf32>
    %1301 = arith.addf %1257, %1300 : vector<8x32xf32>
    %c29_639 = arith.constant 29 : index
    %1302 = memref.load %arg4[%c29_639] : memref<32xf32, #tpu.memory_space<smem>>
    %1303 = vector.broadcast %1302 : f32 to vector<8x32xf32>
    %c174 = arith.constant 174 : index
    %1304 = memref.load %arg3[%c174] : memref<192xf32, #tpu.memory_space<smem>>
    %c0_640 = arith.constant 0 : index
    %c0_641 = arith.constant 0 : index
    %c0_642 = arith.constant 0 : index
    %1305 = vector.load %arg8[%c0_640, %c0_641, %c0_642] : memref<6x8x32xf32, #tpu.memory_space<vmem>>, vector<1x8x32xf32>
    %1306 = vector.shape_cast %1305 : vector<1x8x32xf32> to vector<8x32xf32>
    %1307 = vector.broadcast %1304 : f32 to vector<8x32xf32>
    %1308 = arith.mulf %1307, %1306 : vector<8x32xf32>
    %1309 = arith.addf %1303, %1308 : vector<8x32xf32>
    %c175 = arith.constant 175 : index
    %1310 = memref.load %arg3[%c175] : memref<192xf32, #tpu.memory_space<smem>>
    %c1_643 = arith.constant 1 : index
    %c0_644 = arith.constant 0 : index
    %c0_645 = arith.constant 0 : index
    %1311 = vector.load %arg8[%c1_643, %c0_644, %c0_645] : memref<6x8x32xf32, #tpu.memory_space<vmem>>, vector<1x8x32xf32>
    %1312 = vector.shape_cast %1311 : vector<1x8x32xf32> to vector<8x32xf32>
    %1313 = vector.broadcast %1310 : f32 to vector<8x32xf32>
    %1314 = arith.mulf %1313, %1312 : vector<8x32xf32>
    %1315 = arith.addf %1309, %1314 : vector<8x32xf32>
    %c176 = arith.constant 176 : index
    %1316 = memref.load %arg3[%c176] : memref<192xf32, #tpu.memory_space<smem>>
    %c2_646 = arith.constant 2 : index
    %c0_647 = arith.constant 0 : index
    %c0_648 = arith.constant 0 : index
    %1317 = vector.load %arg8[%c2_646, %c0_647, %c0_648] : memref<6x8x32xf32, #tpu.memory_space<vmem>>, vector<1x8x32xf32>
    %1318 = vector.shape_cast %1317 : vector<1x8x32xf32> to vector<8x32xf32>
    %1319 = vector.broadcast %1316 : f32 to vector<8x32xf32>
    %1320 = arith.mulf %1319, %1318 : vector<8x32xf32>
    %1321 = arith.addf %1315, %1320 : vector<8x32xf32>
    %c177 = arith.constant 177 : index
    %1322 = memref.load %arg3[%c177] : memref<192xf32, #tpu.memory_space<smem>>
    %c3_649 = arith.constant 3 : index
    %c0_650 = arith.constant 0 : index
    %c0_651 = arith.constant 0 : index
    %1323 = vector.load %arg8[%c3_649, %c0_650, %c0_651] : memref<6x8x32xf32, #tpu.memory_space<vmem>>, vector<1x8x32xf32>
    %1324 = vector.shape_cast %1323 : vector<1x8x32xf32> to vector<8x32xf32>
    %1325 = vector.broadcast %1322 : f32 to vector<8x32xf32>
    %1326 = arith.mulf %1325, %1324 : vector<8x32xf32>
    %1327 = arith.addf %1321, %1326 : vector<8x32xf32>
    %c178 = arith.constant 178 : index
    %1328 = memref.load %arg3[%c178] : memref<192xf32, #tpu.memory_space<smem>>
    %c4_652 = arith.constant 4 : index
    %c0_653 = arith.constant 0 : index
    %c0_654 = arith.constant 0 : index
    %1329 = vector.load %arg8[%c4_652, %c0_653, %c0_654] : memref<6x8x32xf32, #tpu.memory_space<vmem>>, vector<1x8x32xf32>
    %1330 = vector.shape_cast %1329 : vector<1x8x32xf32> to vector<8x32xf32>
    %1331 = vector.broadcast %1328 : f32 to vector<8x32xf32>
    %1332 = arith.mulf %1331, %1330 : vector<8x32xf32>
    %1333 = arith.addf %1327, %1332 : vector<8x32xf32>
    %c179 = arith.constant 179 : index
    %1334 = memref.load %arg3[%c179] : memref<192xf32, #tpu.memory_space<smem>>
    %c5_655 = arith.constant 5 : index
    %c0_656 = arith.constant 0 : index
    %c0_657 = arith.constant 0 : index
    %1335 = vector.load %arg8[%c5_655, %c0_656, %c0_657] : memref<6x8x32xf32, #tpu.memory_space<vmem>>, vector<1x8x32xf32>
    %1336 = vector.shape_cast %1335 : vector<1x8x32xf32> to vector<8x32xf32>
    %1337 = vector.broadcast %1334 : f32 to vector<8x32xf32>
    %1338 = arith.mulf %1337, %1336 : vector<8x32xf32>
    %1339 = arith.addf %1333, %1338 : vector<8x32xf32>
    %cst_658 = arith.constant 0.000000e+00 : f32
    %1340 = vector.broadcast %cst_658 : f32 to vector<8x32xf32>
    %1341 = arith.maximumf %1339, %1340 : vector<8x32xf32>
    %c29_659 = arith.constant 29 : index
    %1342 = memref.load %arg5[%c29_659] : memref<32xf32, #tpu.memory_space<smem>>
    %1343 = vector.broadcast %1342 : f32 to vector<8x32xf32>
    %1344 = arith.mulf %1343, %1341 : vector<8x32xf32>
    %1345 = arith.addf %1301, %1344 : vector<8x32xf32>
    %c30_660 = arith.constant 30 : index
    %1346 = memref.load %arg4[%c30_660] : memref<32xf32, #tpu.memory_space<smem>>
    %1347 = vector.broadcast %1346 : f32 to vector<8x32xf32>
    %c180 = arith.constant 180 : index
    %1348 = memref.load %arg3[%c180] : memref<192xf32, #tpu.memory_space<smem>>
    %c0_661 = arith.constant 0 : index
    %c0_662 = arith.constant 0 : index
    %c0_663 = arith.constant 0 : index
    %1349 = vector.load %arg8[%c0_661, %c0_662, %c0_663] : memref<6x8x32xf32, #tpu.memory_space<vmem>>, vector<1x8x32xf32>
    %1350 = vector.shape_cast %1349 : vector<1x8x32xf32> to vector<8x32xf32>
    %1351 = vector.broadcast %1348 : f32 to vector<8x32xf32>
    %1352 = arith.mulf %1351, %1350 : vector<8x32xf32>
    %1353 = arith.addf %1347, %1352 : vector<8x32xf32>
    %c181 = arith.constant 181 : index
    %1354 = memref.load %arg3[%c181] : memref<192xf32, #tpu.memory_space<smem>>
    %c1_664 = arith.constant 1 : index
    %c0_665 = arith.constant 0 : index
    %c0_666 = arith.constant 0 : index
    %1355 = vector.load %arg8[%c1_664, %c0_665, %c0_666] : memref<6x8x32xf32, #tpu.memory_space<vmem>>, vector<1x8x32xf32>
    %1356 = vector.shape_cast %1355 : vector<1x8x32xf32> to vector<8x32xf32>
    %1357 = vector.broadcast %1354 : f32 to vector<8x32xf32>
    %1358 = arith.mulf %1357, %1356 : vector<8x32xf32>
    %1359 = arith.addf %1353, %1358 : vector<8x32xf32>
    %c182 = arith.constant 182 : index
    %1360 = memref.load %arg3[%c182] : memref<192xf32, #tpu.memory_space<smem>>
    %c2_667 = arith.constant 2 : index
    %c0_668 = arith.constant 0 : index
    %c0_669 = arith.constant 0 : index
    %1361 = vector.load %arg8[%c2_667, %c0_668, %c0_669] : memref<6x8x32xf32, #tpu.memory_space<vmem>>, vector<1x8x32xf32>
    %1362 = vector.shape_cast %1361 : vector<1x8x32xf32> to vector<8x32xf32>
    %1363 = vector.broadcast %1360 : f32 to vector<8x32xf32>
    %1364 = arith.mulf %1363, %1362 : vector<8x32xf32>
    %1365 = arith.addf %1359, %1364 : vector<8x32xf32>
    %c183 = arith.constant 183 : index
    %1366 = memref.load %arg3[%c183] : memref<192xf32, #tpu.memory_space<smem>>
    %c3_670 = arith.constant 3 : index
    %c0_671 = arith.constant 0 : index
    %c0_672 = arith.constant 0 : index
    %1367 = vector.load %arg8[%c3_670, %c0_671, %c0_672] : memref<6x8x32xf32, #tpu.memory_space<vmem>>, vector<1x8x32xf32>
    %1368 = vector.shape_cast %1367 : vector<1x8x32xf32> to vector<8x32xf32>
    %1369 = vector.broadcast %1366 : f32 to vector<8x32xf32>
    %1370 = arith.mulf %1369, %1368 : vector<8x32xf32>
    %1371 = arith.addf %1365, %1370 : vector<8x32xf32>
    %c184 = arith.constant 184 : index
    %1372 = memref.load %arg3[%c184] : memref<192xf32, #tpu.memory_space<smem>>
    %c4_673 = arith.constant 4 : index
    %c0_674 = arith.constant 0 : index
    %c0_675 = arith.constant 0 : index
    %1373 = vector.load %arg8[%c4_673, %c0_674, %c0_675] : memref<6x8x32xf32, #tpu.memory_space<vmem>>, vector<1x8x32xf32>
    %1374 = vector.shape_cast %1373 : vector<1x8x32xf32> to vector<8x32xf32>
    %1375 = vector.broadcast %1372 : f32 to vector<8x32xf32>
    %1376 = arith.mulf %1375, %1374 : vector<8x32xf32>
    %1377 = arith.addf %1371, %1376 : vector<8x32xf32>
    %c185 = arith.constant 185 : index
    %1378 = memref.load %arg3[%c185] : memref<192xf32, #tpu.memory_space<smem>>
    %c5_676 = arith.constant 5 : index
    %c0_677 = arith.constant 0 : index
    %c0_678 = arith.constant 0 : index
    %1379 = vector.load %arg8[%c5_676, %c0_677, %c0_678] : memref<6x8x32xf32, #tpu.memory_space<vmem>>, vector<1x8x32xf32>
    %1380 = vector.shape_cast %1379 : vector<1x8x32xf32> to vector<8x32xf32>
    %1381 = vector.broadcast %1378 : f32 to vector<8x32xf32>
    %1382 = arith.mulf %1381, %1380 : vector<8x32xf32>
    %1383 = arith.addf %1377, %1382 : vector<8x32xf32>
    %cst_679 = arith.constant 0.000000e+00 : f32
    %1384 = vector.broadcast %cst_679 : f32 to vector<8x32xf32>
    %1385 = arith.maximumf %1383, %1384 : vector<8x32xf32>
    %c30_680 = arith.constant 30 : index
    %1386 = memref.load %arg5[%c30_680] : memref<32xf32, #tpu.memory_space<smem>>
    %1387 = vector.broadcast %1386 : f32 to vector<8x32xf32>
    %1388 = arith.mulf %1387, %1385 : vector<8x32xf32>
    %1389 = arith.addf %1345, %1388 : vector<8x32xf32>
    %c31_681 = arith.constant 31 : index
    %1390 = memref.load %arg4[%c31_681] : memref<32xf32, #tpu.memory_space<smem>>
    %1391 = vector.broadcast %1390 : f32 to vector<8x32xf32>
    %c186 = arith.constant 186 : index
    %1392 = memref.load %arg3[%c186] : memref<192xf32, #tpu.memory_space<smem>>
    %c0_682 = arith.constant 0 : index
    %c0_683 = arith.constant 0 : index
    %c0_684 = arith.constant 0 : index
    %1393 = vector.load %arg8[%c0_682, %c0_683, %c0_684] : memref<6x8x32xf32, #tpu.memory_space<vmem>>, vector<1x8x32xf32>
    %1394 = vector.shape_cast %1393 : vector<1x8x32xf32> to vector<8x32xf32>
    %1395 = vector.broadcast %1392 : f32 to vector<8x32xf32>
    %1396 = arith.mulf %1395, %1394 : vector<8x32xf32>
    %1397 = arith.addf %1391, %1396 : vector<8x32xf32>
    %c187 = arith.constant 187 : index
    %1398 = memref.load %arg3[%c187] : memref<192xf32, #tpu.memory_space<smem>>
    %c1_685 = arith.constant 1 : index
    %c0_686 = arith.constant 0 : index
    %c0_687 = arith.constant 0 : index
    %1399 = vector.load %arg8[%c1_685, %c0_686, %c0_687] : memref<6x8x32xf32, #tpu.memory_space<vmem>>, vector<1x8x32xf32>
    %1400 = vector.shape_cast %1399 : vector<1x8x32xf32> to vector<8x32xf32>
    %1401 = vector.broadcast %1398 : f32 to vector<8x32xf32>
    %1402 = arith.mulf %1401, %1400 : vector<8x32xf32>
    %1403 = arith.addf %1397, %1402 : vector<8x32xf32>
    %c188 = arith.constant 188 : index
    %1404 = memref.load %arg3[%c188] : memref<192xf32, #tpu.memory_space<smem>>
    %c2_688 = arith.constant 2 : index
    %c0_689 = arith.constant 0 : index
    %c0_690 = arith.constant 0 : index
    %1405 = vector.load %arg8[%c2_688, %c0_689, %c0_690] : memref<6x8x32xf32, #tpu.memory_space<vmem>>, vector<1x8x32xf32>
    %1406 = vector.shape_cast %1405 : vector<1x8x32xf32> to vector<8x32xf32>
    %1407 = vector.broadcast %1404 : f32 to vector<8x32xf32>
    %1408 = arith.mulf %1407, %1406 : vector<8x32xf32>
    %1409 = arith.addf %1403, %1408 : vector<8x32xf32>
    %c189 = arith.constant 189 : index
    %1410 = memref.load %arg3[%c189] : memref<192xf32, #tpu.memory_space<smem>>
    %c3_691 = arith.constant 3 : index
    %c0_692 = arith.constant 0 : index
    %c0_693 = arith.constant 0 : index
    %1411 = vector.load %arg8[%c3_691, %c0_692, %c0_693] : memref<6x8x32xf32, #tpu.memory_space<vmem>>, vector<1x8x32xf32>
    %1412 = vector.shape_cast %1411 : vector<1x8x32xf32> to vector<8x32xf32>
    %1413 = vector.broadcast %1410 : f32 to vector<8x32xf32>
    %1414 = arith.mulf %1413, %1412 : vector<8x32xf32>
    %1415 = arith.addf %1409, %1414 : vector<8x32xf32>
    %c190 = arith.constant 190 : index
    %1416 = memref.load %arg3[%c190] : memref<192xf32, #tpu.memory_space<smem>>
    %c4_694 = arith.constant 4 : index
    %c0_695 = arith.constant 0 : index
    %c0_696 = arith.constant 0 : index
    %1417 = vector.load %arg8[%c4_694, %c0_695, %c0_696] : memref<6x8x32xf32, #tpu.memory_space<vmem>>, vector<1x8x32xf32>
    %1418 = vector.shape_cast %1417 : vector<1x8x32xf32> to vector<8x32xf32>
    %1419 = vector.broadcast %1416 : f32 to vector<8x32xf32>
    %1420 = arith.mulf %1419, %1418 : vector<8x32xf32>
    %1421 = arith.addf %1415, %1420 : vector<8x32xf32>
    %c191 = arith.constant 191 : index
    %1422 = memref.load %arg3[%c191] : memref<192xf32, #tpu.memory_space<smem>>
    %c5_697 = arith.constant 5 : index
    %c0_698 = arith.constant 0 : index
    %c0_699 = arith.constant 0 : index
    %1423 = vector.load %arg8[%c5_697, %c0_698, %c0_699] : memref<6x8x32xf32, #tpu.memory_space<vmem>>, vector<1x8x32xf32>
    %1424 = vector.shape_cast %1423 : vector<1x8x32xf32> to vector<8x32xf32>
    %1425 = vector.broadcast %1422 : f32 to vector<8x32xf32>
    %1426 = arith.mulf %1425, %1424 : vector<8x32xf32>
    %1427 = arith.addf %1421, %1426 : vector<8x32xf32>
    %cst_700 = arith.constant 0.000000e+00 : f32
    %1428 = vector.broadcast %cst_700 : f32 to vector<8x32xf32>
    %1429 = arith.maximumf %1427, %1428 : vector<8x32xf32>
    %c31_701 = arith.constant 31 : index
    %1430 = memref.load %arg5[%c31_701] : memref<32xf32, #tpu.memory_space<smem>>
    %1431 = vector.broadcast %1430 : f32 to vector<8x32xf32>
    %1432 = arith.mulf %1431, %1429 : vector<8x32xf32>
    %1433 = arith.addf %1389, %1432 : vector<8x32xf32>
    %c0_702 = arith.constant 0 : index
    %c0_703 = arith.constant 0 : index
    %1434 = vector.load %arg7[%c0_702, %c0_703] : memref<8x32xf32, #tpu.memory_space<vmem>>, vector<8x32xf32>
    tpu.vector_store %arg7[%c0_702, %c0_703], %1433 {strides = array<i32>} : memref<8x32xf32, #tpu.memory_space<vmem>>, vector<8x32xf32>,
    return
  }
  func.func @transform_0(%arg0: i32) -> (i32, i32) {
    %c0_i32 = arith.constant 0 : i32
    %c0_i32_0 = arith.constant 0 : i32
    return %arg0, %c0_i32 : i32, i32
  }
  func.func @transform_1(%arg0: i32) -> (i32, i32) {
    %c0_i32 = arith.constant 0 : i32
    %c0_i32_0 = arith.constant 0 : i32
    return %arg0, %c0_i32 : i32, i32
  }
  func.func @transform_2(%arg0: i32) -> i32 {
    %c0_i32 = arith.constant 0 : i32
    %c0_i32_0 = arith.constant 0 : i32
    return %c0_i32 : i32
  }
  func.func @transform_3(%arg0: i32) -> i32 {
    %c0_i32 = arith.constant 0 : i32
    %c0_i32_0 = arith.constant 0 : i32
    return %c0_i32 : i32
  }
  func.func @transform_4(%arg0: i32) -> i32 {
    %c0_i32 = arith.constant 0 : i32
    %c0_i32_0 = arith.constant 0 : i32
    return %c0_i32 : i32
  }
  func.func @transform_5(%arg0: i32) -> i32 {
    %c0_i32 = arith.constant 0 : i32
    %c0_i32_0 = arith.constant 0 : i32
    return %c0_i32 : i32
  }
  func.func @transform_6(%arg0: i32) -> (i32, i32) {
    %c0_i32 = arith.constant 0 : i32
    %c0_i32_0 = arith.constant 0 : i32
    return %arg0, %c0_i32 : i32, i32
  }
}

</mosaic_0001>

<bundles_post_ra>
// kernel: tpu_custom_call.1
= control target key start
LH: loop header
LB: loop body
LE: loop exit
PB: predicated region body
PF: predicated region fallthrough
CT: control target
= control target key end

     0   :  { %s3049_s0 = inlined_call_operand.hbm [shape: f32[8,34], index: 0, kind: input, shape index: {}]   ;;  %s3050_s1 = inlined_call_operand.hbm [shape: f32[8,34], index: 1, kind: input, shape index: {}]   ;;  %s3051_s2 = inlined_call_operand.vmem [shape: f32[192], index: 2, kind: input, shape index: {}]   ;;  %s3052_s3 = inlined_call_operand.vmem [shape: f32[32], index: 3, kind: input, shape index: {}]   ;;  %s3053_s4 = inlined_call_operand.vmem [shape: f32[32], index: 4, kind: input, shape index: {}]   ;;  %s3054_s5 = inlined_call_operand.<no memory space> [shape: f32[1], index: 5, kind: input, shape index: {}]   ;;  %s3055_s6 = inlined_call_operand.hbm [shape: f32[8,32], index: 6, kind: output, shape index: {}]  }
   0x1   :  { %3194 = sst [smem:[#allocation175_spill]] %s3054_s5 }
   0x2   :  { %3195 = sst [smem:[#allocation176_spill]] %s3055_s6 }
   0x3   :  { %12 = vsyncpa [#allocation5], 0 }
   0x4   :  { %13 = vsyncpa [#allocation9], 0 }
   0x5   :  { %14 = vsyncpa [#allocation7], 0 }
   0x6   :  { %15 = vsyncpa [#allocation12], 0  ;;  %s53_s23 = sshll.u32 %s3052_s3, 4  ;;  %s54_s23 = int_to_ptr.vmem [resolvable:$true] %s53_s23 }
   0x7   :  { %16 = vsyncpa [#allocation6], 0  ;;  %s1401_s24 = scalar_lea.vmem %s54_s23, 16  ;;  %p1406_p1 = scmp.lt.s32.totalorder %s54_s23, %s54_s23 }
   0x8   :  { %p1402_p0 = scmp.ne.s32.totalorder %s54_s23, %s1401_s24  ;;  %p1407_p2 = scmp.lt.s32.totalorder %s1401_s24, %s1401_s24 }
   0xa   :  { %p1408_p3 = por %p1407_p2, %p1406_p1 }
   0xc   :  { %p1409_p4 = pnand %p1408_p3, %p1402_p0 }
   0xe   :  { %1412 = shalt.err (!%p1409_p4)
}
   0xf   :  { %s1513_s25 = smov [#allocation11]   ;;  %s1514_s26 = smov [#allocation4]  }
  0x10   :  { %56 = dma.vmem_to_smem %s54_s23, 16, %s1513_s25, [#allocation12]  }
  0x11   :  { %s23_s27 = sshll.u32 %s1514_s26, 4  ;;  %s1515_s28 = smov [#allocation8]   ;;  %s24_s27 = int_to_ptr.vmem [resolvable:$true] %s23_s27 }
  0x12   :  { %s33_s29 = sshll.u32 %s1515_s28, 4  ;;  %s1413_s3 = scalar_lea.hbm %s3049_s0, 128  ;;  %s34_s29 = int_to_ptr.vmem [resolvable:$true] %s33_s29 }
  0x13   :  { %p1414_p5 = scmp.ne.s32.totalorder %s3049_s0, %s1413_s3  ;;  %p1417_p6 = scmp.lt.u32.totalorder %s1413_s3, %s3049_s0 }
  0x15   :  { %p1419_p7 = pnand %p1417_p6, %p1414_p5 }
  0x17   :  { %1422 = shalt.err (!%p1419_p7)
}
  0x18   :  { %s1423_s12 = scalar_lea.vmem %s24_s27, 128  ;;  %p1428_p9 = scmp.lt.s32.totalorder %s24_s27, %s24_s27 }
  0x19   :  { %p1424_p8 = scmp.ne.s32.totalorder %s24_s27, %s1423_s12  ;;  %p1429_p10 = scmp.lt.s32.totalorder %s1423_s12, %s1423_s12 }
  0x1b   :  { %p1430_p11 = por %p1429_p10, %p1428_p9 }
  0x1d   :  { %p1431_p12 = pnand %p1430_p11, %p1424_p8 }
  0x1f   :  { %1434 = shalt.err (!%p1431_p12)
}
  0x20   :  { %26 = dma.hbm_to_vmem [thread:$0]  %s3049_s0, 128, %s24_s27, [#allocation5]  }
  0x21   :  { %s43_s17 = sshll.u32 %s3051_s2, 4  ;;  %s1435_s20 = scalar_lea.hbm %s3050_s1, 128  ;;  %s44_s17 = int_to_ptr.vmem [resolvable:$true] %s43_s17 }
  0x22   :  { %p1436_p13 = scmp.ne.s32.totalorder %s3050_s1, %s1435_s20  ;;  %p1439_p0 = scmp.lt.u32.totalorder %s1435_s20, %s3050_s1 }
  0x24   :  { %p1441_p1 = pnand %p1439_p0, %p1436_p13 }
  0x26   :  { %1444 = shalt.err (!%p1441_p1)
}
  0x27   :  { %s1445_s0 = scalar_lea.vmem %s34_s29, 128  ;;  %p1450_p3 = scmp.lt.s32.totalorder %s34_s29, %s34_s29 }
  0x28   :  { %p1446_p2 = scmp.ne.s32.totalorder %s34_s29, %s1445_s0  ;;  %p1451_p4 = scmp.lt.s32.totalorder %s1445_s0, %s1445_s0 }
  0x2a   :  { %p1452_p5 = por %p1451_p4, %p1450_p3 }
  0x2c   :  { %p1453_p6 = pnand %p1452_p5, %p1446_p2 }
  0x2e   :  { %1456 = shalt.err (!%p1453_p6)
}
  0x2f   :  { %36 = dma.hbm_to_vmem [thread:$0]  %s3050_s1, 128, %s34_s29, [#allocation9]  }
  0x30   :  { %s1457_s26 = scalar_lea.vmem %s44_s17, 32  ;;  %p1462_p8 = scmp.lt.s32.totalorder %s44_s17, %s44_s17 }
  0x31   :  { %p1458_p7 = scmp.ne.s32.totalorder %s44_s17, %s1457_s26  ;;  %p1463_p9 = scmp.lt.s32.totalorder %s1457_s26, %s1457_s26 }
  0x33   :  { %p1464_p10 = por %p1463_p9, %p1462_p8 }
  0x35   :  { %p1465_p11 = pnand %p1464_p10, %p1458_p7 }
  0x37   :  { %1468 = shalt.err (!%p1465_p11)
}
  0x38   :  { %s1516_s27 = smov [#allocation10]   ;;  %s63_s7 = sshll.u32 %s3053_s4, 4  ;;  %s64_s7 = int_to_ptr.vmem [resolvable:$true] %s63_s7 }
  0x39   :  { %46 = dma.vmem_to_smem %s44_s17, 32, %s1516_s27, [#allocation7]  }
  0x3a   :  { %s1469_s3 = scalar_lea.vmem %s64_s7, 16  ;;  %p1474_p13 = scmp.lt.s32.totalorder %s64_s7, %s64_s7 }
  0x3b   :  { %p1470_p12 = scmp.ne.s32.totalorder %s64_s7, %s1469_s3  ;;  %p1475_p0 = scmp.lt.s32.totalorder %s1469_s3, %s1469_s3 }
  0x3d   :  { %p1476_p1 = por %p1475_p0, %p1474_p13 }
  0x3f   :  { %p1477_p2 = pnand %p1476_p1, %p1470_p12 }
  0x41   :  { %1480 = shalt.err (!%p1477_p2)
}
  0x42   :  { %s1517_s1 = smov [#allocation13]  }
  0x43   :  { %66 = dma.vmem_to_smem %s64_s7, 16, %s1517_s1, [#allocation12]  }
  0x44   :  { %1503 = dma.done.wait [#allocation5], 128  }
  0x45   :  { %1504 = vsyncadd [#allocation5], 4294967168 }
  0x46   :  { %1505 = dma.done.wait [#allocation9], 128  }
  0x47   :  { %1506 = vsyncadd [#allocation9], 4294967168 }
  0x48   :  { %1507 = dma.done.wait [#allocation7], 32  }
  0x49   :  { %1508 = vsyncadd [#allocation7], 4294967264 }
  0x4a   :  { %1509 = dma.done.wait [#allocation12], 32  }
  0x4b   :  { %1510 = vsyncadd [#allocation12], 4294967264 }
  0x4c   :  { %84 = sfence }
  0x4d   :  { %v88_v0 = vld [vmem:[#allocation4] sm:$0xff]  ;;  %v105_v1 = vld [vmem:[#allocation8] sm:$0xff]  ;;  %vm86_vm0 = vcmask 261120   ;;  %s1518_s4 = smov 127   ;;  %s1591_s29 = sld [smem:[#allocation11]] }
  0x4e   :  { %90 = vrot.lane.b32.xlu0 %v88_v0, %s1518_s4  ;;  %107 = vrot.lane.b32.xlu1 %v105_v1, %s1518_s4  ;;  %87 = vst.msk [vmem:[#allocation2] sm:$0xff] %vm86_vm0, %v88_v0  ;;  %104 = vst.msk [vmem:[#allocation2 + $0x18] sm:$0xff] %vm86_vm0, %v105_v1  ;;  %s1593_s8 = sld [smem:[#allocation10]]  ;;  %s1595_s9 = sld [smem:[#allocation10 + $0x1]] }
  0x4f   :  { %s1597_s10 = sld [smem:[#allocation10 + $0x2]]  ;;  %s1599_s11 = sld [smem:[#allocation10 + $0x3]] }
  0x50   :  { %s1601_s12 = sld [smem:[#allocation10 + $0x4]]  ;;  %s1603_s13 = sld [smem:[#allocation10 + $0x5]] }
  0x51   :  { %s1519_s14 = smov 126   ;;  %s1605_s15 = sld [smem:[#allocation13]] }
  0x52   :  { %97 = vrot.lane.b32.xlu0 %v88_v0, %s1519_s14  ;;  %114 = vrot.lane.b32.xlu1 %v105_v1, %s1519_s14  ;;  %s1607_s16 = sld [smem:[#allocation11 + $0x1]]  ;;  %s1609_s17 = sld [smem:[#allocation10 + $0x6]] }
  0x53   :  { %s1611_s18 = sld [smem:[#allocation10 + $0x7]]  ;;  %s1613_s19 = sld [smem:[#allocation10 + $0x8]]  ;;  %v122_v9 = vstv %s1591_s29 }
  0x54   :  { %3196 = sst [smem:[#allocation20_spill]] %s1595_s9  ;;  %s1615_s20 = sld [smem:[#allocation10 + $0x9]]  ;;  %v125_v3 = vstv %s1593_s8 }
  0x55   :  { %3197 = sst [smem:[#allocation21_spill]] %s1597_s10  ;;  %s1617_s21 = sld [smem:[#allocation10 + $0xa]]  ;;  %v1749_v2 = vld [vmem:[#allocation2] sm:$0xff]  ;;  %v1766_v6 = vld [vmem:[#allocation2 + $0x18] sm:$0xff]  ;;  %v140_v7 = vstv %s1599_s11 }
  0x56   :  { %3198 = sst [smem:[#allocation22_spill]] %s1601_s12  ;;  %s1619_s22 = sld [smem:[#allocation10 + $0xb]]  ;;  %v126_v5 = vmul.f32 %v125_v3, %v1749_v2  ;;  %v1791_v15 = vmul.f32 %v140_v7, %v1766_v6 }
  0x57   :  { %3199 = sst [smem:[#allocation23_spill]] %s1603_s13  ;;  %s1621_s23 = sld [smem:[#allocation13 + $0x1]] }
  0x58   :  { %3200 = sst [smem:[#allocation24_spill]] %s1605_s15  ;;  %s1623_s24 = sld [smem:[#allocation11 + $0x2]]  ;;  %v161_v4 = vstv %s1609_s17  ;;  %v159_v17 = vstv %s1607_s16  ;;  %v1800_v19 = vadd.f32 %v126_v5, %v122_v9 }
  0x59   :  { %3201 = sst [smem:[#allocation25_spill]] %s1611_s18  ;;  %s1625_s0 = sld [smem:[#allocation10 + $0xc]]  ;;  %v162_v14 = vmul.f32 %v161_v4, %v1749_v2 }
  0x5a   :  { %3202 = sst [smem:[#allocation26_spill]] %s1613_s19  ;;  %s1627_s2 = sld [smem:[#allocation10 + $0xd]]  ;;  %v173_v18 = vstv %s1615_s20 }
  0x5b   :  { %3203 = sst [smem:[#allocation27_spill]] %s1617_s21  ;;  %s1629_s25 = sld [smem:[#allocation10 + $0xe]]  ;;  %v1817_v27 = vadd.f32 %v162_v14, %v159_v17  ;;  %v1820_v28 = vmul.f32 %v173_v18, %v1766_v6 }
  0x5c   :  { %3204 = sst [smem:[#allocation28_spill]] %s1619_s22  ;;  %s1631_s26 = sld [smem:[#allocation10 + $0xf]] }
  0x5d   :  { %3205 = sst [smem:[#allocation29_spill]] %s1621_s23  ;;  %s1633_s27 = sld [smem:[#allocation10 + $0x10]] }
  0x5e   :  { %s1635_s28 = sld [smem:[#allocation10 + $0x11]]  ;;  %s1637_s30 = sld [smem:[#allocation13 + $0x2]]  ;;  %v190_v26 = vstv %s1623_s24 }
  0x5f   :  { %s1639_s7 = sld [smem:[#allocation11 + $0x3]]  ;;  %s1641_s3 = sld [smem:[#allocation10 + $0x12]]  ;;  %v192_v10 = vstv %s1625_s0 }
  0x60   :  { %3206 = sst [smem:[#allocation30_spill]] %s1627_s2  ;;  %s1643_s1 = sld [smem:[#allocation10 + $0x13]]  ;;  %v193_v21 = vmul.f32 %v192_v10, %v1749_v2 }
  0x61   :  { %3207 = sst [smem:[#allocation31_spill]] %s1629_s25  ;;  %s1645_s4 = sld [smem:[#allocation10 + $0x14]] }
  0x62   :  { %s1647_s14 = sld [smem:[#allocation10 + $0x15]]  ;;  %s1649_s6 = sld [smem:[#allocation10 + $0x16]]  ;;  %v204_v30 = vstv %s1631_s26  ;;  %v1836_v35 = vadd.f32 %v193_v21, %v190_v26 }
  0x63   :  { %3208 = sst [smem:[#allocation32_spill]] %s1633_s27  ;;  %s1651_s25 = sld [smem:[#allocation10 + $0x17]]  ;;  %v1846_v39 = vmul.f32 %v204_v30, %v1766_v6 }
  0x64   :  { %3209 = sst [smem:[#allocation33_spill]] %s1635_s28  ;;  %s1653_s2 = sld [smem:[#allocation13 + $0x3]] }
  0x65   :  { %3210 = sst [smem:[#allocation34_spill]] %s1637_s30  ;;  %s1655_s27 = sld [smem:[#allocation11 + $0x4]]  ;;  %v223_v22 = vstv %s1641_s3 }
  0x66   :  { %3211 = sst [smem:[#allocation35_spill]] %s1639_s7  ;;  %s1657_s28 = sld [smem:[#allocation10 + $0x18]]  ;;  %v224_v33 = vmul.f32 %v223_v22, %v1749_v2 }
  0x67   :  { %3212 = sst [smem:[#allocation36_spill]] %s1643_s1  ;;  %s1659_s30 = sld [smem:[#allocation10 + $0x19]] }
  0x68   :  { %3213 = sst [smem:[#allocation37_spill]] %s1645_s4  ;;  %s1661_s7 = sld [smem:[#allocation10 + $0x1a]] }
  0x69   :  { %3214 = sst [smem:[#allocation38_spill]] %s1647_s14  ;;  %s1663_s23 = sld [smem:[#allocation10 + $0x1b]] }
  0x6a   :  { %3215 = sst [smem:[#allocation39_spill]] %s1649_s6  ;;  %s1665_s1 = sld [smem:[#allocation10 + $0x1c]] }
  0x6b   :  { %3216 = sst [smem:[#allocation40_spill]] %s1651_s25  ;;  %s1667_s4 = sld [smem:[#allocation10 + $0x1d]] }
  0x6c   :  { %3217 = sst [smem:[#allocation41_spill]] %s1653_s2  ;;  %s1669_s14 = sld [smem:[#allocation13 + $0x4]] }
  0x6d   :  { %3218 = sst [smem:[#allocation42_spill]] %s1655_s27  ;;  %s1671_s6 = sld [smem:[#allocation11 + $0x5]] }
  0x6e   :  { %3219 = sst [smem:[#allocation43_spill]] %s1657_s28  ;;  %s1673_s25 = sld [smem:[#allocation10 + $0x1e]] }
  0x6f   :  { %3220 = sst [smem:[#allocation44_spill]] %s1659_s30  ;;  %s1675_s2 = sld [smem:[#allocation10 + $0x1f]] }
  0x70   :  { %3221 = sst [smem:[#allocation45_spill]] %s1661_s7  ;;  %s1677_s27 = sld [smem:[#allocation10 + $0x20]] }
  0x71   :  { %3222 = sst [smem:[#allocation46_spill]] %s1663_s23  ;;  %s1679_s28 = sld [smem:[#allocation10 + $0x21]] }
  0x72   :  { %3223 = sst [smem:[#allocation47_spill]] %s1665_s1  ;;  %s1681_s30 = sld [smem:[#allocation10 + $0x22]] }
  0x73   :  { %3224 = sst [smem:[#allocation48_spill]] %s1667_s4  ;;  %s1683_s7 = sld [smem:[#allocation10 + $0x23]] }
  0x74   :  { %3225 = sst [smem:[#allocation49_spill]] %s1669_s14  ;;  %s1687_s1 = sld [smem:[#allocation11 + $0x6]] }
  0x75   :  { %3226 = sst [smem:[#allocation50_spill]] %s1671_s6  ;;  %s1685_s23 = sld [smem:[#allocation13 + $0x5]] }
  0x76   :  { %3227 = sst [smem:[#allocation51_spill]] %s1673_s25  ;;  %s1689_s4 = sld [smem:[#allocation10 + $0x24]] }
  0x77   :  { %3228 = sst [smem:[#allocation52_spill]] %s1675_s2  ;;  %s1691_s14 = sld [smem:[#allocation10 + $0x25]] }
  0x78   :  { %3229 = sst [smem:[#allocation53_spill]] %s1677_s27  ;;  %s1693_s6 = sld [smem:[#allocation10 + $0x26]] }
  0x79   :  { %3230 = sst [smem:[#allocation54_spill]] %s1679_s28  ;;  %s1695_s25 = sld [smem:[#allocation10 + $0x27]] }
  0x7a   :  { %3231 = sst [smem:[#allocation55_spill]] %s1681_s30  ;;  %s1697_s2 = sld [smem:[#allocation10 + $0x28]] }
  0x7b   :  { %3232 = sst [smem:[#allocation56_spill]] %s1683_s7  ;;  %s1699_s27 = sld [smem:[#allocation10 + $0x29]] }
  0x7c   :  { %3233 = sst [smem:[#allocation57_spill]] %s1685_s23  ;;  %s1701_s28 = sld [smem:[#allocation13 + $0x6]] }
  0x7d   :  { %3234 = sst [smem:[#allocation58_spill]] %s1687_s1  ;;  %s1703_s30 = sld [smem:[#allocation11 + $0x7]] }
  0x7e   :  { %3235 = sst [smem:[#allocation59_spill]] %s1689_s4  ;;  %s1705_s7 = sld [smem:[#allocation10 + $0x2a]] }
  0x7f   :  { %3236 = sst [smem:[#allocation60_spill]] %s1691_s14  ;;  %s1707_s23 = sld [smem:[#allocation10 + $0x2b]] }
  0x80   :  { %3237 = sst [smem:[#allocation61_spill]] %s1693_s6  ;;  %s1709_s1 = sld [smem:[#allocation10 + $0x2c]] }
  0x81   :  { %3238 = sst [smem:[#allocation62_spill]] %s1695_s25  ;;  %s1711_s4 = sld [smem:[#allocation10 + $0x2d]] }
  0x82   :  { %3239 = sst [smem:[#allocation63_spill]] %s1697_s2  ;;  %s1713_s14 = sld [smem:[#allocation10 + $0x2e]] }
  0x83   :  { %3240 = sst [smem:[#allocation64_spill]] %s1699_s27  ;;  %s1715_s6 = sld [smem:[#allocation10 + $0x2f]] }
  0x84   :  { %3241 = sst [smem:[#allocation65_spill]] %s1701_s28  ;;  %s1717_s25 = sld [smem:[#allocation13 + $0x7]]  ;;  %v347_v3 = vstv %s1705_s7 }
  0x85   :  { %3242 = sst [smem:[#allocation66_spill]] %s1703_s30  ;;  %s1719_s2 = sld [smem:[#allocation11 + $0x8]]  ;;  %v348_v26 = vmul.f32 %v347_v3, %v1749_v2 }
  0x86   :  { %3243 = sst [smem:[#allocation67_spill]] %s1707_s23  ;;  %s1721_s28 = sld [smem:[#allocation10 + $0x30]] }
  0x87   :  { %3244 = sst [smem:[#allocation68_spill]] %s1709_s1  ;;  %s1723_s27 = sld [smem:[#allocation10 + $0x31]] }
  0x88   :  { %3245 = sst [smem:[#allocation69_spill]] %s1711_s4  ;;  %s1725_s30 = sld [smem:[#allocation10 + $0x32]] }
  0x89   :  { %3246 = sst [smem:[#allocation70_spill]] %s1713_s14  ;;  %s1727_s23 = sld [smem:[#allocation10 + $0x33]] }
  0x8a   :  { %3247 = sst [smem:[#allocation71_spill]] %s1715_s6  ;;  %s1729_s1 = sld [smem:[#allocation10 + $0x34]] }
  0x8b   :  { %3248 = sst [smem:[#allocation72_spill]] %s1717_s25  ;;  %s1731_s4 = sld [smem:[#allocation10 + $0x35]] }
  0x8c   :  { %3249 = sst [smem:[#allocation73_spill]] %s1719_s2  ;;  %s1733_s14 = sld [smem:[#allocation13 + $0x8]] }
  0x8d   :  { %3250 = sst [smem:[#allocation74_spill]] %s1721_s28  ;;  %s1735_s6 = sld [smem:[#allocation11 + $0x9]] }
  0x8e   :  { %3251 = sst [smem:[#allocation75_spill]] %s1723_s27  ;;  %s1737_s25 = sld [smem:[#allocation10 + $0x36]] }
  0x8f   :  { %3252 = sst [smem:[#allocation76_spill]] %s1725_s30  ;;  %s1739_s2 = sld [smem:[#allocation10 + $0x37]] }
  0x90   :  { %3253 = sst [smem:[#allocation77_spill]] %s1727_s23  ;;  %s1741_s28 = sld [smem:[#allocation10 + $0x38]] }
  0x91   :  { %3254 = sst [smem:[#allocation78_spill]] %s1729_s1  ;;  %s1743_s27 = sld [smem:[#allocation10 + $0x39]] }
  0x92   :  { %3255 = sst [smem:[#allocation79_spill]] %s1731_s4  ;;  %s1745_s30 = sld [smem:[#allocation10 + $0x3a]] }
  0x93   :  { %3256 = sst [smem:[#allocation80_spill]] %s1733_s14  ;;  %s1747_s23 = sld [smem:[#allocation10 + $0x3b]] }
  0x94   :  { %s1752_s14 = sld [smem:[#allocation13 + $0x9]]  ;;  %s1754_s4 = sld [smem:[#allocation11 + $0xa]] }
  0x95   :  { %3257 = sst [smem:[#allocation81_spill]] %s1739_s2  ;;  %s1756_s2 = sld [smem:[#allocation10 + $0x3c]] }
  0x96   :  { %3258 = sst [smem:[#allocation82_spill]] %s1741_s28  ;;  %s1758_s28 = sld [smem:[#allocation10 + $0x3d]] }
  0x97   :  { %s1769_s8 = sld [smem:[#allocation10 + $0x40]]  ;;  %s1778_s17 = sld [smem:[#allocation13 + $0xa]]  ;;  %v421_v53 = vstv %s1743_s27 }
  0x98   :  { %3259 = sst [smem:[#allocation83_spill]] %s1745_s30  ;;  %s1761_s30 = sld [smem:[#allocation10 + $0x3e]]  ;;  %v2020_v3 = vmul.f32 %v421_v53, %v1766_v6 }
  0x99   :  { %3260 = sst [smem:[#allocation84_spill]] %s1747_s23  ;;  %s1763_s23 = sld [smem:[#allocation10 + $0x3f]] }
  0x9a   :  { %3261 = sst [smem:[#allocation85_spill]] %s1752_s14  ;;  %s1786_s11 = sld [smem:[#allocation10 + $0x42]] }
  0x9b   :  { %3262 = sst [smem:[#allocation86_spill]] %s1754_s4  ;;  %s1771_s14 = sld [smem:[#allocation10 + $0x41]]  ;;  %v440_v0 = vstv %s1756_s2 }
  0x9c   :  { %3263 = sst [smem:[#allocation87_spill]] %s1758_s28  ;;  %s1796_s29 = sld [smem:[#allocation10 + $0x44]] }
  0x9d   :  { %3265 = sst [smem:[#allocation89_spill]] %s1769_s8  ;;  %s1788_s28 = sld [smem:[#allocation10 + $0x43]] }
  0x9e   :  { %3264 = sst [smem:[#allocation88_spill]] %s1761_s30  ;;  %s1780_s30 = sld [smem:[#allocation11 + $0xb]] }
  0x9f   :  { %3267 = sst [smem:[#allocation91_spill]] %s1778_s17  ;;  %s1798_s0 = sld [smem:[#allocation10 + $0x45]] }
  0xa0   :  { %s1805_s10 = sld [smem:[#allocation10 + $0x46]]  ;;  %s1807_s12 = sld [smem:[#allocation10 + $0x47]] }
  0xa1   :  { %3266 = sst [smem:[#allocation90_spill]] %s1771_s14  ;;  %s3275_s16 = sld [smem:[#allocation43_spill]] }
  0xa2   :  { %3269 = sst [smem:[#allocation93_spill]] %s1796_s29  ;;  %s1813_s13 = sld [smem:[#allocation13 + $0xb]] }
  0xa3   :  { %3268 = sst [smem:[#allocation92_spill]] %s1788_s28  ;;  %s1815_s29 = sld [smem:[#allocation11 + $0xc]] }
  0xa4   :  { %s3280_s15 = sld [smem:[#allocation35_spill]]  ;;  %s1826_s21 = sld [smem:[#allocation10 + $0x49]] }
  0xa5   :  { %3270 = sst [smem:[#allocation94_spill]] %s1798_s0  ;;  %s3289_s22 = sld [smem:[#allocation51_spill]] }
  0xa6   :  { %3273 = sst [smem:[#allocation95_spill]] %s1805_s10  ;;  %s3284_s24 = sld [smem:[#allocation38_spill]] }
  0xa7   :  { %3274 = sst [smem:[#allocation96_spill]] %s1807_s12  ;;  %s1824_s12 = sld [smem:[#allocation10 + $0x48]]  ;;  %v254_v34 = vstv %s3275_s16 }
  0xa8   :  { %3277 = sst [smem:[#allocation43_spill]] %s1813_s13  ;;  %s1834_s10 = sld [smem:[#allocation10 + $0x4b]]  ;;  %v255_v45 = vmul.f32 %v254_v34, %v1749_v2 }
  0xa9   :  { %3279 = sst [smem:[#allocation97_spill]] %s1815_s29  ;;  %s1832_s29 = sld [smem:[#allocation10 + $0x4a]] }
  0xaa   :  { %3283 = sst [smem:[#allocation35_spill]] %s1826_s21  ;;  %v221_v38 = vstv %s3280_s15  ;;  %s1841_s21 = sld [smem:[#allocation10 + $0x4c]] }
  0xab   :  { %s3292_s4 = sld [smem:[#allocation42_spill]]  ;;  %s1843_s5 = sld [smem:[#allocation10 + $0x4d]]  ;;  %v285_v46 = vstv %s3289_s22  ;;  %v1863_v47 = vadd.f32 %v224_v33, %v221_v38 }
  0xac   :  { %s3294_s28 = sld [smem:[#allocation46_spill]]  ;;  %v235_v42 = vstv %s3284_s24  ;;  %s1853_s20 = sld [smem:[#allocation11 + $0xd]]  ;;  %v286_v58 = vmul.f32 %v285_v46, %v1749_v2 }
  0xad   :  { %s3299_s15 = sld [smem:[#allocation59_spill]]  ;;  %s1868_s24 = sld [smem:[#allocation10 + $0x50]]  ;;  %v1873_v51 = vmul.f32 %v235_v42, %v1766_v6  ;;  %v502_v41 = vstv %s1824_s12 }
  0xae   :  { %3288 = sst [smem:[#allocation98_spill]] %s1834_s10  ;;  %s1861_s3 = sld [smem:[#allocation10 + $0x4f]] }
  0xaf   :  { %3287 = sst [smem:[#allocation38_spill]] %s1832_s29  ;;  %s1851_s29 = sld [smem:[#allocation13 + $0xc]] }
  0xb0   :  { %3291 = sst [smem:[#allocation51_spill]] %s1841_s21  ;;  %s1859_s21 = sld [smem:[#allocation10 + $0x4e]] }
  0xb1   :  { %3293 = sst [smem:[#allocation42_spill]] %s1843_s5  ;;  %v252_v49 = vstv %s3292_s4  ;;  %s1870_s18 = sld [smem:[#allocation10 + $0x51]] }
  0xb2   :  { %3298 = sst [smem:[#allocation99_spill]] %s1853_s20  ;;  %v266_v50 = vstv %s3294_s28  ;;  %s3305_s19 = sld [smem:[#allocation50_spill]]  ;;  %v1890_v59 = vadd.f32 %v255_v45, %v252_v49  ;;  %v407_v49 = vstv %s1735_s6 }
  0xb3   :  { %3304 = sst [smem:[#allocation100_spill]] %s1868_s24  ;;  %s3307_s13 = sld [smem:[#allocation54_spill]]  ;;  %v316_v54 = vstv %s3299_s15  ;;  %v1893_v60 = vmul.f32 %v266_v50, %v1766_v6 }
  0xb4   :  { %3303 = sst [smem:[#allocation59_spill]] %s1861_s3  ;;  %s1878_s3 = sld [smem:[#allocation10 + $0x52]]  ;;  %v317_v1 = vmul.f32 %v316_v54, %v1749_v2  ;;  %v452_v54 = vstv %s1763_s23 }
  0xb5   :  { %3296 = sst [smem:[#allocation46_spill]] %s1851_s29  ;;  %s1880_s20 = sld [smem:[#allocation10 + $0x53]] }
  0xb6   :  { %s1886_s26 = sld [smem:[#allocation13 + $0xd]]  ;;  %s1888_s16 = sld [smem:[#allocation11 + $0xe]] }
  0xb7   :  { %3306 = sst [smem:[#allocation50_spill]] %s1870_s18  ;;  %s1897_s15 = sld [smem:[#allocation10 + $0x54]] }
  0xb8   :  { %s3317_s10 = sld [smem:[#allocation58_spill]]  ;;  %v283_v61 = vstv %s3305_s19  ;;  %s1899_s0 = sld [smem:[#allocation10 + $0x55]] }
  0xb9   :  { %v297_v62 = vstv %s3307_s13  ;;  %s3320_s9 = sld [smem:[#allocation62_spill]]  ;;  %s3325_s18 = sld [smem:[#allocation74_spill]]  ;;  %v1917_v10 = vadd.f32 %v286_v58, %v283_v61 }
  0xba   :  { %3310 = sst [smem:[#allocation54_spill]] %s1878_s3  ;;  %s1907_s3 = sld [smem:[#allocation10 + $0x57]]  ;;  %v1920_v14 = vmul.f32 %v297_v62, %v1766_v6  ;;  %v409_v62 = vstv %s1737_s25 }
  0xbb   :  { %3311 = sst [smem:[#allocation101_spill]] %s1880_s20  ;;  %s1913_s19 = sld [smem:[#allocation10 + $0x58]]  ;;  %v410_v58 = vmul.f32 %v409_v62, %v1749_v2  ;;  %v469_v62 = vstv %s1780_s30 }
  0xbc   :  { %3314 = sst [smem:[#allocation102_spill]] %s1886_s26  ;;  %s1915_s22 = sld [smem:[#allocation10 + $0x59]] }
  0xbd   :  { %3316 = sst [smem:[#allocation103_spill]] %s1888_s16  ;;  %s1905_s16 = sld [smem:[#allocation10 + $0x56]]  ;;  %v564_v46 = vstv %s1897_s15 }
  0xbe   :  { %3319 = sst [smem:[#allocation58_spill]] %s1899_s0  ;;  %v314_v9 = vstv %s3317_s10  ;;  %s1926_s24 = sld [smem:[#allocation11 + $0xf]] }
  0xbf   :  { %s3330_s29 = sld [smem:[#allocation66_spill]]  ;;  %v328_v18 = vstv %s3320_s9  ;;  %s3335_s10 = sld [smem:[#allocation69_spill]]  ;;  %v378_v30 = vstv %s3325_s18  ;;  %v1936_v33 = vadd.f32 %v317_v1, %v314_v9 }
  0xc0   :  { %3324 = sst [smem:[#allocation104_spill]] %s1907_s3  ;;  %s1934_s3 = sld [smem:[#allocation10 + $0x5b]]  ;;  %v1946_v45 = vmul.f32 %v328_v18, %v1766_v6  ;;  %v379_v61 = vmul.f32 %v378_v30, %v1749_v2 }
  0xc1   :  { %3327 = sst [smem:[#allocation74_spill]] %s1913_s19  ;;  %s1932_s19 = sld [smem:[#allocation10 + $0x5a]] }
  0xc2   :  { %3329 = sst [smem:[#allocation105_spill]] %s1915_s22  ;;  %s1941_s5 = sld [smem:[#allocation10 + $0x5c]] }
  0xc3   :  { %3323 = sst [smem:[#allocation62_spill]] %s1905_s16  ;;  %s1924_s16 = sld [smem:[#allocation13 + $0xe]] }
  0xc4   :  { %3334 = sst [smem:[#allocation106_spill]] %s1926_s24  ;;  %s3341_s26 = sld [smem:[#allocation73_spill]] }
  0xc5   :  { %v345_v42 = vstv %s3330_s29  ;;  %s1943_s20 = sld [smem:[#allocation10 + $0x5d]]  ;;  %v359_v50 = vstv %s3335_s10  ;;  %s1953_s13 = sld [smem:[#allocation10 + $0x5f]] }
  0xc6   :  { %3338 = sst [smem:[#allocation69_spill]] %s1934_s3  ;;  %s1951_s3 = sld [smem:[#allocation10 + $0x5e]]  ;;  %v1963_v1 = vadd.f32 %v348_v26, %v345_v42  ;;  %v1973_v30 = vmul.f32 %v359_v50, %v1766_v6  ;;  %v441_v42 = vmul.f32 %v440_v0, %v1749_v2  ;;  %v471_v26 = vstv %s1786_s11 }
  0xc7   :  { %s1961_s7 = sld [smem:[#allocation11 + $0x10]]  ;;  %s1970_s4 = sld [smem:[#allocation10 + $0x61]]  ;;  %v2017_v0 = vadd.f32 %v410_v58, %v407_v49  ;;  %v503_v58 = vmul.f32 %v502_v41, %v1749_v2  ;;  %v533_v49 = vstv %s1859_s21 }
  0xc8   :  { %3340 = sst [smem:[#allocation107_spill]] %s1941_s5  ;;  %s1968_s10 = sld [smem:[#allocation10 + $0x60]]  ;;  %v534_v38 = vmul.f32 %v533_v49, %v1749_v2 }
  0xc9   :  { %3332 = sst [smem:[#allocation66_spill]] %s1924_s16  ;;  %s3342_s16 = sld [smem:[#allocation77_spill]] }
  0xca   :  { %s1959_s5 = sld [smem:[#allocation13 + $0xf]]  ;;  %v376_v9 = vstv %s3341_s26  ;;  %s1978_s28 = sld [smem:[#allocation10 + $0x62]] }
  0xcb   :  { %3346 = sst [smem:[#allocation77_spill]] %s1953_s13  ;;  %s1986_s9 = sld [smem:[#allocation10 + $0x64]]  ;;  %v1990_v50 = vadd.f32 %v379_v61, %v376_v9  ;;  %v472_v61 = vmul.f32 %v471_v26, %v1749_v2  ;;  %v2046_v26 = vmul.f32 %v452_v54, %v1766_v6  ;;  %v607_v63 = vstv %s1943_s20 }
  0xcc   :  { %3344 = sst [smem:[#allocation73_spill]] %s1951_s3  ;;  %s3359_s24 = sld [smem:[#allocation86_spill]] }
  0xcd   :  { %3350 = sst [smem:[#allocation109_spill]] %s1970_s4  ;;  %s1988_s18 = sld [smem:[#allocation10 + $0x65]]  ;;  %v2063_v54 = vadd.f32 %v472_v61, %v469_v62  ;;  %v565_v61 = vmul.f32 %v564_v46, %v1749_v2  ;;  %v595_v62 = vstv %s1932_s19 }
  0xce   :  { %s1997_s2 = sld [smem:[#allocation13 + $0x10]]  ;;  %s1999_s0 = sld [smem:[#allocation11 + $0x11]]  ;;  %v626_v5 = vstv %s1968_s10 }
  0xcf   :  { %v390_v18 = vstv %s3342_s16  ;;  %s2013_s27 = sld [smem:[#allocation10 + $0x68]]  ;;  %s2015_s25 = sld [smem:[#allocation10 + $0x69]] }
  0xd0   :  { %3349 = sst [smem:[#allocation108_spill]] %s1959_s5  ;;  %s1980_s5 = sld [smem:[#allocation10 + $0x63]]  ;;  %v1993_v21 = vmul.f32 %v390_v18, %v1766_v6 }
  0xd1   :  { %3353 = sst [smem:[#allocation110_spill]] %s1978_s28  ;;  %s2007_s28 = sld [smem:[#allocation10 + $0x67]] }
  0xd2   :  { %3356 = sst [smem:[#allocation111_spill]] %s1986_s9  ;;  %s2005_s9 = sld [smem:[#allocation10 + $0x66]]  ;;  %v438_v8 = vstv %s3359_s24 }
  0xd3   :  { %3358 = sst [smem:[#allocation112_spill]] %s1988_s18  ;;  %s2024_s11 = sld [smem:[#allocation10 + $0x6a]]  ;;  %v2036_v53 = vadd.f32 %v441_v42, %v438_v8 }
  0xd4   :  { %3360 = sst [smem:[#allocation86_spill]] %s1997_s2  ;;  %s2026_s22 = sld [smem:[#allocation10 + $0x6b]] }
  0xd5   :  { %3366 = sst [smem:[#allocation114_spill]] %s2013_s27  ;;  %s3369_s24 = sld [smem:[#allocation94_spill]]  ;;  %v669_v40 = vstv %s2015_s25 }
  0xd6   :  { %s2032_s26 = sld [smem:[#allocation13 + $0x11]]  ;;  %s2034_s27 = sld [smem:[#allocation11 + $0x12]]  ;;  %v638_v56 = vstv %s1980_s5 }
  0xd7   :  { %3364 = sst [smem:[#allocation113_spill]] %s2007_s28  ;;  %s2041_s1 = sld [smem:[#allocation10 + $0x6c]] }
  0xd8   :  { %s3375_s29 = sld [smem:[#allocation97_spill]]  ;;  %s2053_s6 = sld [smem:[#allocation10 + $0x6f]] }
  0xd9   :  { %3367 = sst [smem:[#allocation115_spill]] %s2024_s11  ;;  %s2043_s18 = sld [smem:[#allocation10 + $0x6d]] }
  0xda   :  { %3368 = sst [smem:[#allocation116_spill]] %s2026_s22  ;;  %s3377_s22 = sld [smem:[#allocation98_spill]] }
  0xdb   :  { %v483_v31 = vstv %s3369_s24  ;;  %s2061_s14 = sld [smem:[#allocation10 + $0x71]]  ;;  %s2068_s24 = sld [smem:[#allocation13 + $0x12]] }
  0xdc   :  { %3372 = sst [smem:[#allocation94_spill]] %s2032_s26  ;;  %s2051_s26 = sld [smem:[#allocation10 + $0x6e]]  ;;  %v2073_v41 = vmul.f32 %v483_v31, %v1766_v6 }
  0xdd   :  { %3373 = sst [smem:[#allocation117_spill]] %s2034_s27  ;;  %s3387_s17 = sld [smem:[#allocation99_spill]]  ;;  %v688_v52 = vstv %s2041_s1 }
  0xde   :  { %v500_v18 = vstv %s3375_s29  ;;  %s2070_s4 = sld [smem:[#allocation11 + $0x13]]  ;;  %s3389_s16 = sld [smem:[#allocation50_spill]]  ;;  %v700_v29 = vstv %s2053_s6 }
  0xdf   :  { %3376 = sst [smem:[#allocation97_spill]] %s2043_s18  ;;  %s2059_s18 = sld [smem:[#allocation10 + $0x70]]  ;;  %v2090_v31 = vadd.f32 %v503_v58, %v500_v18  ;;  %v624_v58 = vstv %s1961_s7  ;;  %v2220_v18 = vmul.f32 %v669_v40, %v1766_v6 }
  0xe0   :  { %v514_v20 = vstv %s3377_s22  ;;  %s2086_s23 = sld [smem:[#allocation10 + $0x74]]  ;;  %s2088_s12 = sld [smem:[#allocation10 + $0x75]] }
  0xe1   :  { %3385 = sst [smem:[#allocation119_spill]] %s2061_s14  ;;  %s2078_s14 = sld [smem:[#allocation10 + $0x72]]  ;;  %v2093_v8 = vmul.f32 %v514_v20, %v1766_v6  ;;  %v596_v20 = vmul.f32 %v595_v62, %v1749_v2  ;;  %3447 = vst [vmem:[#allocation142_spill] sm:$0xff] %v2220_v18 }
  0xe2   :  { %3379 = sst [smem:[#allocation98_spill]] %s2051_s26  ;;  %s2080_s26 = sld [smem:[#allocation10 + $0x73]] }
  0xe3   :  { %3386 = sst [smem:[#allocation120_spill]] %s2068_s24  ;;  %s3398_s27 = sld [smem:[#allocation103_spill]]  ;;  %v531_v42 = vstv %s3387_s17 }
  0xe4   :  { %3388 = sst [smem:[#allocation99_spill]] %s2070_s4  ;;  %v545_v34 = vstv %s3389_s16  ;;  %s2097_s15 = sld [smem:[#allocation10 + $0x76]]  ;;  %v2117_v46 = vadd.f32 %v534_v38, %v531_v42  ;;  %v627_v42 = vmul.f32 %v626_v5, %v1749_v2  ;;  %v657_v38 = vstv %s2005_s9 }
  0xe5   :  { %3383 = sst [smem:[#allocation118_spill]] %s2059_s18  ;;  %s2099_s8 = sld [smem:[#allocation10 + $0x77]]  ;;  %v2120_v9 = vmul.f32 %v545_v34, %v1766_v6  ;;  %v2173_v5 = vmul.f32 %v607_v63, %v1766_v6  ;;  %v658_v44 = vmul.f32 %v657_v38, %v1749_v2 }
  0xe6   :  { %3395 = sst [smem:[#allocation121_spill]] %s2086_s23  ;;  %s3402_s30 = sld [smem:[#allocation104_spill]]  ;;  %v2190_v63 = vadd.f32 %v627_v42, %v624_v58 }
  0xe7   :  { %3397 = sst [smem:[#allocation122_spill]] %s2088_s12  ;;  %s2105_s12 = sld [smem:[#allocation13 + $0x13]]  ;;  %3427 = vst [vmem:[#allocation133_spill] sm:$0xff] %v2173_v5 }
  0xe8   :  { %3392 = sst [smem:[#allocation50_spill]] %s2080_s26  ;;  %s2107_s4 = sld [smem:[#allocation11 + $0x14]] }
  0xe9   :  { %v562_v22 = vstv %s3398_s27  ;;  %s2113_s16 = sld [smem:[#allocation10 + $0x78]]  ;;  %s2115_s21 = sld [smem:[#allocation10 + $0x79]] }
  0xea   :  { %3399 = sst [smem:[#allocation103_spill]] %s2097_s15  ;;  %s3410_s18 = sld [smem:[#allocation106_spill]]  ;;  %v2136_v34 = vadd.f32 %v565_v61, %v562_v22  ;;  %v2193_v22 = vmul.f32 %v638_v56, %v1766_v6  ;;  %v655_v61 = vstv %s1999_s0 }
  0xeb   :  { %3401 = sst [smem:[#allocation123_spill]] %s2099_s8  ;;  %s2126_s24 = sld [smem:[#allocation10 + $0x7b]] }
  0xec   :  { %v576_v17 = vstv %s3402_s30  ;;  %s2141_s30 = sld [smem:[#allocation13 + $0x14]]  ;;  %s2143_s23 = sld [smem:[#allocation11 + $0x15]]  ;;  %3434 = vst [vmem:[#allocation136_spill] sm:$0xff] %v2193_v22 }
  0xed   :  { %3405 = sst [smem:[#allocation104_spill]] %s2105_s12  ;;  %s2124_s12 = sld [smem:[#allocation10 + $0x7a]]  ;;  %v2146_v62 = vmul.f32 %v576_v17, %v1766_v6 }
  0xee   :  { %3406 = sst [smem:[#allocation124_spill]] %s2107_s4  ;;  %s2134_s4 = sld [smem:[#allocation10 + $0x7d]] }
  0xef   :  { %3409 = sst [smem:[#allocation125_spill]] %s2115_s21  ;;  %s2132_s21 = sld [smem:[#allocation10 + $0x7c]]  ;;  %v750_v24 = vstv %s2113_s16 }
  0xf0   :  { %v593_v49 = vstv %s3410_s18  ;;  %s2151_s10 = sld [smem:[#allocation10 + $0x7e]]  ;;  %s2153_s17 = sld [smem:[#allocation10 + $0x7f]] }
  0xf1   :  { %s2159_s26 = sld [smem:[#allocation10 + $0x80]]  ;;  %s2161_s19 = sld [smem:[#allocation10 + $0x81]]  ;;  %v2163_v17 = vadd.f32 %v596_v20, %v593_v49  ;;  %v689_v20 = vmul.f32 %v688_v52, %v1749_v2  ;;  %v719_v49 = vstv %s2078_s14  ;;  %v2217_v52 = vadd.f32 %v658_v44, %v655_v61 }
  0xf2   :  { %3418 = sst [smem:[#allocation128_spill]] %s2141_s30  ;;  %s2168_s20 = sld [smem:[#allocation10 + $0x82]]  ;;  %v720_v56 = vmul.f32 %v719_v49, %v1749_v2  ;;  %v2246_v49 = vmul.f32 %v700_v29, %v1766_v6  ;;  %v751_v61 = vmul.f32 %v750_v24, %v1749_v2  ;;  %v762_v12 = vstv %s2126_s24 }
  0xf3   :  { %3412 = sst [smem:[#allocation106_spill]] %s2124_s12  ;;  %s2170_s29 = sld [smem:[#allocation10 + $0x83]]  ;;  %3446 = vst [vmem:[#allocation141_spill] sm:$0xff] %v2217_v52 }
  0xf4   :  { %3417 = sst [smem:[#allocation127_spill]] %s2134_s4  ;;  %s2178_s22 = sld [smem:[#allocation13 + $0x15]]  ;;  %3459 = vst [vmem:[#allocation145_spill] sm:$0xff] %v2246_v49 }
  0xf5   :  { %3416 = sst [smem:[#allocation126_spill]] %s2132_s21  ;;  %s2180_s27 = sld [smem:[#allocation11 + $0x16]] }
  0xf6   :  { %3420 = sst [smem:[#allocation129_spill]] %s2153_s17  ;;  %s2186_s7 = sld [smem:[#allocation10 + $0x84]]  ;;  %v781_v44 = vstv %s2151_s10 }
  0xf7   :  { %3423 = sst [smem:[#allocation130_spill]] %s2159_s26  ;;  %s2188_s13 = sld [smem:[#allocation10 + $0x85]]  ;;  %v782_v4 = vmul.f32 %v781_v44, %v1749_v2  ;;  %v793_v57 = vstv %s2161_s19 }
  0xf8   :  { %3425 = sst [smem:[#allocation131_spill]] %s2168_s20  ;;  %s3433_s11 = sld [smem:[#allocation117_spill]]  ;;  %v2320_v58 = vmul.f32 %v793_v57, %v1766_v6 }
  0xf9   :  { %3426 = sst [smem:[#allocation132_spill]] %s2170_s29  ;;  %s2197_s1 = sld [smem:[#allocation10 + $0x86]] }
  0xfa   :  { %3429 = sst [smem:[#allocation134_spill]] %s2178_s22  ;;  %s2199_s8 = sld [smem:[#allocation10 + $0x87]]  ;;  %3482 = vst [vmem:[#allocation156_spill] sm:$0xff] %v2320_v58 }
  0xfb   :  { %s2205_s22 = sld [smem:[#allocation10 + $0x88]]  ;;  %s2207_s29 = sld [smem:[#allocation10 + $0x89]]  ;;  %v810_v55 = vstv %s2180_s27 }
  0xfc   :  { %s2213_s25 = sld [smem:[#allocation13 + $0x16]]  ;;  %s2215_s9 = sld [smem:[#allocation11 + $0x17]]  ;;  %v812_v7 = vstv %s2186_s7 }
  0xfd   :  { %3432 = sst [smem:[#allocation135_spill]] %s2188_s13  ;;  %s3445_s2 = sld [smem:[#allocation99_spill]] }
  0xfe   :  { %v686_v36 = vstv %s3433_s11  ;;  %s2226_s3 = sld [smem:[#allocation10 + $0x8b]]  ;;  %s3451_s11 = sld [smem:[#allocation122_spill]] }
  0xff   :  { %3435 = sst [smem:[#allocation117_spill]] %s2197_s1  ;;  %v2236_v40 = vadd.f32 %v689_v20, %v686_v36  ;;  %s2241_s6 = sld [smem:[#allocation10 + $0x8e]]  ;;  %v2293_v36 = vmul.f32 %v762_v12, %v1766_v6  ;;  %v779_v20 = vstv %s2143_s23 }
 0x100   :  { %s3457_s18 = sld [smem:[#allocation124_spill]]  ;;  %s2243_s30 = sld [smem:[#allocation10 + $0x8f]]  ;;  %v824_v48 = vstv %s2199_s8 }
 0x101   :  { %3439 = sst [smem:[#allocation137_spill]] %s2205_s22  ;;  %s2234_s22 = sld [smem:[#allocation10 + $0x8d]]  ;;  %3455 = vst [vmem:[#allocation143_spill] sm:$0xff] %v2236_v40  ;;  %3471 = vst [vmem:[#allocation153_spill] sm:$0xff] %v2293_v36 }
 0x102   :  { %3440 = sst [smem:[#allocation138_spill]] %s2207_s29  ;;  %s2224_s29 = sld [smem:[#allocation10 + $0x8a]] }
 0x103   :  { %3442 = sst [smem:[#allocation139_spill]] %s2213_s25  ;;  %v717_v38 = vstv %s3445_s2  ;;  %s2251_s13 = sld [smem:[#allocation13 + $0x17]] }
 0x104   :  { %3444 = sst [smem:[#allocation140_spill]] %s2215_s9  ;;  %s2232_s9 = sld [smem:[#allocation10 + $0x8c]]  ;;  %v731_v16 = vstv %s3451_s11  ;;  %v2263_v29 = vadd.f32 %v720_v56, %v717_v38  ;;  %v813_v56 = vmul.f32 %v812_v7, %v1749_v2  ;;  %v2317_v7 = vadd.f32 %v782_v4, %v779_v20 }
 0x105   :  { %3450 = sst [smem:[#allocation99_spill]] %s2226_s3  ;;  %s2253_s0 = sld [smem:[#allocation11 + $0x18]]  ;;  %v2273_v24 = vmul.f32 %v731_v16, %v1766_v6 }
 0x106   :  { %3456 = sst [smem:[#allocation144_spill]] %s2241_s6  ;;  %s2259_s1 = sld [smem:[#allocation10 + $0x90]]  ;;  %3464 = vst [vmem:[#allocation147_spill] sm:$0xff] %v2263_v29  ;;  %v748_v42 = vstv %s3457_s18  ;;  %3481 = vst [vmem:[#allocation155_spill] sm:$0xff] %v2317_v7  ;;  %v2336_v57 = vadd.f32 %v813_v56, %v810_v55 }
 0x107   :  { %3458 = sst [smem:[#allocation124_spill]] %s2243_s30  ;;  %s2261_s14 = sld [smem:[#allocation10 + $0x91]]  ;;  %3466 = vst [vmem:[#allocation149_spill] sm:$0xff] %v2273_v24  ;;  %v2290_v16 = vadd.f32 %v751_v61, %v748_v42  ;;  %v855_v37 = vstv %s2234_s22 }
 0x108   :  { %s2268_s11 = sld [smem:[#allocation10 + $0x92]]  ;;  %s2270_s5 = sld [smem:[#allocation10 + $0x93]]  ;;  %v843_v38 = vstv %s2224_s29  ;;  %3487 = vst [vmem:[#allocation157_spill] sm:$0xff] %v2336_v57 }
 0x109   :  { %3461 = sst [smem:[#allocation146_spill]] %s2251_s13  ;;  %s2278_s25 = sld [smem:[#allocation10 + $0x94]]  ;;  %3470 = vst [vmem:[#allocation152_spill] sm:$0xff] %v2290_v16  ;;  %v844_v12 = vmul.f32 %v843_v38, %v1749_v2  ;;  %v2346_v38 = vmul.f32 %v824_v48, %v1766_v6 }
 0x10a   :  { %3454 = sst [smem:[#allocation122_spill]] %s2232_s9  ;;  %s2280_s28 = sld [smem:[#allocation10 + $0x95]] }
 0x10b   :  { %s2286_s24 = sld [smem:[#allocation13 + $0x18]]  ;;  %s2288_s18 = sld [smem:[#allocation10 + $0x96]]  ;;  %3488 = vst [vmem:[#allocation158_spill] sm:$0xff] %v2346_v38  ;;  %v872_v61 = vstv %s2253_s0 }
 0x10c   :  { %s2297_s7 = sld [smem:[#allocation11 + $0x19]]  ;;  %s2299_s21 = sld [smem:[#allocation10 + $0x97]]  ;;  %v874_v43 = vstv %s2259_s1 }
 0x10d   :  { %s3475_s12 = sld [smem:[#allocation135_spill]]  ;;  %s2305_s2 = sld [smem:[#allocation10 + $0x98]]  ;;  %v875_v20 = vmul.f32 %v874_v43, %v1749_v2  ;;  %v2373_v43 = vmul.f32 %v855_v37, %v1766_v6 }
 0x10e   :  { %3465 = sst [smem:[#allocation148_spill]] %s2268_s11  ;;  %s2313_s19 = sld [smem:[#allocation10 + $0x9a]]  ;;  %v886_v32 = vstv %s2270_s5 }
 0x10f   :  { %3468 = sst [smem:[#allocation150_spill]] %s2278_s25  ;;  %s2307_s15 = sld [smem:[#allocation10 + $0x99]]  ;;  %3492 = vst [vmem:[#allocation161_spill] sm:$0xff] %v2373_v43  ;;  %v2390_v37 = vadd.f32 %v875_v20, %v872_v61  ;;  %v2393_v55 = vmul.f32 %v886_v32, %v1766_v6  ;;  %v91_v32 = vpop.permute.xlu0 %90  ;;  %v108_v61 = vpop.permute.xlu1 %107 }
 0x110   :  { %s3477_s23 = sld [smem:[#allocation117_spill]]  ;;  %s2315_s4 = sld [smem:[#allocation10 + $0x9b]]  ;;  %94 = vst.msk [vmem:[#allocation2 + $0x8] sm:$0xff] %vm86_vm0, %v91_v32  ;;  %111 = vst.msk [vmem:[#allocation2 + $0x20] sm:$0xff] %vm86_vm0, %v108_v61 }
 0x111   :  { %3469 = sst [smem:[#allocation151_spill]] %s2286_s24  ;;  %s3480_s10 = sld [smem:[#allocation140_spill]]  ;;  %v905_v4 = vstv %s2288_s18  ;;  %3497 = vst [vmem:[#allocation163_spill] sm:$0xff] %v2390_v37  ;;  %3498 = vst [vmem:[#allocation164_spill] sm:$0xff] %v2393_v55 }
 0x112   :  { %3473 = sst [smem:[#allocation154_spill]] %s2299_s21  ;;  %s3478_s21 = sld [smem:[#allocation137_spill]]  ;;  %v906_v23 = vmul.f32 %v905_v4, %v1749_v2  ;;  %v903_v56 = vstv %s2297_s7 }
 0x113   :  { %3476 = sst [smem:[#allocation135_spill]] %s2305_s2  ;;  %s2324_s2 = sld [smem:[#allocation13 + $0x19]]  ;;  %v98_v11 = vpop.permute.xlu0 %97 }
 0x114   :  { %s2326_s20 = sld [smem:[#allocation10 + $0x9c]]  ;;  %s2332_s17 = sld [smem:[#allocation11 + $0x1a]]  ;;  %101 = vst.msk [vmem:[#allocation2 + $0x10] sm:$0xff] %vm86_vm0, %v98_v11 }
 0x115   :  { %s2341_s8 = sld [smem:[#allocation10 + $0x9e]]  ;;  %s2343_s16 = sld [smem:[#allocation10 + $0x9f]]  ;;  %v917_v13 = vstv %s2307_s15 }
 0x116   :  { %3479 = sst [smem:[#allocation117_spill]] %s2315_s4  ;;  %s2334_s4 = sld [smem:[#allocation10 + $0x9d]]  ;;  %v2422_v42 = vmul.f32 %v917_v13, %v1766_v6 }
 0x117   :  { %v841_v44 = vstv %s3480_s10  ;;  %s2351_s1 = sld [smem:[#allocation10 + $0xa0]]  ;;  %s2353_s9 = sld [smem:[#allocation10 + $0xa1]] }
 0x118   :  { %s2359_s10 = sld [smem:[#allocation13 + $0x1a]]  ;;  %v2363_v48 = vadd.f32 %v844_v12, %v841_v44  ;;  %s2368_s22 = sld [smem:[#allocation11 + $0x1b]]  ;;  %3503 = vst [vmem:[#allocation166_spill] sm:$0xff] %v2422_v42  ;;  %v115_v42 = vpop.permute.xlu1 %114 }
 0x119   :  { %3484 = sst [smem:[#allocation137_spill]] %s2324_s2  ;;  %s2361_s29 = sld [smem:[#allocation10 + $0xa2]]  ;;  %118 = vst.msk [vmem:[#allocation2 + $0x28] sm:$0xff] %vm86_vm0, %v115_v42 }
 0x11a   :  { %3491 = vst [vmem:[#allocation160_spill] sm:$0xff] %v2363_v48  ;;  %s2370_s26 = sld [smem:[#allocation10 + $0xa3]]  ;;  %v936_v25 = vstv %s2326_s20  ;;  %s2378_s18 = sld [smem:[#allocation10 + $0xa4]]  ;;  %v934_v55 = vstv %s2332_s17 }
 0x11b   :  { %s3494_s27 = sld [smem:[#allocation154_spill]]  ;;  %s2380_s6 = sld [smem:[#allocation10 + $0xa5]]  ;;  %v937_v44 = vmul.f32 %v936_v25, %v1749_v2  ;;  %v2419_v25 = vadd.f32 %v906_v23, %v903_v56  ;;  %v948_v4 = vstv %s2343_s16  ;;  %v2505_v48 = vld [vmem:[#allocation2 + $0x10] sm:$0xff] }
 0x11c   :  { %s2386_s5 = sld [smem:[#allocation10 + $0xa6]]  ;;  %s3495_s0 = sld [smem:[#allocation135_spill]]  ;;  %v2440_v20 = vmul.f32 %v948_v4, %v1766_v6 }
 0x11d   :  { %3489 = sst [smem:[#allocation140_spill]] %s2353_s9  ;;  %s2388_s3 = sld [smem:[#allocation10 + $0xa7]]  ;;  %3502 = vst [vmem:[#allocation165_spill] sm:$0xff] %v2419_v25  ;;  %v2434_v23 = vadd.f32 %v937_v44, %v934_v55  ;;  %v2462_v25 = vld [vmem:[#allocation2 + $0x8] sm:$0xff] }
 0x11e   :  { %3490 = sst [smem:[#allocation159_spill]] %s2359_s10  ;;  %s2397_s20 = sld [smem:[#allocation11 + $0x1c]]  ;;  %v965_v56 = vstv %s2368_s22  ;;  %3507 = vst [vmem:[#allocation170_spill] sm:$0xff] %v2440_v20 }
 0x11f   :  { %s2399_s13 = sld [smem:[#allocation10 + $0xa8]]  ;;  %s3499_s25 = sld [smem:[#allocation117_spill]]  ;;  %v967_v43 = vstv %s2361_s29  ;;  %3506 = vst [vmem:[#allocation169_spill] sm:$0xff] %v2434_v23 }
 0x120   :  { %3493 = sst [smem:[#allocation162_spill]] %s2378_s18  ;;  %s2405_s30 = sld [smem:[#allocation10 + $0xa9]]  ;;  %v968_v32 = vmul.f32 %v967_v43, %v1749_v2 }
 0x121   :  { %s2407_s11 = sld [smem:[#allocation10 + $0xaa]]  ;;  %s2413_s15 = sld [smem:[#allocation10 + $0xab]]  ;;  %v979_v61 = vstv %s2380_s6 }
 0x122   :  { %s2415_s7 = sld [smem:[#allocation10 + $0xac]]  ;;  %s2426_s17 = sld [smem:[#allocation10 + $0xad]]  ;;  %v2451_v4 = vadd.f32 %v968_v32, %v965_v56  ;;  %v2454_v37 = vmul.f32 %v979_v61, %v1766_v6 }
 0x123   :  { %3496 = sst [smem:[#allocation154_spill]] %s2388_s3  ;;  %s2432_s29 = sld [smem:[#allocation11 + $0x1d]] }
 0x124   :  { %v996_v13 = vstv %s2397_s20  ;;  %s3508_s6 = sld [smem:[#allocation20_spill]]  ;;  %s3509_s16 = sld [smem:[#allocation22_spill]]  ;;  %3510 = vst [vmem:[#allocation171_spill] sm:$0xff] %v2451_v4  ;;  %3512 = vst [vmem:[#allocation172_spill] sm:$0xff] %v2454_v37 }
 0x125   :  { %v998_v12 = vstv %s2399_s13  ;;  %s3511_s22 = sld [smem:[#allocation25_spill]]  ;;  %s3513_s13 = sld [smem:[#allocation27_spill]] }
 0x126   :  { %v999_v23 = vmul.f32 %v998_v12, %v1749_v2  ;;  %s3514_s10 = sld [smem:[#allocation30_spill]]  ;;  %s3515_s2 = sld [smem:[#allocation32_spill]]  ;;  %v2464_v2 = vld [vmem:[#allocation2 + $0x20] sm:$0xff] }
 0x127   :  { %3500 = sst [smem:[#allocation135_spill]] %s2407_s11  ;;  %v1010_v11 = vstv %s2413_s15  ;;  %s3516_s24 = sld [smem:[#allocation36_spill]] }
 0x128   :  { %3501 = sst [smem:[#allocation117_spill]] %s2415_s7  ;;  %s3517_s9 = sld [smem:[#allocation39_spill]]  ;;  %v2466_v12 = vadd.f32 %v999_v23, %v996_v13  ;;  %v2469_v32 = vmul.f32 %v1010_v11, %v1766_v6 }
 0x129   :  { %3504 = sst [smem:[#allocation167_spill]] %s2426_s17  ;;  %s3518_s20 = sld [smem:[#allocation44_spill]] }
 0x12a   :  { %3505 = sst [smem:[#allocation168_spill]] %s2432_s29  ;;  %s3519_s18 = sld [smem:[#allocation47_spill]]  ;;  %3520 = vst [vmem:[#allocation173_spill] sm:$0xff] %v2466_v12  ;;  %3521 = vst [vmem:[#allocation174_spill] sm:$0xff] %v2469_v32  ;;  %v3522_v42 = vstv %s3508_s6  ;;  %v3523_v44 = vstv %s3509_s16 }
 0x12b   :  { %v131_v43 = vmul.f32 %v3522_v42, %v2462_v25  ;;  %s3524_s15 = sld [smem:[#allocation52_spill]]  ;;  %v146_v20 = vmul.f32 %v3523_v44, %v2464_v2  ;;  %v3525_v55 = vstv %s3511_s22  ;;  %s3526_s7 = sld [smem:[#allocation55_spill]]  ;;  %v3527_v4 = vstv %s3513_s13 }
 0x12c   :  { %v166_v37 = vmul.f32 %v3525_v55, %v2462_v25  ;;  %s3528_s3 = sld [smem:[#allocation21_spill]]  ;;  %v178_v23 = vmul.f32 %v3527_v4, %v2464_v2  ;;  %v3529_v6 = vstv %s3514_s10  ;;  %s3530_s11 = sld [smem:[#allocation23_spill]]  ;;  %v3531_v11 = vstv %s3515_s2 }
 0x12d   :  { %v197_v13 = vmul.f32 %v3529_v6, %v2462_v25  ;;  %s3532_s6 = sld [smem:[#allocation26_spill]]  ;;  %v209_v42 = vmul.f32 %v3531_v11, %v2464_v2  ;;  %v3533_v61 = vstv %s3516_s24  ;;  %s3534_s16 = sld [smem:[#allocation28_spill]]  ;;  %v132_v32 = vadd.f32 %v131_v43, %v1800_v19 }
 0x12e   :  { %v228_v44 = vmul.f32 %v3533_v61, %v2462_v25  ;;  %v3535_v56 = vstv %s3517_s9  ;;  %s3536_s22 = sld [smem:[#allocation31_spill]]  ;;  %s3537_s13 = sld [smem:[#allocation33_spill]]  ;;  %v167_v4 = vadd.f32 %v166_v37, %v1817_v27  ;;  %v2507_v61 = vld [vmem:[#allocation2 + $0x28] sm:$0xff] }
 0x12f   :  { %v240_v55 = vmul.f32 %v3535_v56, %v2464_v2  ;;  %s3538_s29 = sld [smem:[#allocation37_spill]]  ;;  %v3539_v6 = vstv %s3518_s20  ;;  %s3540_s10 = sld [smem:[#allocation40_spill]]  ;;  %v198_v56 = vadd.f32 %v197_v13, %v1836_v35 }
 0x130   :  { %v259_v12 = vmul.f32 %v3539_v6, %v2462_v25  ;;  %v3541_v11 = vstv %s3519_s18  ;;  %s3542_s9 = sld [smem:[#allocation45_spill]]  ;;  %v229_v58 = vadd.f32 %v228_v44, %v1863_v47  ;;  %s3545_s2 = sld [smem:[#allocation48_spill]] }
 0x131   :  { %v271_v38 = vmul.f32 %v3541_v11, %v2464_v2  ;;  %v3543_v19 = vstv %s3524_s15  ;;  %v3544_v27 = vstv %s3526_s7  ;;  %s3551_s24 = sld [smem:[#allocation53_spill]]  ;;  %s2554_s7 = sld [smem:[#allocation10 + $0xae]] }
 0x132   :  { %v290_v43 = vmul.f32 %v3543_v19, %v2462_v25  ;;  %v302_v37 = vmul.f32 %v3544_v27, %v2464_v2  ;;  %v3546_v6 = vstv %s3528_s3  ;;  %v3547_v11 = vstv %s3530_s11  ;;  %s3555_s3 = sld [smem:[#allocation56_spill]]  ;;  %s3556_s11 = sld [smem:[#allocation60_spill]] }
 0x133   :  { %v136_v57 = vmul.f32 %v3546_v6, %v2505_v48  ;;  %v151_v36 = vmul.f32 %v3547_v11, %v2507_v61  ;;  %v3548_v7 = vstv %s3532_s6  ;;  %v3549_v35 = vstv %s3534_s16  ;;  %s3559_s18 = sld [smem:[#allocation61_spill]]  ;;  %s3566_s20 = sld [smem:[#allocation64_spill]] }
 0x134   :  { %v170_v16 = vmul.f32 %v3548_v7, %v2505_v48  ;;  %v182_v13 = vmul.f32 %v3549_v35, %v2507_v61  ;;  %v3550_v47 = vstv %s3536_s22  ;;  %v3552_v19 = vstv %s3537_s13  ;;  %s3567_s15 = sld [smem:[#allocation24_spill]]  ;;  %s3568_s6 = sld [smem:[#allocation29_spill]] }
 0x135   :  { %v201_v44 = vmul.f32 %v3550_v47, %v2505_v48  ;;  %v213_v24 = vmul.f32 %v3552_v19, %v2507_v61  ;;  %v3553_v27 = vstv %s3538_s29  ;;  %v3554_v6 = vstv %s3540_s10  ;;  %s3564_s29 = sld [smem:[#allocation63_spill]]  ;;  %s3569_s16 = sld [smem:[#allocation34_spill]] }
 0x136   :  { %v232_v49 = vmul.f32 %v3553_v27, %v2505_v48  ;;  %v244_v29 = vmul.f32 %v3554_v6, %v2507_v61  ;;  %v137_v11 = vadd.f32 %v136_v57, %v132_v32  ;;  %v171_v7 = vadd.f32 %v170_v16, %v167_v4  ;;  %s3571_s22 = sld [smem:[#allocation67_spill]]  ;;  %s3572_s13 = sld [smem:[#allocation41_spill]] }
 0x137   :  { %v260_v18 = vadd.f32 %v259_v12, %v1890_v59  ;;  %v3557_v35 = vstv %s3542_s9  ;;  %v202_v22 = vadd.f32 %v201_v44, %v198_v56  ;;  %v3558_v52 = vstv %s3545_s2  ;;  %3561 = sst [smem:[#allocation20_spill]] %s2554_s7  ;;  %s3574_s9 = sld [smem:[#allocation49_spill]] }
 0x138   :  { %v263_v40 = vmul.f32 %v3557_v35, %v2505_v48  ;;  %v233_v47 = vadd.f32 %v232_v49, %v229_v58  ;;  %v275_v19 = vmul.f32 %v3558_v52, %v2507_v61  ;;  %v291_v5 = vadd.f32 %v290_v43, %v1917_v10  ;;  %s3573_s10 = sld [smem:[#allocation68_spill]]  ;;  %s3577_s2 = sld [smem:[#allocation70_spill]] }
 0x139   :  { %v142_v27 = vadd.f32 %v1791_v15, %v137_v11  ;;  %v175_v6 = vadd.f32 %v1820_v28, %v171_v7  ;;  %v3560_v16 = vstv %s3551_s24  ;;  %v206_v59 = vadd.f32 %v1846_v39, %v202_v22  ;;  %s3578_s24 = sld [smem:[#allocation71_spill]]  ;;  %s3587_s17 = sld [smem:[#allocation78_spill]] }
 0x13a   :  { %v264_v57 = vadd.f32 %v263_v40, %v260_v18  ;;  %v294_v32 = vmul.f32 %v3560_v16, %v2505_v48  ;;  %v237_v58 = vadd.f32 %v1873_v51, %v233_v47  ;;  %v3562_v49 = vstv %s3555_s3  ;;  %s3579_s3 = sld [smem:[#allocation75_spill]] }
 0x13b   :  { %v306_v52 = vmul.f32 %v3562_v49, %v2507_v61  ;;  %v3563_v10 = vstv %s3556_s11  ;;  %v147_v15 = vadd.f32 %v146_v20, %v142_v27  ;;  %v179_v4 = vadd.f32 %v178_v23, %v175_v6  ;;  %s3581_s11 = sld [smem:[#allocation76_spill]] }
 0x13c   :  { %v321_v12 = vmul.f32 %v3563_v10, %v2462_v25  ;;  %v268_v28 = vadd.f32 %v1893_v60, %v264_v57  ;;  %v295_v18 = vadd.f32 %v294_v32, %v291_v5  ;;  %v210_v40 = vadd.f32 %v209_v42, %v206_v59 }
 0x13d   :  { %v241_v56 = vadd.f32 %v240_v55, %v237_v58  ;;  %v3565_v39 = vstv %s3559_s18  ;;  %v152_v51 = vadd.f32 %v151_v36, %v147_v15  ;;  %v183_v44 = vadd.f32 %v182_v13, %v179_v4  ;;  %s3583_s18 = sld [smem:[#allocation57_spill]] }
 0x13e   :  { %v322_v43 = vadd.f32 %v321_v12, %v1936_v33  ;;  %v325_v22 = vmul.f32 %v3565_v39, %v2505_v48  ;;  %v272_v11 = vadd.f32 %v271_v38, %v268_v28  ;;  %v299_v7 = vadd.f32 %v1920_v14, %v295_v18 }
 0x13f   :  { %v214_v20 = vadd.f32 %v213_v24, %v210_v40  ;;  %v245_v23 = vadd.f32 %v244_v29, %v241_v56  ;;  %v3570_v5 = vstv %s3564_s29  ;;  %v153_v33 = vmax.f32 %v152_v51, 0.0  ;;  %s3596_s29 = sld [smem:[#allocation83_spill]] }
 0x140   :  { %v326_v60 = vadd.f32 %v325_v22, %v322_v43  ;;  %v333_v42 = vmul.f32 %v3570_v5, %v2464_v2  ;;  %v184_v55 = vmax.f32 %v183_v44, 0.0  ;;  %v276_v35 = vadd.f32 %v275_v19, %v272_v11 }
 0x141   :  { %v303_v36 = vadd.f32 %v302_v37, %v299_v7  ;;  %v215_v13 = vmax.f32 %v214_v20, 0.0  ;;  %v246_v38 = vmax.f32 %v245_v23, 0.0  ;;  %v3575_v24 = vstv %s3566_s20  ;;  %s3624_s20 = sld [smem:[#allocation38_spill]] }
 0x142   :  { %v330_v14 = vadd.f32 %v1946_v45, %v326_v60  ;;  %v337_v29 = vmul.f32 %v3575_v24, %v2507_v61  ;;  %v3576_v47 = vstv %s3567_s15  ;;  %v277_v6 = vmax.f32 %v276_v35, 0.0  ;;  %s3585_s15 = sld [smem:[#allocation175_spill]] }
 0x143   :  { %v156_v27 = vmul.f32 %v3576_v47, %v153_v33  ;;  %v307_v57 = vadd.f32 %v306_v52, %v303_v36  ;;  %v1029_v16 = vstv %s2554_s7  ;;  %v3580_v32 = vstv %s3568_s6  ;;  %s3590_s6 = sld [smem:[#allocation81_spill]] }
 0x144   :  { %v187_v37 = vmul.f32 %v3580_v32, %v184_v55  ;;  %v3582_v19 = vstv %s3569_s16  ;;  %v334_v58 = vadd.f32 %v333_v42, %v330_v14  ;;  %v3584_v45 = vstv %s3571_s22  ;;  %s3592_s16 = sld [smem:[#allocation82_spill]]  ;;  %s3593_s7 = sld [smem:[#allocation65_spill]] }
 0x145   :  { %v218_v59 = vmul.f32 %v3582_v19, %v215_v13  ;;  %v352_v49 = vmul.f32 %v3584_v45, %v2462_v25  ;;  %v3588_v15 = vstv %s3572_s13  ;;  %v308_v4 = vmax.f32 %v307_v57, 0.0  ;;  %s3595_s22 = sld [smem:[#allocation79_spill]] }
 0x146   :  { %v249_v52 = vmul.f32 %v3588_v15, %v246_v38  ;;  %v3589_v28 = vstv %s3573_s10  ;;  %v3591_v40 = vstv %s3574_s9  ;;  %v338_v43 = vadd.f32 %v337_v29, %v334_v58  ;;  %s3601_s13 = sld [smem:[#allocation87_spill]]  ;;  %s3602_s10 = sld [smem:[#allocation84_spill]] }
 0x147   :  { %v356_v18 = vmul.f32 %v3589_v28, %v2505_v48  ;;  %v280_v56 = vmul.f32 %v3591_v40, %v277_v6  ;;  %v353_v39 = vadd.f32 %v352_v49, %v1963_v1  ;;  %v3594_v22 = vstv %s3577_s2  ;;  %s3604_s9 = sld [smem:[#allocation88_spill]]  ;;  %s3605_s2 = sld [smem:[#allocation89_spill]] }
 0x148   :  { %v3586_v10 = vstv %s3585_s15  ;;  %v364_v51 = vmul.f32 %v3594_v22, %v2464_v2  ;;  %v3597_v11 = vstv %s3578_s24  ;;  %v3598_v20 = vstv %s3579_s3  ;;  %s3610_s24 = sld [smem:[#allocation90_spill]]  ;;  %s3613_s3 = sld [smem:[#allocation93_spill]] }
 0x149   :  { %v157_v12 = vadd.f32 %v156_v27, %v3586_v10  ;;  %v368_v7 = vmul.f32 %v3597_v11, %v2507_v61  ;;  %v383_v23 = vmul.f32 %v3598_v20, %v2462_v25  ;;  %v3599_v60 = vstv %s3581_s11  ;;  %s3619_s11 = sld [smem:[#allocation35_spill]]  ;;  %s3625_s15 = sld [smem:[#allocation96_spill]] }
 0x14a   :  { %v387_v5 = vmul.f32 %v3599_v60, %v2505_v48  ;;  %v3600_v42 = vstv %s3583_s18  ;;  %v339_v55 = vmax.f32 %v338_v43, 0.0  ;;  %v357_v1 = vadd.f32 %v356_v18, %v353_v39  ;;  %s3621_s18 = sld [smem:[#allocation72_spill]] }
 0x14b   :  { %v188_v44 = vadd.f32 %v187_v37, %v157_v12  ;;  %v311_v33 = vmul.f32 %v3600_v42, %v308_v4  ;;  %v3603_v35 = vstv %s3587_s17  ;;  %v384_v38 = vadd.f32 %v383_v23, %v1990_v50  ;;  %s3612_s17 = sld [smem:[#allocation92_spill]] }
 0x14c   :  { %v395_v36 = vmul.f32 %v3603_v35, %v2464_v2  ;;  %v3606_v14 = vstv %s3590_s6  ;;  %v3607_v29 = vstv %s3592_s16  ;;  %v3608_v27 = vstv %s3593_s7  ;;  %s3618_s7 = sld [smem:[#allocation95_spill]]  ;;  %s3628_s6 = sld [smem:[#allocation51_spill]] }
 0x14d   :  { %v219_v13 = vadd.f32 %v218_v59, %v188_v44  ;;  %v414_v24 = vmul.f32 %v3606_v14, %v2462_v25  ;;  %v418_v47 = vmul.f32 %v3607_v29, %v2505_v48  ;;  %v342_v6 = vmul.f32 %v3608_v27, %v339_v55  ;;  %s3629_s16 = sld [smem:[#allocation80_spill]] }
 0x14e   :  { %v361_v57 = vadd.f32 %v1973_v30, %v357_v1  ;;  %v3609_v32 = vstv %s3595_s22  ;;  %v3611_v19 = vstv %s3596_s29  ;;  %v388_v58 = vadd.f32 %v387_v5, %v384_v38  ;;  %s3631_s22 = sld [smem:[#allocation59_spill]]  ;;  %s3633_s29 = sld [smem:[#allocation42_spill]] }
 0x14f   :  { %v399_v37 = vmul.f32 %v3609_v32, %v2507_v61  ;;  %v426_v59 = vmul.f32 %v3611_v19, %v2464_v2  ;;  %v250_v50 = vadd.f32 %v249_v52, %v219_v13  ;;  %v415_v45 = vadd.f32 %v414_v24, %v2017_v0 }
 0x150   :  { %v3614_v49 = vstv %s3601_s13  ;;  %v365_v12 = vadd.f32 %v364_v51, %v361_v57  ;;  %v3615_v15 = vstv %s3602_s10  ;;  %v3616_v4 = vstv %s3604_s9  ;;  %s3634_s13 = sld [smem:[#allocation100_spill]]  ;;  %s3635_s10 = sld [smem:[#allocation85_spill]] }
 0x151   :  { %v445_v10 = vmul.f32 %v3614_v49, %v2462_v25  ;;  %v430_v30 = vmul.f32 %v3615_v15, %v2507_v61  ;;  %v449_v28 = vmul.f32 %v3616_v4, %v2505_v48  ;;  %v3617_v18 = vstv %s3605_s2  ;;  %s3638_s9 = sld [smem:[#allocation54_spill]]  ;;  %s3640_s2 = sld [smem:[#allocation58_spill]] }
 0x152   :  { %v457_v40 = vmul.f32 %v3617_v18, %v2464_v2  ;;  %v281_v43 = vadd.f32 %v280_v56, %v250_v50  ;;  %v392_v52 = vadd.f32 %v1993_v21, %v388_v58  ;;  %v419_v39 = vadd.f32 %v418_v47, %v415_v45 }
 0x153   :  { %v446_v0 = vadd.f32 %v445_v10, %v2036_v53  ;;  %v369_v22 = vadd.f32 %v368_v7, %v365_v12  ;;  %v3620_v51 = vstv %s3610_s24  ;;  %v3622_v11 = vstv %s3612_s17  ;;  %s3641_s24 = sld [smem:[#allocation91_spill]]  ;;  %s3643_s17 = sld [smem:[#allocation62_spill]] }
 0x154   :  { %v461_v44 = vmul.f32 %v3620_v51, %v2507_v61  ;;  %v476_v20 = vmul.f32 %v3622_v11, %v2462_v25  ;;  %v3623_v23 = vstv %s3613_s3  ;;  %v312_v5 = vadd.f32 %v311_v33, %v281_v43  ;;  %s3646_s3 = sld [smem:[#allocation101_spill]] }
 0x155   :  { %v480_v60 = vmul.f32 %v3623_v23, %v2505_v48  ;;  %v396_v42 = vadd.f32 %v395_v36, %v392_v52  ;;  %v423_v56 = vadd.f32 %v2020_v3, %v419_v39  ;;  %v450_v21 = vadd.f32 %v449_v28, %v446_v0 }
 0x156   :  { %v370_v55 = vmax.f32 %v369_v22, 0.0  ;;  %v477_v53 = vadd.f32 %v476_v20, %v2063_v54  ;;  %v3626_v7 = vstv %s3618_s7  ;;  %v3627_v35 = vstv %s3619_s11  ;;  %s3648_s7 = sld [smem:[#allocation74_spill]]  ;;  %s3649_s11 = sld [smem:[#allocation69_spill]] }
 0x157   :  { %v488_v1 = vmul.f32 %v3626_v7, %v2464_v2  ;;  %v507_v13 = vmul.f32 %v3627_v35, %v2462_v25  ;;  %v343_v38 = vadd.f32 %v342_v6, %v312_v5  ;;  %v400_v14 = vadd.f32 %v399_v37, %v396_v42 }
 0x158   :  { %v427_v24 = vadd.f32 %v426_v59, %v423_v56  ;;  %v454_v33 = vadd.f32 %v2046_v26, %v450_v21  ;;  %v3630_v36 = vstv %s3621_s18  ;;  %v481_v29 = vadd.f32 %v480_v60, %v477_v53  ;;  %s3650_s18 = sld [smem:[#allocation43_spill]] }
 0x159   :  { %v373_v3 = vmul.f32 %v3630_v36, %v370_v55  ;;  %v508_v47 = vadd.f32 %v507_v13, %v2090_v31  ;;  %v3632_v54 = vstv %s3624_s20  ;;  %v401_v57 = vmax.f32 %v400_v14, 0.0  ;;  %s3653_s20 = sld [smem:[#allocation107_spill]] }
 0x15a   :  { %v511_v27 = vmul.f32 %v3632_v54, %v2505_v48  ;;  %v431_v32 = vadd.f32 %v430_v30, %v427_v24  ;;  %v458_v6 = vadd.f32 %v457_v40, %v454_v33  ;;  %v3636_v37 = vstv %s3625_s15  ;;  %s3655_s15 = sld [smem:[#allocation105_spill]] }
 0x15b   :  { %v492_v19 = vmul.f32 %v3636_v37, %v2507_v61  ;;  %v374_v59 = vadd.f32 %v373_v3, %v343_v38  ;;  %v485_v26 = vadd.f32 %v2073_v41, %v481_v29  ;;  %v3637_v58 = vstv %s3628_s6  ;;  %s3657_s6 = sld [smem:[#allocation73_spill]] }
 0x15c   :  { %v512_v50 = vadd.f32 %v511_v27, %v508_v47  ;;  %v519_v31 = vmul.f32 %v3637_v58, %v2464_v2  ;;  %v3639_v45 = vstv %s3629_s16  ;;  %v432_v10 = vmax.f32 %v431_v32, 0.0  ;;  %s3659_s16 = sld [smem:[#allocation46_spill]] }
 0x15d   :  { %v404_v49 = vmul.f32 %v3639_v45, %v401_v57  ;;  %v462_v12 = vadd.f32 %v461_v44, %v458_v6  ;;  %v3642_v15 = vstv %s3631_s22  ;;  %v489_v4 = vadd.f32 %v488_v1, %v485_v26  ;;  %s3660_s22 = sld [smem:[#allocation109_spill]] }
 0x15e   :  { %v538_v30 = vmul.f32 %v3642_v15, %v2462_v25  ;;  %v516_v28 = vadd.f32 %v2093_v8, %v512_v50  ;;  %v3644_v41 = vstv %s3633_s29  ;;  %v3645_v40 = vstv %s3634_s13  ;;  %s3663_s29 = sld [smem:[#allocation77_spill]]  ;;  %s3665_s13 = sld [smem:[#allocation110_spill]] }
 0x15f   :  { %v523_v18 = vmul.f32 %v3644_v41, %v2507_v61  ;;  %v542_v43 = vmul.f32 %v3645_v40, %v2505_v48  ;;  %v405_v52 = vadd.f32 %v404_v49, %v374_v59  ;;  %v3647_v39 = vstv %s3635_s10  ;;  %s3667_s10 = sld [smem:[#allocation111_spill]] }
 0x160   :  { %v435_v0 = vmul.f32 %v3647_v39, %v432_v10  ;;  %v463_v22 = vmax.f32 %v462_v12, 0.0  ;;  %v539_v51 = vadd.f32 %v538_v30, %v2117_v46  ;;  %v493_v44 = vadd.f32 %v492_v19, %v489_v4 }
 0x161   :  { %v520_v11 = vadd.f32 %v519_v31, %v516_v28  ;;  %v3651_v8 = vstv %s3638_s9  ;;  %v3652_v23 = vstv %s3640_s2  ;;  %v3654_v42 = vstv %s3641_s24  ;;  %s3670_s9 = sld [smem:[#allocation113_spill]]  ;;  %s3671_s2 = sld [smem:[#allocation114_spill]] }
 0x162   :  { %v550_v20 = vmul.f32 %v3651_v8, %v2464_v2  ;;  %v569_v60 = vmul.f32 %v3652_v23, %v2462_v25  ;;  %v436_v5 = vadd.f32 %v435_v0, %v405_v52  ;;  %v466_v56 = vmul.f32 %v3654_v42, %v463_v22  ;;  %s3674_s24 = sld [smem:[#allocation112_spill]]  ;;  %v3683_v52 = vld [vmem:[#allocation133_spill] sm:$0xff] }
 0x163   :  { %v543_v21 = vadd.f32 %v542_v43, %v539_v51  ;;  %v3656_v55 = vstv %s3643_s17  ;;  %v494_v46 = vmax.f32 %v493_v44, 0.0  ;;  %v524_v7 = vadd.f32 %v523_v18, %v520_v11  ;;  %s3675_s17 = sld [smem:[#allocation115_spill]] }
 0x164   :  { %v573_v53 = vmul.f32 %v3656_v55, %v2505_v48  ;;  %v3658_v1 = vstv %s3646_s3  ;;  %v570_v13 = vadd.f32 %v569_v60, %v2136_v34  ;;  %v467_v38 = vadd.f32 %v466_v56, %v436_v5  ;;  %s3676_s3 = sld [smem:[#allocation102_spill]] }
 0x165   :  { %v554_v35 = vmul.f32 %v3658_v1, %v2507_v61  ;;  %v547_v14 = vadd.f32 %v2120_v9, %v543_v21  ;;  %v3661_v24 = vstv %s3648_s7  ;;  %v3662_v36 = vstv %s3649_s11  ;;  %s3679_s7 = sld [smem:[#allocation97_spill]]  ;;  %s3681_s11 = sld [smem:[#allocation116_spill]]  ;;  %v3692_v21 = vld [vmem:[#allocation141_spill] sm:$0xff]  ;;  %v3695_v1 = vld [vmem:[#allocation136_spill] sm:$0xff] }
 0x166   :  { %v581_v33 = vmul.f32 %v3661_v24, %v2464_v2  ;;  %v600_v3 = vmul.f32 %v3662_v36, %v2462_v25  ;;  %v3664_v29 = vstv %s3650_s18  ;;  %v525_v54 = vmax.f32 %v524_v7, 0.0  ;;  %s3682_s18 = sld [smem:[#allocation98_spill]] }
 0x167   :  { %v497_v47 = vmul.f32 %v3664_v29, %v494_v46  ;;  %v574_v27 = vadd.f32 %v573_v53, %v570_v13  ;;  %v3666_v57 = vstv %s3653_s20  ;;  %v551_v34 = vadd.f32 %v550_v20, %v547_v14  ;;  %s3686_s20 = sld [smem:[#allocation66_spill]]  ;;  %v3700_v29 = vld [vmem:[#allocation143_spill] sm:$0xff] }
 0x168   :  { %v604_v32 = vmul.f32 %v3666_v57, %v2505_v48  ;;  %v3668_v6 = vstv %s3655_s15  ;;  %v601_v37 = vadd.f32 %v600_v3, %v2163_v17  ;;  %v3669_v19 = vstv %s3657_s6  ;;  %s3689_s15 = sld [smem:[#allocation118_spill]]  ;;  %s3691_s6 = sld [smem:[#allocation50_spill]] }
 0x169   :  { %v585_v9 = vmul.f32 %v3668_v6, %v2507_v61  ;;  %v612_v59 = vmul.f32 %v3669_v19, %v2464_v2  ;;  %v498_v26 = vadd.f32 %v497_v47, %v467_v38  ;;  %v3672_v50 = vstv %s3659_s16  ;;  %s3694_s16 = sld [smem:[#allocation121_spill]]  ;;  %v3707_v19 = vld [vmem:[#allocation142_spill] sm:$0xff] }
 0x16a   :  { %v528_v58 = vmul.f32 %v3672_v50, %v525_v54  ;;  %v578_v31 = vadd.f32 %v2146_v62, %v574_v27  ;;  %v3673_v45 = vstv %s3660_s22  ;;  %v555_v10 = vadd.f32 %v554_v35, %v551_v34  ;;  %s3698_s22 = sld [smem:[#allocation119_spill]] }
 0x16b   :  { %v631_v49 = vmul.f32 %v3673_v45, %v2462_v25  ;;  %v605_v12 = vadd.f32 %v604_v32, %v601_v37  ;;  %v3677_v17 = vstv %s3663_s29  ;;  %v3678_v30 = vstv %s3665_s13  ;;  %s3699_s29 = sld [smem:[#allocation108_spill]]  ;;  %s3702_s13 = sld [smem:[#allocation103_spill]] }
 0x16c   :  { %v616_v15 = vmul.f32 %v3677_v17, %v2507_v61  ;;  %v635_v4 = vmul.f32 %v3678_v30, %v2505_v48  ;;  %v529_v28 = vadd.f32 %v528_v58, %v498_v26  ;;  %v582_v41 = vadd.f32 %v581_v33, %v578_v31 }
 0x16d   :  { %v632_v18 = vadd.f32 %v631_v49, %v2190_v63  ;;  %v3680_v62 = vstv %s3667_s10  ;;  %v556_v43 = vmax.f32 %v555_v10, 0.0  ;;  %v609_v39 = vadd.f32 %v3683_v52, %v605_v12  ;;  %s3705_s10 = sld [smem:[#allocation125_spill]]  ;;  %v3712_v12 = vld [vmem:[#allocation147_spill] sm:$0xff] }
 0x16e   :  { %v643_v40 = vmul.f32 %v3680_v62, %v2464_v2  ;;  %v3684_v0 = vstv %s3670_s9  ;;  %v3685_v51 = vstv %s3671_s2  ;;  %v586_v11 = vadd.f32 %v585_v9, %v582_v41  ;;  %s3706_s9 = sld [smem:[#allocation106_spill]]  ;;  %s3709_s2 = sld [smem:[#allocation123_spill]] }
 0x16f   :  { %v662_v22 = vmul.f32 %v3684_v0, %v2462_v25  ;;  %v666_v44 = vmul.f32 %v3685_v51, %v2505_v48  ;;  %v636_v8 = vadd.f32 %v635_v4, %v632_v18  ;;  %v3687_v20 = vstv %s3674_s24  ;;  %s3710_s24 = sld [smem:[#allocation86_spill]] }
 0x170   :  { %v647_v63 = vmul.f32 %v3687_v20, %v2507_v61  ;;  %v3688_v23 = vstv %s3675_s17  ;;  %v3690_v5 = vstv %s3676_s3  ;;  %v613_v56 = vadd.f32 %v612_v59, %v609_v39  ;;  %s3714_s17 = sld [smem:[#allocation126_spill]]  ;;  %s3717_s3 = sld [smem:[#allocation129_spill]] }
 0x171   :  { %v674_v60 = vmul.f32 %v3688_v23, %v2464_v2  ;;  %v559_v42 = vmul.f32 %v3690_v5, %v556_v43  ;;  %v663_v55 = vadd.f32 %v662_v22, %v3692_v21  ;;  %v3693_v53 = vstv %s3679_s7  ;;  %s3718_s7 = sld [smem:[#allocation130_spill]] }
 0x172   :  { %v693_v46 = vmul.f32 %v3693_v53, %v2462_v25  ;;  %v587_v7 = vmax.f32 %v586_v11, 0.0  ;;  %v640_v35 = vadd.f32 %v3695_v1, %v636_v8  ;;  %v3696_v13 = vstv %s3681_s11  ;;  %s3721_s11 = sld [smem:[#allocation127_spill]] }
 0x173   :  { %v678_v38 = vmul.f32 %v3696_v13, %v2507_v61  ;;  %v3697_v14 = vstv %s3682_s18  ;;  %v560_v33 = vadd.f32 %v559_v42, %v529_v28  ;;  %v617_v36 = vadd.f32 %v616_v15, %v613_v56  ;;  %v3715_v28 = vld [vmem:[#allocation145_spill] sm:$0xff]  ;;  %s3722_s18 = sld [smem:[#allocation94_spill]]  ;;  %v3727_v42 = vld [vmem:[#allocation152_spill] sm:$0xff] }
 0x174   :  { %v697_v24 = vmul.f32 %v3697_v14, %v2505_v48  ;;  %v667_v3 = vadd.f32 %v666_v44, %v663_v55  ;;  %v694_v47 = vadd.f32 %v693_v46, %v3700_v29  ;;  %v3701_v54 = vstv %s3686_s20  ;;  %s3725_s20 = sld [smem:[#allocation131_spill]] }
 0x175   :  { %v590_v27 = vmul.f32 %v3701_v54, %v587_v7  ;;  %v644_v57 = vadd.f32 %v643_v40, %v640_v35  ;;  %v3703_v32 = vstv %s3689_s15  ;;  %v3704_v6 = vstv %s3691_s6  ;;  %s3730_s15 = sld [smem:[#allocation120_spill]]  ;;  %s3732_s6 = sld [smem:[#allocation132_spill]]  ;;  %v3735_v54 = vld [vmem:[#allocation155_spill] sm:$0xff] }
 0x176   :  { %v705_v34 = vmul.f32 %v3703_v32, %v2464_v2  ;;  %v724_v9 = vmul.f32 %v3704_v6, %v2462_v25  ;;  %v618_v37 = vmax.f32 %v617_v36, 0.0  ;;  %v671_v59 = vadd.f32 %v3707_v19, %v667_v3  ;;  %v3739_v6 = vld [vmem:[#allocation153_spill] sm:$0xff] }
 0x177   :  { %v698_v26 = vadd.f32 %v697_v24, %v694_v47  ;;  %v3708_v50 = vstv %s3694_s16  ;;  %v591_v31 = vadd.f32 %v590_v27, %v560_v33  ;;  %v648_v45 = vadd.f32 %v647_v63, %v644_v57  ;;  %s3737_s16 = sld [smem:[#allocation99_spill]] }
 0x178   :  { %v728_v58 = vmul.f32 %v3708_v50, %v2505_v48  ;;  %v3711_v49 = vstv %s3698_s22  ;;  %v725_v17 = vadd.f32 %v724_v9, %v3712_v12  ;;  %v3713_v15 = vstv %s3699_s29  ;;  %s3738_s22 = sld [smem:[#allocation122_spill]]  ;;  %s3740_s29 = sld [smem:[#allocation104_spill]] }
 0x179   :  { %v709_v10 = vmul.f32 %v3711_v49, %v2507_v61  ;;  %v621_v30 = vmul.f32 %v3713_v15, %v618_v37  ;;  %v675_v4 = vadd.f32 %v674_v60, %v671_v59  ;;  %v702_v41 = vadd.f32 %v3715_v28, %v698_v26  ;;  %v3726_v60 = vld [vmem:[#allocation149_spill] sm:$0xff]  ;;  %v3747_v15 = vld [vmem:[#allocation157_spill] sm:$0xff] }
 0x17a   :  { %v3716_v18 = vstv %s3702_s13  ;;  %v649_v40 = vmax.f32 %v648_v45, 0.0  ;;  %v729_v43 = vadd.f32 %v728_v58, %v725_v17  ;;  %v3719_v52 = vstv %s3705_s10  ;;  %s3743_s13 = sld [smem:[#allocation138_spill]]  ;;  %s3746_s10 = sld [smem:[#allocation144_spill]] }
 0x17b   :  { %v736_v62 = vmul.f32 %v3716_v18, %v2464_v2  ;;  %v755_v39 = vmul.f32 %v3719_v52, %v2462_v25  ;;  %v3720_v0 = vstv %s3706_s9  ;;  %v622_v51 = vadd.f32 %v621_v30, %v591_v31  ;;  %v3750_v18 = vld [vmem:[#allocation156_spill] sm:$0xff]  ;;  %s3755_s9 = sld [smem:[#allocation128_spill]] }
 0x17c   :  { %v759_v22 = vmul.f32 %v3720_v0, %v2505_v48  ;;  %v679_v44 = vadd.f32 %v678_v38, %v675_v4  ;;  %v706_v11 = vadd.f32 %v705_v34, %v702_v41  ;;  %v3723_v8 = vstv %s3709_s2  ;;  %s3763_s2 = sld [smem:[#allocation134_spill]] }
 0x17d   :  { %v740_v20 = vmul.f32 %v3723_v8, %v2507_v61  ;;  %v3724_v63 = vstv %s3710_s24  ;;  %v733_v5 = vadd.f32 %v3726_v60, %v729_v43  ;;  %v756_v56 = vadd.f32 %v755_v39, %v3727_v42  ;;  %s3790_s24 = sld [smem:[#allocation151_spill]] }
 0x17e   :  { %v652_v23 = vmul.f32 %v3724_v63, %v649_v40  ;;  %v3728_v21 = vstv %s3714_s17  ;;  %v680_v53 = vmax.f32 %v679_v44, 0.0  ;;  %v710_v46 = vadd.f32 %v709_v10, %v706_v11  ;;  %v3758_v63 = vld [vmem:[#allocation160_spill] sm:$0xff]  ;;  %s3791_s17 = sld [smem:[#allocation154_spill]] }
 0x17f   :  { %v767_v55 = vmul.f32 %v3728_v21, %v2464_v2  ;;  %v3729_v7 = vstv %s3717_s3  ;;  %v3731_v35 = vstv %s3718_s7  ;;  %v737_v14 = vadd.f32 %v736_v62, %v733_v5  ;;  %s3798_s3 = sld [smem:[#allocation167_spill]]  ;;  %s2928_s7 = sld [smem:[#allocation13 + $0x1b]] }
 0x180   :  { %v786_v1 = vmul.f32 %v3729_v7, %v2462_v25  ;;  %v790_v13 = vmul.f32 %v3731_v35, %v2505_v48  ;;  %v653_v38 = vadd.f32 %v652_v23, %v622_v51  ;;  %v760_v24 = vadd.f32 %v759_v22, %v756_v56 }
 0x181   :  { %v3733_v33 = vstv %s3721_s11  ;;  %v3734_v3 = vstv %s3722_s18  ;;  %v711_v47 = vmax.f32 %v710_v46, 0.0  ;;  %v3736_v57 = vstv %s3725_s20  ;;  %s2947_s18 = sld [smem:[#allocation11 + $0x1e]]  ;;  %s2949_s20 = sld [smem:[#allocation10 + $0xb4]] }
 0x182   :  { %v771_v36 = vmul.f32 %v3733_v33, %v2507_v61  ;;  %v683_v29 = vmul.f32 %v3734_v3, %v680_v53  ;;  %v787_v27 = vadd.f32 %v786_v1, %v3735_v54  ;;  %v798_v32 = vmul.f32 %v3736_v57, %v2464_v2  ;;  %v3761_v53 = vld [vmem:[#allocation158_spill] sm:$0xff] }
 0x183   :  { %v741_v34 = vadd.f32 %v740_v20, %v737_v14  ;;  %v764_v9 = vadd.f32 %v3739_v6, %v760_v24  ;;  %v3741_v37 = vstv %s3475_s12  ;;  %v3742_v59 = vstv %s3477_s23  ;;  %s3749_s12 = sld [smem:[#allocation148_spill]]  ;;  %s3753_s23 = sld [smem:[#allocation124_spill]]  ;;  %v3765_v24 = vld [vmem:[#allocation163_spill] sm:$0xff] }
 0x184   :  { %v817_v19 = vmul.f32 %v3741_v37, %v2462_v25  ;;  %v821_v26 = vmul.f32 %v3742_v59, %v2505_v48  ;;  %v684_v50 = vadd.f32 %v683_v29, %v653_v38  ;;  %v3744_v58 = vstv %s3730_s15  ;;  %s3809_s15 = sld [smem:[#allocation137_spill]] }
 0x185   :  { %v714_v31 = vmul.f32 %v3744_v58, %v711_v47  ;;  %v791_v45 = vadd.f32 %v790_v13, %v787_v27  ;;  %v3745_v49 = vstv %s3732_s6  ;;  %v742_v12 = vmax.f32 %v741_v34, 0.0  ;;  %v3769_v34 = vld [vmem:[#allocation161_spill] sm:$0xff]  ;;  %s2961_s6 = sld [smem:[#allocation10 + $0xb5]] }
 0x186   :  { %v802_v10 = vmul.f32 %v3745_v49, %v2507_v61  ;;  %v768_v17 = vadd.f32 %v767_v55, %v764_v9  ;;  %v818_v30 = vadd.f32 %v817_v19, %v3747_v15  ;;  %v3748_v4 = vstv %s3478_s21  ;;  %s3757_s21 = sld [smem:[#allocation150_spill]] }
 0x187   :  { %v829_v28 = vmul.f32 %v3748_v4, %v2464_v2  ;;  %v715_v41 = vadd.f32 %v714_v31, %v684_v50  ;;  %v795_v62 = vadd.f32 %v3750_v18, %v791_v45  ;;  %v3751_v40 = vstv %s3737_s16  ;;  %v3773_v31 = vld [vmem:[#allocation165_spill] sm:$0xff]  ;;  %s2964_s16 = sld [smem:[#allocation10 + $0xb6]] }
 0x188   :  { %v848_v43 = vmul.f32 %v3751_v40, %v2462_v25  ;;  %v3752_v52 = vstv %s3738_s22  ;;  %v3754_v0 = vstv %s3740_s29  ;;  %v772_v51 = vadd.f32 %v771_v36, %v768_v17  ;;  %v3775_v17 = vld [vmem:[#allocation164_spill] sm:$0xff]  ;;  %s2966_s22 = sld [smem:[#allocation10 + $0xb7]]  ;;  %s3813_s29 = sld [smem:[#allocation159_spill]] }
 0x189   :  { %v852_v39 = vmul.f32 %v3752_v52, %v2505_v48  ;;  %v745_v22 = vmul.f32 %v3754_v0, %v742_v12  ;;  %v822_v44 = vadd.f32 %v821_v26, %v818_v30  ;;  %v3756_v11 = vstv %s3743_s13  ;;  %s2975_s13 = sld [smem:[#allocation13 + $0x1c]] }
 0x18a   :  { %v833_v8 = vmul.f32 %v3756_v11, %v2507_v61  ;;  %v799_v20 = vadd.f32 %v798_v32, %v795_v62  ;;  %v849_v23 = vadd.f32 %v848_v43, %v3758_v63  ;;  %v3759_v60 = vstv %s3746_s10  ;;  %v3785_v63 = vld [vmem:[#allocation169_spill] sm:$0xff]  ;;  %s2982_s10 = sld [smem:[#allocation10 + $0xb8]] }
 0x18b   :  { %v860_v5 = vmul.f32 %v3759_v60, %v2464_v2  ;;  %v3760_v42 = vstv %s2261_s14  ;;  %v746_v21 = vadd.f32 %v745_v22, %v715_v41  ;;  %v773_v55 = vmax.f32 %v772_v51, 0.0  ;;  %s3772_s14 = sld [smem:[#allocation139_spill]] }
 0x18c   :  { %v879_v56 = vmul.f32 %v3760_v42, %v2462_v25  ;;  %v826_v46 = vadd.f32 %v3761_v53, %v822_v44  ;;  %v3762_v7 = vstv %s3749_s12  ;;  %v803_v35 = vadd.f32 %v802_v10, %v799_v20  ;;  %s2984_s12 = sld [smem:[#allocation10 + $0xb9]] }
 0x18d   :  { %v883_v1 = vmul.f32 %v3762_v7, %v2505_v48  ;;  %v853_v13 = vadd.f32 %v852_v39, %v849_v23  ;;  %v3764_v38 = vstv %s3753_s23  ;;  %v3766_v36 = vstv %s3755_s9  ;;  %s2987_s23 = sld [smem:[#allocation11 + $0x1f]]  ;;  %s2989_s9 = sld [smem:[#allocation10 + $0xba]] }
 0x18e   :  { %v864_v14 = vmul.f32 %v3764_v38, %v2507_v61  ;;  %v880_v33 = vadd.f32 %v879_v56, %v3765_v24  ;;  %v776_v3 = vmul.f32 %v3766_v36, %v773_v55  ;;  %v830_v29 = vadd.f32 %v829_v28, %v826_v46  ;;  %v3794_v36 = vld [vmem:[#allocation171_spill] sm:$0xff] }
 0x18f   :  { %v3767_v47 = vstv %s3757_s21  ;;  %v3768_v27 = vstv %s3494_s27  ;;  %v804_v32 = vmax.f32 %v803_v35, 0.0  ;;  %v857_v6 = vadd.f32 %v3769_v34, %v853_v13  ;;  %s3777_s27 = sld [smem:[#allocation162_spill]]  ;;  %s2994_s21 = sld [smem:[#allocation10 + $0xbb]] }
 0x190   :  { %v891_v54 = vmul.f32 %v3767_v47, %v2464_v2  ;;  %v910_v57 = vmul.f32 %v3768_v27, %v2462_v25  ;;  %v884_v9 = vadd.f32 %v883_v1, %v880_v33  ;;  %v3770_v37 = vstv %s3495_s0  ;;  %s3782_s0 = sld [smem:[#allocation146_spill]]  ;;  %v3797_v27 = vld [vmem:[#allocation170_spill] sm:$0xff] }
 0x191   :  { %v914_v19 = vmul.f32 %v3770_v37, %v2505_v48  ;;  %v777_v59 = vadd.f32 %v776_v3, %v746_v21  ;;  %v834_v26 = vadd.f32 %v833_v8, %v830_v29  ;;  %v3771_v50 = vstv %s2280_s28  ;;  %s3781_s28 = sld [smem:[#allocation140_spill]]  ;;  %v3784_v8 = vld [vmem:[#allocation166_spill] sm:$0xff] }
 0x192   :  { %v895_v58 = vmul.f32 %v3771_v50, %v2507_v61  ;;  %v911_v45 = vadd.f32 %v910_v57, %v3773_v31  ;;  %v3774_v49 = vstv %s3763_s2  ;;  %v861_v12 = vadd.f32 %v860_v5, %v857_v6  ;;  %s2999_s2 = sld [smem:[#allocation10 + $0xbc]] }
 0x193   :  { %v807_v10 = vmul.f32 %v3774_v49, %v804_v32  ;;  %v888_v15 = vadd.f32 %v3775_v17, %v884_v9  ;;  %v3776_v30 = vstv %s2313_s19  ;;  %v835_v28 = vmax.f32 %v834_v26, 0.0  ;;  %s2897_s19 = sld [smem:[#allocation10 + $0xaf]]  ;;  %v3804_v49 = vld [vmem:[#allocation173_spill] sm:$0xff] }
 0x194   :  { %v922_v4 = vmul.f32 %v3776_v30, %v2464_v2  ;;  %v915_v41 = vadd.f32 %v914_v19, %v911_v45  ;;  %v3778_v18 = vstv %s2334_s4  ;;  %v3779_v40 = vstv %s2341_s8  ;;  %s3789_s4 = sld [smem:[#allocation135_spill]]  ;;  %s2914_s8 = sld [smem:[#allocation10 + $0xb1]] }
 0x195   :  { %v941_v62 = vmul.f32 %v3778_v18, %v2462_v25  ;;  %v945_v43 = vmul.f32 %v3779_v40, %v2505_v48  ;;  %v808_v52 = vadd.f32 %v807_v10, %v777_v59  ;;  %v865_v39 = vadd.f32 %v864_v14, %v861_v12 }
 0x196   :  { %v892_v0 = vadd.f32 %v891_v54, %v888_v15  ;;  %v3780_v22 = vstv %s3499_s25  ;;  %v3783_v44 = vstv %s3772_s14  ;;  %v919_v20 = vadd.f32 %v3784_v8, %v915_v41  ;;  %s2912_s25 = sld [smem:[#allocation10 + $0xb0]]  ;;  %v3807_v15 = vld [vmem:[#allocation172_spill] sm:$0xff]  ;;  %s3001_s14 = sld [smem:[#allocation10 + $0xbd]] }
 0x197   :  { %v926_v51 = vmul.f32 %v3780_v22, %v2507_v61  ;;  %v838_v11 = vmul.f32 %v3783_v44, %v835_v28  ;;  %v942_v23 = vadd.f32 %v941_v62, %v3785_v63  ;;  %v3786_v60 = vstv %s2351_s1  ;;  %s2925_s1 = sld [smem:[#allocation10 + $0xb2]]  ;;  %v2955_v41 = vld [vmem:[#allocation2] sm:$0xff]  ;;  %v3812_v63 = vld [vmem:[#allocation174_spill] sm:$0xff] }
 0x198   :  { %v953_v5 = vmul.f32 %v3786_v60, %v2464_v2  ;;  %v866_v42 = vmax.f32 %v865_v39, 0.0  ;;  %v896_v56 = vadd.f32 %v895_v58, %v892_v0  ;;  %v3787_v21 = vstv %s2370_s26  ;;  %s3796_s26 = sld [smem:[#allocation117_spill]] }
 0x199   :  { %v972_v55 = vmul.f32 %v3787_v21, %v2462_v25  ;;  %v3788_v53 = vstv %s3777_s27  ;;  %v839_v7 = vadd.f32 %v838_v11, %v808_v52  ;;  %v923_v1 = vadd.f32 %v922_v4, %v919_v20  ;;  %s3006_s27 = sld [smem:[#allocation13 + $0x1d]] }
 0x19a   :  { %v976_v46 = vmul.f32 %v3788_v53, %v2505_v48  ;;  %v946_v35 = vadd.f32 %v945_v43, %v942_v23  ;;  %v3792_v13 = vstv %s3781_s28  ;;  %v3793_v14 = vstv %s3782_s0  ;;  %s3013_s28 = sld [smem:[#allocation10 + $0xbe]]  ;;  %s3015_s0 = sld [smem:[#allocation10 + $0xbf]] }
 0x19b   :  { %v957_v38 = vmul.f32 %v3792_v13, %v2507_v61  ;;  %v869_v24 = vmul.f32 %v3793_v14, %v866_v42  ;;  %v897_v33 = vmax.f32 %v896_v56, 0.0  ;;  %v973_v3 = vadd.f32 %v972_v55, %v3794_v36  ;;  %v2978_v56 = vld [vmem:[#allocation2 + $0x18] sm:$0xff] }
 0x19c   :  { %v3795_v29 = vstv %s2386_s5  ;;  %v927_v54 = vadd.f32 %v926_v51, %v923_v1  ;;  %v950_v57 = vadd.f32 %v3797_v27, %v946_v35  ;;  %v3799_v32 = vstv %s2405_s30  ;;  %s2941_s5 = sld [smem:[#allocation10 + $0xb3]]  ;;  %s3806_s30 = sld [smem:[#allocation168_spill]] }
 0x19d   :  { %v984_v47 = vmul.f32 %v3795_v29, %v2464_v2  ;;  %v1003_v34 = vmul.f32 %v3799_v32, %v2462_v25  ;;  %v3800_v6 = vstv %s3789_s4  ;;  %v870_v37 = vadd.f32 %v869_v24, %v839_v7  ;;  %s1390_s4 = sld [smem:[#allocation13 + $0x1f]] }
 0x19e   :  { %v1007_v9 = vmul.f32 %v3800_v6, %v2505_v48  ;;  %v3802_v19 = vstv %s3790_s24  ;;  %v977_v26 = vadd.f32 %v976_v46, %v973_v3  ;;  %v3803_v50 = vstv %s3791_s17 }
 0x19f   :  { %v900_v59 = vmul.f32 %v3802_v19, %v897_v33  ;;  %v988_v58 = vmul.f32 %v3803_v50, %v2507_v61  ;;  %v928_v31 = vmax.f32 %v927_v54, 0.0  ;;  %v954_v45 = vadd.f32 %v953_v5, %v950_v57 }
 0x1a0   :  { %v1004_v10 = vadd.f32 %v1003_v34, %v3804_v49  ;;  %v3805_v12 = vstv %s3796_s26  ;;  %v981_v30 = vadd.f32 %v3807_v15, %v977_v26  ;;  %v3808_v4 = vstv %s3798_s3 }
 0x1a1   :  { %v1015_v17 = vmul.f32 %v3805_v12, %v2464_v2  ;;  %v1019_v28 = vmul.f32 %v3808_v4, %v2507_v61  ;;  %v1030_v18 = vmul.f32 %v2955_v41, %v1029_v16  ;;  %v1033_v62 = vstv %s2897_s19  ;;  %s1382_s19 = sld [smem:[#allocation13 + $0x1e]] }
 0x1a2   :  { %v901_v40 = vadd.f32 %v900_v59, %v870_v37  ;;  %v958_v43 = vadd.f32 %v957_v38, %v954_v45  ;;  %v1008_v52 = vadd.f32 %v1007_v9, %v1004_v10  ;;  %v1034_v39 = vmul.f32 %v1033_v62, %v2462_v25 }
 0x1a3   :  { %v985_v0 = vadd.f32 %v984_v47, %v981_v30  ;;  %v3810_v22 = vstv %s3806_s30  ;;  %v1037_v44 = vstv %s2912_s25  ;;  %v1041_v11 = vstv %s2914_s8  ;;  %s1520_s25 = smov [#allocation14]  }
 0x1a4   :  { %v1031_v51 = vadd.f32 %v1030_v18, %v3810_v22  ;;  %v3811_v16 = vstv %s3809_s15  ;;  %v959_v20 = vmax.f32 %v958_v43, 0.0  ;;  %v1012_v23 = vadd.f32 %v3812_v63, %v1008_v52  ;;  %s1126_s8 = sshll.u32 %s1520_s25, 4  ;;  %s1127_s8 = int_to_ptr.vmem [resolvable:$true] %s1126_s8 }
 0x1a5   :  { %v931_v8 = vmul.f32 %v3811_v16, %v928_v31  ;;  %v1038_v60 = vmul.f32 %v1037_v44, %v2505_v48  ;;  %v989_v5 = vadd.f32 %v988_v58, %v985_v0  ;;  %v1042_v21 = vmul.f32 %v2978_v56, %v1041_v11  ;;  %s1481_s24 = scalar_lea.vmem %s1127_s8, 128  ;;  %p1486_p4 = scmp.lt.s32.totalorder %s1127_s8, %s1127_s8 }
 0x1a6   :  { %v1035_v42 = vadd.f32 %v1034_v39, %v1031_v51  ;;  %v1045_v55 = vstv %s2925_s1  ;;  %v992_v53 = vstv %s2928_s7  ;;  %v1016_v46 = vadd.f32 %v1015_v17, %v1012_v23  ;;  %p1482_p3 = scmp.ne.s32.totalorder %s1127_s8, %s1481_s24  ;;  %p1487_p5 = scmp.lt.s32.totalorder %s1481_s24, %s1481_s24 }
 0x1a7   :  { %v932_v7 = vadd.f32 %v931_v8, %v901_v40  ;;  %v3814_v1 = vstv %s3813_s29  ;;  %v1049_v38 = vstv %s2941_s5  ;;  %v990_v14 = vmax.f32 %v989_v5, 0.0 }
 0x1a8   :  { %v962_v35 = vmul.f32 %v3814_v1, %v959_v20  ;;  %v1039_v13 = vadd.f32 %v1038_v60, %v1035_v42  ;;  %v1046_v24 = vmul.f32 %v1045_v55, %v2464_v2  ;;  %v1058_v33 = vstv %s2947_s18  ;;  %p1488_p6 = por %p1487_p5, %p1486_p4 }
 0x1a9   :  { %v1060_v36 = vstv %s2949_s20  ;;  %v1020_v3 = vadd.f32 %v1019_v28, %v1016_v46  ;;  %v1064_v54 = vstv %s2961_s6  ;;  %v1050_v27 = vmul.f32 %v1049_v38, %v2507_v61 }
 0x1aa   :  { %v1043_v29 = vadd.f32 %v1042_v21, %v1039_v13  ;;  %v1061_v47 = vmul.f32 %v2955_v41, %v1060_v36  ;;  %v1065_v57 = vmul.f32 %v1064_v54, %v2462_v25  ;;  %v1068_v32 = vstv %s2964_s16  ;;  %p1489_p7 = pnand %p1488_p6, %p1482_p3 }
 0x1ab   :  { %v1072_v34 = vstv %s2966_s22  ;;  %v963_v6 = vadd.f32 %v962_v35, %v932_v7  ;;  %v1069_v19 = vmul.f32 %v1068_v32, %v2505_v48  ;;  %v993_v59 = vmul.f32 %v992_v53, %v990_v14 }
 0x1ac   :  { %v1047_v9 = vadd.f32 %v1046_v24, %v1043_v29  ;;  %v1062_v37 = vadd.f32 %v1061_v47, %v1058_v33  ;;  %v1023_v26 = vstv %s2975_s13  ;;  %v1021_v50 = vmax.f32 %v1020_v3, 0.0 }
 0x1ad   :  { %v1073_v31 = vmul.f32 %v2978_v56, %v1072_v34  ;;  %v1076_v45 = vstv %s2982_s10  ;;  %v1080_v10 = vstv %s2984_s12  ;;  %v1089_v12 = vstv %s2987_s23 }
 0x1ae   :  { %v1066_v58 = vadd.f32 %v1065_v57, %v1062_v37  ;;  %v1051_v49 = vadd.f32 %v1050_v27, %v1047_v9  ;;  %v1091_v17 = vstv %s2989_s9  ;;  %v994_v15 = vadd.f32 %v993_v59, %v963_v6 }
 0x1af   :  { %v1092_v4 = vmul.f32 %v2955_v41, %v1091_v17  ;;  %v1095_v28 = vstv %s2994_s21  ;;  %v1077_v18 = vmul.f32 %v1076_v45, %v2464_v2  ;;  %v1099_v40 = vstv %s2999_s2 }
 0x1b0   :  { %v1070_v30 = vadd.f32 %v1069_v19, %v1066_v58  ;;  %v1096_v62 = vmul.f32 %v1095_v28, %v2462_v25  ;;  %v1103_v43 = vstv %s3001_s14  ;;  %v1081_v39 = vmul.f32 %v1080_v10, %v2507_v61 }
 0x1b1   :  { %v1093_v0 = vadd.f32 %v1092_v4, %v1089_v12  ;;  %v1100_v22 = vmul.f32 %v1099_v40, %v2505_v48  ;;  %v1052_v51 = vmax.f32 %v1051_v49, 0.0  ;;  %v1054_v44 = vstv %s3006_s27 }
 0x1b2   :  { %v1074_v52 = vadd.f32 %v1073_v31, %v1070_v30  ;;  %v1024_v11 = vmul.f32 %v1023_v26, %v1021_v50  ;;  %v1104_v8 = vmul.f32 %v2978_v56, %v1103_v43  ;;  %v1107_v20 = vstv %s3013_s28 }
 0x1b3   :  { %v1097_v16 = vadd.f32 %v1096_v62, %v1093_v0  ;;  %v1111_v63 = vstv %s3015_s0  ;;  %v1055_v5 = vmul.f32 %v1054_v44, %v1052_v51  ;;  %v1108_v55 = vmul.f32 %v1107_v20, %v2464_v2 }
 0x1b4   :  { %v1078_v41 = vadd.f32 %v1077_v18, %v1074_v52  ;;  %v1025_v23 = vadd.f32 %v1024_v11, %v994_v15  ;;  %v1112_v48 = vmul.f32 %v1111_v63, %v2507_v61  ;;  %v1085_v53 = vstv %s1382_s19 }
 0x1b5   :  { %v1101_v60 = vadd.f32 %v1100_v22, %v1097_v16  ;;  %v1116_v13 = vstv %s1390_s4 }
 0x1b6   :  { %v1082_v25 = vadd.f32 %v1081_v39, %v1078_v41  ;;  %v1056_v46 = vadd.f32 %v1055_v5, %v1025_v23 }
 0x1b7   :  { %v1105_v21 = vadd.f32 %v1104_v8, %v1101_v60 }
 0x1b8   :  { %v1083_v42 = vmax.f32 %v1082_v25, 0.0 }
 0x1b9   :  { %v1109_v7 = vadd.f32 %v1108_v55, %v1105_v21 }
 0x1ba   :  { %v1086_v1 = vmul.f32 %v1085_v53, %v1083_v42 }
 0x1bb   :  { %v1113_v35 = vadd.f32 %v1112_v48, %v1109_v7 }
 0x1bc   :  { %v1087_v56 = vadd.f32 %v1086_v1, %v1056_v46 }
 0x1bd   :  { %v1114_v38 = vmax.f32 %v1113_v35, 0.0 }
 0x1bf   :  { %v1117_v14 = vmul.f32 %v1116_v13, %v1114_v38 }
 0x1c1   :  { %v1118_v24 = vadd.f32 %v1117_v14, %v1087_v56 }
 0x1c3   :  { %1119 = vst.msk [vmem:[#allocation14] sm:$0xff] %vm86_vm0, %v1118_v24 }
 0x1c4   :  { %1492 = shalt.err (!%p1489_p7)
}
 0x1c5   :  { %s3815_s1 = sld [smem:[#allocation176_spill]] }
 0x1cb   :  { %s1493_s3 = scalar_lea.hbm %s3815_s1, 128 }
 0x1cc   :  { %p1494_p8 = scmp.ne.s32.totalorder %s3815_s1, %s1493_s3  ;;  %p1497_p9 = scmp.lt.u32.totalorder %s1493_s3, %s3815_s1 }
 0x1ce   :  { %p1499_p10 = pnand %p1497_p9, %p1494_p8 }
 0x1d0   :  { %1502 = shalt.err (!%p1499_p10)
}
 0x1d1   :  { %1129 = dma.vmem_to_hbm [thread:$0]  %s1127_s8, 128, %s3815_s1, [#allocation6]  }
 0x1d2   :  { %1511 = dma.done.wait [#allocation6], 128  }
 0x1d3   :  { %1512 = vsyncadd [#allocation6], 4294967168 }
 0x1d4   :  { %1133 = vsyncpa [#allocation5], 1 }
 0x1d5   :  { %1134 = vsyncpa [#allocation9], 1 }
 0x1d6   :  { %1135 = vsyncpa [#allocation6], 1 }
 0x1d7   :  { %1136 = vsyncpa [#allocation7], 1 }
 0x1d8   :  { %1137 = vsyncpa [#allocation12], 1 }

</bundles_post_ra>
